<compile_context>
chip_gen: v7x
topology: tpu7x:2x2x1
jax: 0.10.0
libtpu: 0.0.40
codegen_flags: <defaults>
</compile_context>

<pallas_src>
import functools

import jax
import jax.numpy as jnp
from jax import lax
from jax.experimental import pallas as pl
from jax.experimental.pallas import tpu as pltpu

EPS = 1e-5


# ----------------------------- Pallas kernel -------------------------------

def _bottleneck_kernel(x_ref, mask_ref,
                       w1_ref, s1_ref, b1_ref, a1_ref,
                       w2_ref, s2_ref, b2_ref, a2_ref,
                       o_ref, slab_ref, *, H, W, C):
    """Fused Bottleneck_b for ONE image: out = block2(block1(x)) + x.

    x_ref    : ((H+2)*(W+2), C) bf16  spatially padded input, rows flattened (W+2)-major
    mask_ref : (L, 1) f32             1.0 on real output columns, 0.0 on the 2 wrap-junk
                                      columns per image row; L = (H-1)*(W+2) + W
    w*_ref   : (9, C, C) bf16         ACB-folded 3x3 weights (per-branch BN folded in)
    s*/b*/a* : (1, C) f32             bn1 scale, bn1-folded bias, PReLU slope
    o_ref    : (L, C) f32             "wide-row" output (junk columns stripped in wrapper)
    slab_ref : ((H+2)*(W+2), C) f32   VMEM scratch: block1 output embedded with the zero
                                      ring that implements block2's pad=1
    """
    Wp = W + 2
    L = (H - 1) * Wp + W
    base = Wp + 1                                   # slab row of output position (0, 0)
    offs = [base + di * Wp + dj for di in (-1, 0, 1) for dj in (-1, 0, 1)]

    # ---- block1: 3x3 ACBConv as 9 shifted-slice matmuls (in-kernel im2col) ----
    acc1 = jnp.zeros((L, C), jnp.float32)
    for k, s in enumerate(offs):
        acc1 = acc1 + jnp.dot(x_ref[s:s + L, :], w1_ref[k],
                              preferred_element_type=jnp.float32)
    z1 = acc1 * s1_ref[...] + b1_ref[...]           # bn1 applied in f32 epilogue
    y1 = jnp.where(z1 > 0, z1, a1_ref[...] * z1)    # PReLU

    # ---- re-embed block1 output into a zero-bordered slab (block2's zero padding) ----
    slab_ref[...] = jnp.zeros_like(slab_ref)
    slab_ref[base:base + L, :] = y1 * mask_ref[...]  # junk columns -> zero padding

    # ---- block2 (reads only VMEM-resident data) ----
    acc2 = jnp.zeros((L, C), jnp.float32)
    for k, s in enumerate(offs):
        acc2 = acc2 + jnp.dot(slab_ref[s:s + L, :].astype(jnp.bfloat16), w2_ref[k],
                              preferred_element_type=jnp.float32)
    z2 = acc2 * s2_ref[...] + b2_ref[...]
    y2 = jnp.where(z2 > 0, z2, a2_ref[...] * z2)

    # ---- fused residual: original x is the center tap, already resident in VMEM ----
    o_ref[...] = y2 + x_ref[base:base + L, :].astype(jnp.float32)


# ------------------------------ Pallas wrapper -------------------------------

def bottleneck_b_forward(x_nchw, folded):
    """Bottleneck_b: temp = x; out = block2(block1(x)); return out + temp.  NCHW in/out."""
    N, C, H, W = x_nchw.shape
    Wp = W + 2
    P = (H + 2) * Wp
    L = (H - 1) * Wp + W

    # NCHW -> NHWC, spatial zero pad (pad=1), flatten rows, bf16 for the HBM read.
    x_nhwc = jnp.transpose(x_nchw, (0, 2, 3, 1))
    slab = jnp.pad(x_nhwc, ((0, 0), (1, 1), (1, 1), (0, 0))).astype(jnp.bfloat16)
    slab = slab.reshape(N, P, C)

    # Wide-row junk-column mask (the 2 horizontal-wrap columns per image row).
    col = (jnp.arange(L, dtype=jnp.int32) + Wp + 1) % Wp
    mask = ((col >= 1) & (col <= W)).astype(jnp.float32)[:, None]       # (L, 1)

    f1, f2 = folded["block1"], folded["block2"]
    kernel = functools.partial(_bottleneck_kernel, H=H, W=W, C=C)

    row = pl.BlockSpec((1, C), lambda n: (0, 0))                         # grid-invariant
    wsp = pl.BlockSpec((9, C, C), lambda n: (0, 0, 0))                   # grid-invariant

    flops = N * 2 * 9 * 2 * L * C * C
    bytes_accessed = (N * (P * C * 2 + L * C * 4) + L * 4
                      + 2 * (9 * C * C * 2 + 3 * C * 4))
    cost = pl.CostEstimate(flops=flops, transcendentals=0, bytes_accessed=bytes_accessed)

    out_wide = pl.pallas_call(
        kernel,
        out_shape=jax.ShapeDtypeStruct((N, L, C), jnp.float32),
        grid=(N,),
        in_specs=[
            pl.BlockSpec((None, P, C), lambda n: (n, 0, 0)),   # per-image padded slab
            pl.BlockSpec((L, 1), lambda n: (0, 0)),            # junk-column mask
            wsp, row, row, row,                                # block1 w / bn1 scale / bias / alpha
            wsp, row, row, row,                                # block2 w / bn1 scale / bias / alpha
        ],
        out_specs=pl.BlockSpec((None, L, C), lambda n: (n, 0, 0)),
        scratch_shapes=[pltpu.VMEM((P, C), jnp.float32)],
        compiler_params=pltpu.CompilerParams(
            dimension_semantics=("parallel",),        # shard images across v7x's 2 TCs
            vmem_limit_bytes=48 * 1024 * 1024,        # headroom under v7x's 64 MiB VMEM
        ),
        cost_estimate=cost,
    )(slab, mask,
      f1["w"], f1["scale"], f1["bias"], f1["alpha"],
      f2["w"], f2["scale"], f2["bias"], f2["alpha"])

    # Strip the 2 junk columns per image row: (N, L, C) -> (N, H, W, C) -> NCHW.
    out_wide = jnp.pad(out_wide, ((0, 0), (0, H * Wp - L), (0, 0)))
    out = out_wide.reshape(N, H, Wp, C)[:, :, :W, :]
    return jnp.transpose(out, (0, 3, 1, 2))


# --------------------------- Parameters & folding -----------------------------

def _bn_params(key, c):
    kg, kb, km, kv = jax.random.split(key, 4)
    return dict(
        gamma=1.0 + 0.1 * jax.random.normal(kg, (c,), jnp.float32),
        beta=0.1 * jax.random.normal(kb, (c,), jnp.float32),
        mean=0.1 * jax.random.normal(km, (c,), jnp.float32),
        var=jax.random.uniform(kv, (c,), jnp.float32, minval=0.5, maxval=1.5),
    )


def _bn_scale_shift(bn):
    scale = bn["gamma"] / jnp.sqrt(bn["var"] + EPS)
    shift = bn["beta"] - bn["mean"] * scale
    return scale, shift


def init_basic_block_raw(key, cin, cout):
    keys = jax.random.split(key, 7)

    def conv_w(k, kh, kw):
        std = (2.0 / (cout * kh * kw)) ** 0.5   # kaiming_normal fan_out
        return std * jax.random.normal(k, (kh, kw, cin, cout), jnp.float32)

    return dict(
        w_sq=conv_w(keys[0], 3, 3),
        w_v=conv_w(keys[1], 3, 1),
        w_h=conv_w(keys[2], 1, 3),
        bn_sq=_bn_params(keys[3], cout),
        bn_v=_bn_params(keys[4], cout),
        bn_h=_bn_params(keys[5], cout),
        bn1=_bn_params(keys[6], cout),
        alpha=jnp.full((cout,), 0.25, jnp.float32),          # PReLU init
    )


def fold_basic_block(raw):
    """ACNet deploy fusion + per-branch BN folded into one 3x3 weight; bn1 stays in the
    f32 epilogue as (scale, bias) so the bf16 weight dynamic range stays small."""
    ss, bs = _bn_scale_shift(raw["bn_sq"])
    sv, bv = _bn_scale_shift(raw["bn_v"])
    sh, bh = _bn_scale_shift(raw["bn_h"])
    s1, t1 = _bn_scale_shift(raw["bn1"])

    w = raw["w_sq"] * ss                                     # (3, 3, cin, cout)
    w = w.at[:, 1:2, :, :].add(raw["w_v"] * sv)              # 3x1 branch -> center column
    w = w.at[1:2, :, :, :].add(raw["w_h"] * sh)              # 1x3 branch -> center row
    bias_br = bs + bv + bh                                   # summed branch-BN shifts

    cin, cout = w.shape[2], w.shape[3]
    return dict(
        w=w.reshape(9, cin, cout).astype(jnp.bfloat16),      # per-tap (cin, cout) bf16
        scale=s1.reshape(1, cout).astype(jnp.float32),       # bn1 scale (epilogue)
        bias=(bias_br * s1 + t1).reshape(1, cout).astype(jnp.float32),
        alpha=raw["alpha"].reshape(1, cout).astype(jnp.float32),
    )


# --------------------------- Pure-JAX reference (f32) -------------------------

def _conv_nhwc(x, w, padding):
    return lax.conv_general_dilated(x, w, window_strides=(1, 1), padding=padding,
                                    dimension_numbers=("NHWC", "HWIO", "NHWC"))


def _bn_apply(y, bn):
    scale, shift = _bn_scale_shift(bn)
    return y * scale + shift


def reference_basic_block(x, raw):
    sq = _bn_apply(_conv_nhwc(x, raw["w_sq"], [(1, 1), (1, 1)]), raw["bn_sq"])
    ve = _bn_apply(_conv_nhwc(x, raw["w_v"], [(1, 1), (0, 0)]), raw["bn_v"])
    ho = _bn_apply(_conv_nhwc(x, raw["w_h"], [(0, 0), (1, 1)]), raw["bn_h"])
    y = _bn_apply(sq + ve + ho, raw["bn1"])
    return jnp.where(y > 0, y, raw["alpha"] * y)


def reference_bottleneck_b(x_nchw, raw):
    x = jnp.transpose(x_nchw, (0, 2, 3, 1))
    out = reference_basic_block(x, raw["block1"])
    out = reference_basic_block(out, raw["block2"])
    out = out + x
    return jnp.transpose(out, (0, 3, 1, 2))


# ------------------------------- main -----------------------------------------

if __name__ == "__main__":
    key = jax.random.PRNGKey(0)
    kx, k1, k2 = jax.random.split(key, 3)

    # Bottleneck_b(inplanes, planes, k=3, stride=1, pad=1, r): residual add out + x
    # requires inplanes == planes and stride 1.  Small deterministic shapes:
    N, C, H, W = 2, 16, 16, 16
    x = jax.random.normal(kx, (N, C, H, W), jnp.float32)

    raw = dict(block1=init_basic_block_raw(k1, C, C),
               block2=init_basic_block_raw(k2, C, C))
    folded = dict(block1=fold_basic_block(raw["block1"]),
                  block2=fold_basic_block(raw["block2"]))

    fwd = jax.jit(lambda xx: bottleneck_b_forward(xx, folded))
    out = fwd(x)
    jax.block_until_ready(out)

    assert out.shape == (N, C, H, W), out.shape
    assert out.dtype == jnp.float32

    # Sanity check against a pure-JAX f32 three-branch reference (kernel uses bf16 matmuls).
    ref = reference_bottleneck_b(x, raw)
    err = float(jnp.max(jnp.abs(out - ref)))
    tol = 5e-2 * (1.0 + float(jnp.max(jnp.abs(ref))))
    assert err < tol, (err, tol)

    print("KERNEL_OK")
</pallas_src>

<mosaic_0001>
module attributes {stable_mosaic.version = 11 : i64} {
  func.func @_bottleneck_kernel(%arg0: i32, %arg1: memref<1x324x16xbf16, #tpu.memory_space<vmem>>, %arg2: memref<286x1xf32, #tpu.memory_space<vmem>>, %arg3: memref<9x16x16xbf16, #tpu.memory_space<vmem>>, %arg4: memref<1x16xf32, #tpu.memory_space<vmem>>, %arg5: memref<1x16xf32, #tpu.memory_space<vmem>>, %arg6: memref<1x16xf32, #tpu.memory_space<vmem>>, %arg7: memref<9x16x16xbf16, #tpu.memory_space<vmem>>, %arg8: memref<1x16xf32, #tpu.memory_space<vmem>>, %arg9: memref<1x16xf32, #tpu.memory_space<vmem>>, %arg10: memref<1x16xf32, #tpu.memory_space<vmem>>, %arg11: memref<1x286x16xf32, #tpu.memory_space<vmem>>, %arg12: memref<324x16xf32, #tpu.memory_space<vmem>>) attributes {dimension_semantics = [#tpu.dimension_semantics<parallel>], iteration_bounds = array<i64: 2>, scalar_prefetch = 0 : i64, scratch_operands = 1 : i64, tpu.core_type = #tpu.core_type<tc>, window_params = [{transform_indices = @transform_0, window_bounds = array<i64: 1, 324, 16>}, {pipeline_mode = #tpu.pipeline_mode<synchronous>, transform_indices = @transform_1, window_bounds = array<i64: 286, 1>}, {pipeline_mode = #tpu.pipeline_mode<synchronous>, transform_indices = @transform_2, window_bounds = array<i64: 9, 16, 16>}, {pipeline_mode = #tpu.pipeline_mode<synchronous>, transform_indices = @transform_3, window_bounds = array<i64: 1, 16>}, {pipeline_mode = #tpu.pipeline_mode<synchronous>, transform_indices = @transform_4, window_bounds = array<i64: 1, 16>}, {pipeline_mode = #tpu.pipeline_mode<synchronous>, transform_indices = @transform_5, window_bounds = array<i64: 1, 16>}, {pipeline_mode = #tpu.pipeline_mode<synchronous>, transform_indices = @transform_6, window_bounds = array<i64: 9, 16, 16>}, {pipeline_mode = #tpu.pipeline_mode<synchronous>, transform_indices = @transform_7, window_bounds = array<i64: 1, 16>}, {pipeline_mode = #tpu.pipeline_mode<synchronous>, transform_indices = @transform_8, window_bounds = array<i64: 1, 16>}, {pipeline_mode = #tpu.pipeline_mode<synchronous>, transform_indices = @transform_9, window_bounds = array<i64: 1, 16>}, {transform_indices = @transform_10, window_bounds = array<i64: 1, 286, 16>}]} {
    %cst = arith.constant 0.000000e+00 : f32
    %0 = vector.broadcast %cst : f32 to vector<286x16xf32>
    %c0 = arith.constant 0 : index
    %c0_0 = arith.constant 0 : index
    %c0_1 = arith.constant 0 : index
    %1 = vector.load %arg1[%c0, %c0_0, %c0_1] : memref<1x324x16xbf16, #tpu.memory_space<vmem>>, vector<1x286x16xbf16>
    %2 = vector.shape_cast %1 : vector<1x286x16xbf16> to vector<286x16xbf16>
    %c0_2 = arith.constant 0 : index
    %c0_3 = arith.constant 0 : index
    %c0_4 = arith.constant 0 : index
    %3 = vector.load %arg3[%c0_2, %c0_3, %c0_4] : memref<9x16x16xbf16, #tpu.memory_space<vmem>>, vector<1x16x16xbf16>
    %4 = vector.shape_cast %3 : vector<1x16x16xbf16> to vector<16x16xbf16>
    %cst_5 = arith.constant dense<0.000000e+00> : vector<286x16xf32>
    %5 = tpu.matmul %2, %4, %cst_5 {dimension_numbers = #tpu.dot_dimension_numbers<[1], [0], [0], [1], [0, 0, 1, 1], [], []>} : vector<286x16xbf16>, vector<16x16xbf16>, vector<286x16xf32> -> vector<286x16xf32>
    %6 = arith.addf %0, %5 : vector<286x16xf32>
    %c0_6 = arith.constant 0 : index
    %c1 = arith.constant 1 : index
    %c0_7 = arith.constant 0 : index
    %7 = vector.load %arg1[%c0_6, %c1, %c0_7] : memref<1x324x16xbf16, #tpu.memory_space<vmem>>, vector<1x286x16xbf16>
    %8 = vector.shape_cast %7 : vector<1x286x16xbf16> to vector<286x16xbf16>
    %c1_8 = arith.constant 1 : index
    %c0_9 = arith.constant 0 : index
    %c0_10 = arith.constant 0 : index
    %9 = vector.load %arg3[%c1_8, %c0_9, %c0_10] : memref<9x16x16xbf16, #tpu.memory_space<vmem>>, vector<1x16x16xbf16>
    %10 = vector.shape_cast %9 : vector<1x16x16xbf16> to vector<16x16xbf16>
    %cst_11 = arith.constant dense<0.000000e+00> : vector<286x16xf32>
    %11 = tpu.matmul %8, %10, %cst_11 {dimension_numbers = #tpu.dot_dimension_numbers<[1], [0], [0], [1], [0, 0, 1, 1], [], []>} : vector<286x16xbf16>, vector<16x16xbf16>, vector<286x16xf32> -> vector<286x16xf32>
    %12 = arith.addf %6, %11 : vector<286x16xf32>
    %c0_12 = arith.constant 0 : index
    %c2 = arith.constant 2 : index
    %c0_13 = arith.constant 0 : index
    %13 = vector.load %arg1[%c0_12, %c2, %c0_13] : memref<1x324x16xbf16, #tpu.memory_space<vmem>>, vector<1x286x16xbf16>
    %14 = vector.shape_cast %13 : vector<1x286x16xbf16> to vector<286x16xbf16>
    %c2_14 = arith.constant 2 : index
    %c0_15 = arith.constant 0 : index
    %c0_16 = arith.constant 0 : index
    %15 = vector.load %arg3[%c2_14, %c0_15, %c0_16] : memref<9x16x16xbf16, #tpu.memory_space<vmem>>, vector<1x16x16xbf16>
    %16 = vector.shape_cast %15 : vector<1x16x16xbf16> to vector<16x16xbf16>
    %cst_17 = arith.constant dense<0.000000e+00> : vector<286x16xf32>
    %17 = tpu.matmul %14, %16, %cst_17 {dimension_numbers = #tpu.dot_dimension_numbers<[1], [0], [0], [1], [0, 0, 1, 1], [], []>} : vector<286x16xbf16>, vector<16x16xbf16>, vector<286x16xf32> -> vector<286x16xf32>
    %18 = arith.addf %12, %17 : vector<286x16xf32>
    %c0_18 = arith.constant 0 : index
    %c18 = arith.constant 18 : index
    %c0_19 = arith.constant 0 : index
    %19 = vector.load %arg1[%c0_18, %c18, %c0_19] : memref<1x324x16xbf16, #tpu.memory_space<vmem>>, vector<1x286x16xbf16>
    %20 = vector.shape_cast %19 : vector<1x286x16xbf16> to vector<286x16xbf16>
    %c3 = arith.constant 3 : index
    %c0_20 = arith.constant 0 : index
    %c0_21 = arith.constant 0 : index
    %21 = vector.load %arg3[%c3, %c0_20, %c0_21] : memref<9x16x16xbf16, #tpu.memory_space<vmem>>, vector<1x16x16xbf16>
    %22 = vector.shape_cast %21 : vector<1x16x16xbf16> to vector<16x16xbf16>
    %cst_22 = arith.constant dense<0.000000e+00> : vector<286x16xf32>
    %23 = tpu.matmul %20, %22, %cst_22 {dimension_numbers = #tpu.dot_dimension_numbers<[1], [0], [0], [1], [0, 0, 1, 1], [], []>} : vector<286x16xbf16>, vector<16x16xbf16>, vector<286x16xf32> -> vector<286x16xf32>
    %24 = arith.addf %18, %23 : vector<286x16xf32>
    %c0_23 = arith.constant 0 : index
    %c19 = arith.constant 19 : index
    %c0_24 = arith.constant 0 : index
    %25 = vector.load %arg1[%c0_23, %c19, %c0_24] : memref<1x324x16xbf16, #tpu.memory_space<vmem>>, vector<1x286x16xbf16>
    %26 = vector.shape_cast %25 : vector<1x286x16xbf16> to vector<286x16xbf16>
    %c4 = arith.constant 4 : index
    %c0_25 = arith.constant 0 : index
    %c0_26 = arith.constant 0 : index
    %27 = vector.load %arg3[%c4, %c0_25, %c0_26] : memref<9x16x16xbf16, #tpu.memory_space<vmem>>, vector<1x16x16xbf16>
    %28 = vector.shape_cast %27 : vector<1x16x16xbf16> to vector<16x16xbf16>
    %cst_27 = arith.constant dense<0.000000e+00> : vector<286x16xf32>
    %29 = tpu.matmul %26, %28, %cst_27 {dimension_numbers = #tpu.dot_dimension_numbers<[1], [0], [0], [1], [0, 0, 1, 1], [], []>} : vector<286x16xbf16>, vector<16x16xbf16>, vector<286x16xf32> -> vector<286x16xf32>
    %30 = arith.addf %24, %29 : vector<286x16xf32>
    %c0_28 = arith.constant 0 : index
    %c20 = arith.constant 20 : index
    %c0_29 = arith.constant 0 : index
    %31 = vector.load %arg1[%c0_28, %c20, %c0_29] : memref<1x324x16xbf16, #tpu.memory_space<vmem>>, vector<1x286x16xbf16>
    %32 = vector.shape_cast %31 : vector<1x286x16xbf16> to vector<286x16xbf16>
    %c5 = arith.constant 5 : index
    %c0_30 = arith.constant 0 : index
    %c0_31 = arith.constant 0 : index
    %33 = vector.load %arg3[%c5, %c0_30, %c0_31] : memref<9x16x16xbf16, #tpu.memory_space<vmem>>, vector<1x16x16xbf16>
    %34 = vector.shape_cast %33 : vector<1x16x16xbf16> to vector<16x16xbf16>
    %cst_32 = arith.constant dense<0.000000e+00> : vector<286x16xf32>
    %35 = tpu.matmul %32, %34, %cst_32 {dimension_numbers = #tpu.dot_dimension_numbers<[1], [0], [0], [1], [0, 0, 1, 1], [], []>} : vector<286x16xbf16>, vector<16x16xbf16>, vector<286x16xf32> -> vector<286x16xf32>
    %36 = arith.addf %30, %35 : vector<286x16xf32>
    %c0_33 = arith.constant 0 : index
    %c36 = arith.constant 36 : index
    %c0_34 = arith.constant 0 : index
    %37 = vector.load %arg1[%c0_33, %c36, %c0_34] : memref<1x324x16xbf16, #tpu.memory_space<vmem>>, vector<1x286x16xbf16>
    %38 = vector.shape_cast %37 : vector<1x286x16xbf16> to vector<286x16xbf16>
    %c6 = arith.constant 6 : index
    %c0_35 = arith.constant 0 : index
    %c0_36 = arith.constant 0 : index
    %39 = vector.load %arg3[%c6, %c0_35, %c0_36] : memref<9x16x16xbf16, #tpu.memory_space<vmem>>, vector<1x16x16xbf16>
    %40 = vector.shape_cast %39 : vector<1x16x16xbf16> to vector<16x16xbf16>
    %cst_37 = arith.constant dense<0.000000e+00> : vector<286x16xf32>
    %41 = tpu.matmul %38, %40, %cst_37 {dimension_numbers = #tpu.dot_dimension_numbers<[1], [0], [0], [1], [0, 0, 1, 1], [], []>} : vector<286x16xbf16>, vector<16x16xbf16>, vector<286x16xf32> -> vector<286x16xf32>
    %42 = arith.addf %36, %41 : vector<286x16xf32>
    %c0_38 = arith.constant 0 : index
    %c37 = arith.constant 37 : index
    %c0_39 = arith.constant 0 : index
    %43 = vector.load %arg1[%c0_38, %c37, %c0_39] : memref<1x324x16xbf16, #tpu.memory_space<vmem>>, vector<1x286x16xbf16>
    %44 = vector.shape_cast %43 : vector<1x286x16xbf16> to vector<286x16xbf16>
    %c7 = arith.constant 7 : index
    %c0_40 = arith.constant 0 : index
    %c0_41 = arith.constant 0 : index
    %45 = vector.load %arg3[%c7, %c0_40, %c0_41] : memref<9x16x16xbf16, #tpu.memory_space<vmem>>, vector<1x16x16xbf16>
    %46 = vector.shape_cast %45 : vector<1x16x16xbf16> to vector<16x16xbf16>
    %cst_42 = arith.constant dense<0.000000e+00> : vector<286x16xf32>
    %47 = tpu.matmul %44, %46, %cst_42 {dimension_numbers = #tpu.dot_dimension_numbers<[1], [0], [0], [1], [0, 0, 1, 1], [], []>} : vector<286x16xbf16>, vector<16x16xbf16>, vector<286x16xf32> -> vector<286x16xf32>
    %48 = arith.addf %42, %47 : vector<286x16xf32>
    %c0_43 = arith.constant 0 : index
    %c38 = arith.constant 38 : index
    %c0_44 = arith.constant 0 : index
    %49 = vector.load %arg1[%c0_43, %c38, %c0_44] : memref<1x324x16xbf16, #tpu.memory_space<vmem>>, vector<1x286x16xbf16>
    %50 = vector.shape_cast %49 : vector<1x286x16xbf16> to vector<286x16xbf16>
    %c8 = arith.constant 8 : index
    %c0_45 = arith.constant 0 : index
    %c0_46 = arith.constant 0 : index
    %51 = vector.load %arg3[%c8, %c0_45, %c0_46] : memref<9x16x16xbf16, #tpu.memory_space<vmem>>, vector<1x16x16xbf16>
    %52 = vector.shape_cast %51 : vector<1x16x16xbf16> to vector<16x16xbf16>
    %cst_47 = arith.constant dense<0.000000e+00> : vector<286x16xf32>
    %53 = tpu.matmul %50, %52, %cst_47 {dimension_numbers = #tpu.dot_dimension_numbers<[1], [0], [0], [1], [0, 0, 1, 1], [], []>} : vector<286x16xbf16>, vector<16x16xbf16>, vector<286x16xf32> -> vector<286x16xf32>
    %54 = arith.addf %48, %53 : vector<286x16xf32>
    %c0_48 = arith.constant 0 : index
    %c0_49 = arith.constant 0 : index
    %55 = vector.load %arg4[%c0_48, %c0_49] : memref<1x16xf32, #tpu.memory_space<vmem>>, vector<1x16xf32>
    %56 = vector.broadcast %55 : vector<1x16xf32> to vector<286x16xf32>
    %57 = arith.mulf %54, %56 : vector<286x16xf32>
    %c0_50 = arith.constant 0 : index
    %c0_51 = arith.constant 0 : index
    %58 = vector.load %arg5[%c0_50, %c0_51] : memref<1x16xf32, #tpu.memory_space<vmem>>, vector<1x16xf32>
    %59 = vector.broadcast %58 : vector<1x16xf32> to vector<286x16xf32>
    %60 = arith.addf %57, %59 : vector<286x16xf32>
    %cst_52 = arith.constant 0.000000e+00 : f32
    %61 = vector.broadcast %cst_52 : f32 to vector<286x16xf32>
    %62 = arith.cmpf ogt, %60, %61 : vector<286x16xf32>
    %c0_53 = arith.constant 0 : index
    %c0_54 = arith.constant 0 : index
    %63 = vector.load %arg6[%c0_53, %c0_54] : memref<1x16xf32, #tpu.memory_space<vmem>>, vector<1x16xf32>
    %64 = vector.broadcast %63 : vector<1x16xf32> to vector<286x16xf32>
    %65 = arith.mulf %64, %60 : vector<286x16xf32>
    %66 = arith.select %62, %60, %65 : vector<286x16xi1>, vector<286x16xf32>
    %cst_55 = arith.constant 0.000000e+00 : f32
    %67 = vector.broadcast %cst_55 : f32 to vector<324x16xf32>
    %c0_56 = arith.constant 0 : index
    %c0_57 = arith.constant 0 : index
    %68 = vector.load %arg12[%c0_56, %c0_57] : memref<324x16xf32, #tpu.memory_space<vmem>>, vector<324x16xf32>
    tpu.vector_store %arg12[%c0_56, %c0_57], %67 {strides = array<i32>} : memref<324x16xf32, #tpu.memory_space<vmem>>, vector<324x16xf32>,
    %c0_58 = arith.constant 0 : index
    %c0_59 = arith.constant 0 : index
    %69 = vector.load %arg2[%c0_58, %c0_59] : memref<286x1xf32, #tpu.memory_space<vmem>>, vector<286x1xf32>
    %70 = vector.broadcast %69 : vector<286x1xf32> to vector<286x16xf32>
    %71 = arith.mulf %66, %70 : vector<286x16xf32>
    %c19_60 = arith.constant 19 : index
    %c0_61 = arith.constant 0 : index
    %72 = vector.load %arg12[%c19_60, %c0_61] : memref<324x16xf32, #tpu.memory_space<vmem>>, vector<286x16xf32>
    tpu.vector_store %arg12[%c19_60, %c0_61], %71 {strides = array<i32>} : memref<324x16xf32, #tpu.memory_space<vmem>>, vector<286x16xf32>,
    %cst_62 = arith.constant 0.000000e+00 : f32
    %73 = vector.broadcast %cst_62 : f32 to vector<286x16xf32>
    %c0_63 = arith.constant 0 : index
    %c0_64 = arith.constant 0 : index
    %74 = vector.load %arg12[%c0_63, %c0_64] : memref<324x16xf32, #tpu.memory_space<vmem>>, vector<286x16xf32>
    %75 = arith.truncf %74 : vector<286x16xf32> to vector<286x16xbf16>
    %c0_65 = arith.constant 0 : index
    %c0_66 = arith.constant 0 : index
    %c0_67 = arith.constant 0 : index
    %76 = vector.load %arg7[%c0_65, %c0_66, %c0_67] : memref<9x16x16xbf16, #tpu.memory_space<vmem>>, vector<1x16x16xbf16>
    %77 = vector.shape_cast %76 : vector<1x16x16xbf16> to vector<16x16xbf16>
    %cst_68 = arith.constant dense<0.000000e+00> : vector<286x16xf32>
    %78 = tpu.matmul %75, %77, %cst_68 {dimension_numbers = #tpu.dot_dimension_numbers<[1], [0], [0], [1], [0, 0, 1, 1], [], []>} : vector<286x16xbf16>, vector<16x16xbf16>, vector<286x16xf32> -> vector<286x16xf32>
    %79 = arith.addf %73, %78 : vector<286x16xf32>
    %c1_69 = arith.constant 1 : index
    %c0_70 = arith.constant 0 : index
    %80 = vector.load %arg12[%c1_69, %c0_70] : memref<324x16xf32, #tpu.memory_space<vmem>>, vector<286x16xf32>
    %81 = arith.truncf %80 : vector<286x16xf32> to vector<286x16xbf16>
    %c1_71 = arith.constant 1 : index
    %c0_72 = arith.constant 0 : index
    %c0_73 = arith.constant 0 : index
    %82 = vector.load %arg7[%c1_71, %c0_72, %c0_73] : memref<9x16x16xbf16, #tpu.memory_space<vmem>>, vector<1x16x16xbf16>
    %83 = vector.shape_cast %82 : vector<1x16x16xbf16> to vector<16x16xbf16>
    %cst_74 = arith.constant dense<0.000000e+00> : vector<286x16xf32>
    %84 = tpu.matmul %81, %83, %cst_74 {dimension_numbers = #tpu.dot_dimension_numbers<[1], [0], [0], [1], [0, 0, 1, 1], [], []>} : vector<286x16xbf16>, vector<16x16xbf16>, vector<286x16xf32> -> vector<286x16xf32>
    %85 = arith.addf %79, %84 : vector<286x16xf32>
    %c2_75 = arith.constant 2 : index
    %c0_76 = arith.constant 0 : index
    %86 = vector.load %arg12[%c2_75, %c0_76] : memref<324x16xf32, #tpu.memory_space<vmem>>, vector<286x16xf32>
    %87 = arith.truncf %86 : vector<286x16xf32> to vector<286x16xbf16>
    %c2_77 = arith.constant 2 : index
    %c0_78 = arith.constant 0 : index
    %c0_79 = arith.constant 0 : index
    %88 = vector.load %arg7[%c2_77, %c0_78, %c0_79] : memref<9x16x16xbf16, #tpu.memory_space<vmem>>, vector<1x16x16xbf16>
    %89 = vector.shape_cast %88 : vector<1x16x16xbf16> to vector<16x16xbf16>
    %cst_80 = arith.constant dense<0.000000e+00> : vector<286x16xf32>
    %90 = tpu.matmul %87, %89, %cst_80 {dimension_numbers = #tpu.dot_dimension_numbers<[1], [0], [0], [1], [0, 0, 1, 1], [], []>} : vector<286x16xbf16>, vector<16x16xbf16>, vector<286x16xf32> -> vector<286x16xf32>
    %91 = arith.addf %85, %90 : vector<286x16xf32>
    %c18_81 = arith.constant 18 : index
    %c0_82 = arith.constant 0 : index
    %92 = vector.load %arg12[%c18_81, %c0_82] : memref<324x16xf32, #tpu.memory_space<vmem>>, vector<286x16xf32>
    %93 = arith.truncf %92 : vector<286x16xf32> to vector<286x16xbf16>
    %c3_83 = arith.constant 3 : index
    %c0_84 = arith.constant 0 : index
    %c0_85 = arith.constant 0 : index
    %94 = vector.load %arg7[%c3_83, %c0_84, %c0_85] : memref<9x16x16xbf16, #tpu.memory_space<vmem>>, vector<1x16x16xbf16>
    %95 = vector.shape_cast %94 : vector<1x16x16xbf16> to vector<16x16xbf16>
    %cst_86 = arith.constant dense<0.000000e+00> : vector<286x16xf32>
    %96 = tpu.matmul %93, %95, %cst_86 {dimension_numbers = #tpu.dot_dimension_numbers<[1], [0], [0], [1], [0, 0, 1, 1], [], []>} : vector<286x16xbf16>, vector<16x16xbf16>, vector<286x16xf32> -> vector<286x16xf32>
    %97 = arith.addf %91, %96 : vector<286x16xf32>
    %c19_87 = arith.constant 19 : index
    %c0_88 = arith.constant 0 : index
    %98 = vector.load %arg12[%c19_87, %c0_88] : memref<324x16xf32, #tpu.memory_space<vmem>>, vector<286x16xf32>
    %99 = arith.truncf %98 : vector<286x16xf32> to vector<286x16xbf16>
    %c4_89 = arith.constant 4 : index
    %c0_90 = arith.constant 0 : index
    %c0_91 = arith.constant 0 : index
    %100 = vector.load %arg7[%c4_89, %c0_90, %c0_91] : memref<9x16x16xbf16, #tpu.memory_space<vmem>>, vector<1x16x16xbf16>
    %101 = vector.shape_cast %100 : vector<1x16x16xbf16> to vector<16x16xbf16>
    %cst_92 = arith.constant dense<0.000000e+00> : vector<286x16xf32>
    %102 = tpu.matmul %99, %101, %cst_92 {dimension_numbers = #tpu.dot_dimension_numbers<[1], [0], [0], [1], [0, 0, 1, 1], [], []>} : vector<286x16xbf16>, vector<16x16xbf16>, vector<286x16xf32> -> vector<286x16xf32>
    %103 = arith.addf %97, %102 : vector<286x16xf32>
    %c20_93 = arith.constant 20 : index
    %c0_94 = arith.constant 0 : index
    %104 = vector.load %arg12[%c20_93, %c0_94] : memref<324x16xf32, #tpu.memory_space<vmem>>, vector<286x16xf32>
    %105 = arith.truncf %104 : vector<286x16xf32> to vector<286x16xbf16>
    %c5_95 = arith.constant 5 : index
    %c0_96 = arith.constant 0 : index
    %c0_97 = arith.constant 0 : index
    %106 = vector.load %arg7[%c5_95, %c0_96, %c0_97] : memref<9x16x16xbf16, #tpu.memory_space<vmem>>, vector<1x16x16xbf16>
    %107 = vector.shape_cast %106 : vector<1x16x16xbf16> to vector<16x16xbf16>
    %cst_98 = arith.constant dense<0.000000e+00> : vector<286x16xf32>
    %108 = tpu.matmul %105, %107, %cst_98 {dimension_numbers = #tpu.dot_dimension_numbers<[1], [0], [0], [1], [0, 0, 1, 1], [], []>} : vector<286x16xbf16>, vector<16x16xbf16>, vector<286x16xf32> -> vector<286x16xf32>
    %109 = arith.addf %103, %108 : vector<286x16xf32>
    %c36_99 = arith.constant 36 : index
    %c0_100 = arith.constant 0 : index
    %110 = vector.load %arg12[%c36_99, %c0_100] : memref<324x16xf32, #tpu.memory_space<vmem>>, vector<286x16xf32>
    %111 = arith.truncf %110 : vector<286x16xf32> to vector<286x16xbf16>
    %c6_101 = arith.constant 6 : index
    %c0_102 = arith.constant 0 : index
    %c0_103 = arith.constant 0 : index
    %112 = vector.load %arg7[%c6_101, %c0_102, %c0_103] : memref<9x16x16xbf16, #tpu.memory_space<vmem>>, vector<1x16x16xbf16>
    %113 = vector.shape_cast %112 : vector<1x16x16xbf16> to vector<16x16xbf16>
    %cst_104 = arith.constant dense<0.000000e+00> : vector<286x16xf32>
    %114 = tpu.matmul %111, %113, %cst_104 {dimension_numbers = #tpu.dot_dimension_numbers<[1], [0], [0], [1], [0, 0, 1, 1], [], []>} : vector<286x16xbf16>, vector<16x16xbf16>, vector<286x16xf32> -> vector<286x16xf32>
    %115 = arith.addf %109, %114 : vector<286x16xf32>
    %c37_105 = arith.constant 37 : index
    %c0_106 = arith.constant 0 : index
    %116 = vector.load %arg12[%c37_105, %c0_106] : memref<324x16xf32, #tpu.memory_space<vmem>>, vector<286x16xf32>
    %117 = arith.truncf %116 : vector<286x16xf32> to vector<286x16xbf16>
    %c7_107 = arith.constant 7 : index
    %c0_108 = arith.constant 0 : index
    %c0_109 = arith.constant 0 : index
    %118 = vector.load %arg7[%c7_107, %c0_108, %c0_109] : memref<9x16x16xbf16, #tpu.memory_space<vmem>>, vector<1x16x16xbf16>
    %119 = vector.shape_cast %118 : vector<1x16x16xbf16> to vector<16x16xbf16>
    %cst_110 = arith.constant dense<0.000000e+00> : vector<286x16xf32>
    %120 = tpu.matmul %117, %119, %cst_110 {dimension_numbers = #tpu.dot_dimension_numbers<[1], [0], [0], [1], [0, 0, 1, 1], [], []>} : vector<286x16xbf16>, vector<16x16xbf16>, vector<286x16xf32> -> vector<286x16xf32>
    %121 = arith.addf %115, %120 : vector<286x16xf32>
    %c38_111 = arith.constant 38 : index
    %c0_112 = arith.constant 0 : index
    %122 = vector.load %arg12[%c38_111, %c0_112] : memref<324x16xf32, #tpu.memory_space<vmem>>, vector<286x16xf32>
    %123 = arith.truncf %122 : vector<286x16xf32> to vector<286x16xbf16>
    %c8_113 = arith.constant 8 : index
    %c0_114 = arith.constant 0 : index
    %c0_115 = arith.constant 0 : index
    %124 = vector.load %arg7[%c8_113, %c0_114, %c0_115] : memref<9x16x16xbf16, #tpu.memory_space<vmem>>, vector<1x16x16xbf16>
    %125 = vector.shape_cast %124 : vector<1x16x16xbf16> to vector<16x16xbf16>
    %cst_116 = arith.constant dense<0.000000e+00> : vector<286x16xf32>
    %126 = tpu.matmul %123, %125, %cst_116 {dimension_numbers = #tpu.dot_dimension_numbers<[1], [0], [0], [1], [0, 0, 1, 1], [], []>} : vector<286x16xbf16>, vector<16x16xbf16>, vector<286x16xf32> -> vector<286x16xf32>
    %127 = arith.addf %121, %126 : vector<286x16xf32>
    %c0_117 = arith.constant 0 : index
    %c0_118 = arith.constant 0 : index
    %128 = vector.load %arg8[%c0_117, %c0_118] : memref<1x16xf32, #tpu.memory_space<vmem>>, vector<1x16xf32>
    %129 = vector.broadcast %128 : vector<1x16xf32> to vector<286x16xf32>
    %130 = arith.mulf %127, %129 : vector<286x16xf32>
    %c0_119 = arith.constant 0 : index
    %c0_120 = arith.constant 0 : index
    %131 = vector.load %arg9[%c0_119, %c0_120] : memref<1x16xf32, #tpu.memory_space<vmem>>, vector<1x16xf32>
    %132 = vector.broadcast %131 : vector<1x16xf32> to vector<286x16xf32>
    %133 = arith.addf %130, %132 : vector<286x16xf32>
    %cst_121 = arith.constant 0.000000e+00 : f32
    %134 = vector.broadcast %cst_121 : f32 to vector<286x16xf32>
    %135 = arith.cmpf ogt, %133, %134 : vector<286x16xf32>
    %c0_122 = arith.constant 0 : index
    %c0_123 = arith.constant 0 : index
    %136 = vector.load %arg10[%c0_122, %c0_123] : memref<1x16xf32, #tpu.memory_space<vmem>>, vector<1x16xf32>
    %137 = vector.broadcast %136 : vector<1x16xf32> to vector<286x16xf32>
    %138 = arith.mulf %137, %133 : vector<286x16xf32>
    %139 = arith.select %135, %133, %138 : vector<286x16xi1>, vector<286x16xf32>
    %c0_124 = arith.constant 0 : index
    %c19_125 = arith.constant 19 : index
    %c0_126 = arith.constant 0 : index
    %140 = vector.load %arg1[%c0_124, %c19_125, %c0_126] : memref<1x324x16xbf16, #tpu.memory_space<vmem>>, vector<1x286x16xbf16>
    %141 = vector.shape_cast %140 : vector<1x286x16xbf16> to vector<286x16xbf16>
    %142 = arith.extf %141 : vector<286x16xbf16> to vector<286x16xf32>
    %143 = arith.addf %139, %142 : vector<286x16xf32>
    %c0_127 = arith.constant 0 : index
    %c0_128 = arith.constant 0 : index
    %c0_129 = arith.constant 0 : index
    %144 = vector.load %arg11[%c0_127, %c0_128, %c0_129] : memref<1x286x16xf32, #tpu.memory_space<vmem>>, vector<1x286x16xf32>
    %145 = vector.shape_cast %144 : vector<1x286x16xf32> to vector<286x16xf32>
    %146 = vector.shape_cast %143 : vector<286x16xf32> to vector<1x286x16xf32>
    tpu.vector_store %arg11[%c0_127, %c0_128, %c0_129], %146 {strides = array<i32>} : memref<1x286x16xf32, #tpu.memory_space<vmem>>, vector<1x286x16xf32>,
    return
  }
  func.func @transform_0(%arg0: i32) -> (i32, i32, i32) {
    %c0_i32 = arith.constant 0 : i32
    %c0_i32_0 = arith.constant 0 : i32
    %c0_i32_1 = arith.constant 0 : i32
    return %arg0, %c0_i32, %c0_i32_0 : i32, i32, i32
  }
  func.func @transform_1(%arg0: i32) -> (i32, i32) {
    %c0_i32 = arith.constant 0 : i32
    %c0_i32_0 = arith.constant 0 : i32
    %c0_i32_1 = arith.constant 0 : i32
    return %c0_i32, %c0_i32_0 : i32, i32
  }
  func.func @transform_2(%arg0: i32) -> (i32, i32, i32) {
    %c0_i32 = arith.constant 0 : i32
    %c0_i32_0 = arith.constant 0 : i32
    %c0_i32_1 = arith.constant 0 : i32
    %c0_i32_2 = arith.constant 0 : i32
    return %c0_i32, %c0_i32_0, %c0_i32_1 : i32, i32, i32
  }
  func.func @transform_3(%arg0: i32) -> (i32, i32) {
    %c0_i32 = arith.constant 0 : i32
    %c0_i32_0 = arith.constant 0 : i32
    %c0_i32_1 = arith.constant 0 : i32
    return %c0_i32, %c0_i32_0 : i32, i32
  }
  func.func @transform_4(%arg0: i32) -> (i32, i32) {
    %c0_i32 = arith.constant 0 : i32
    %c0_i32_0 = arith.constant 0 : i32
    %c0_i32_1 = arith.constant 0 : i32
    return %c0_i32, %c0_i32_0 : i32, i32
  }
  func.func @transform_5(%arg0: i32) -> (i32, i32) {
    %c0_i32 = arith.constant 0 : i32
    %c0_i32_0 = arith.constant 0 : i32
    %c0_i32_1 = arith.constant 0 : i32
    return %c0_i32, %c0_i32_0 : i32, i32
  }
  func.func @transform_6(%arg0: i32) -> (i32, i32, i32) {
    %c0_i32 = arith.constant 0 : i32
    %c0_i32_0 = arith.constant 0 : i32
    %c0_i32_1 = arith.constant 0 : i32
    %c0_i32_2 = arith.constant 0 : i32
    return %c0_i32, %c0_i32_0, %c0_i32_1 : i32, i32, i32
  }
  func.func @transform_7(%arg0: i32) -> (i32, i32) {
    %c0_i32 = arith.constant 0 : i32
    %c0_i32_0 = arith.constant 0 : i32
    %c0_i32_1 = arith.constant 0 : i32
    return %c0_i32, %c0_i32_0 : i32, i32
  }
  func.func @transform_8(%arg0: i32) -> (i32, i32) {
    %c0_i32 = arith.constant 0 : i32
    %c0_i32_0 = arith.constant 0 : i32
    %c0_i32_1 = arith.constant 0 : i32
    return %c0_i32, %c0_i32_0 : i32, i32
  }
  func.func @transform_9(%arg0: i32) -> (i32, i32) {
    %c0_i32 = arith.constant 0 : i32
    %c0_i32_0 = arith.constant 0 : i32
    %c0_i32_1 = arith.constant 0 : i32
    return %c0_i32, %c0_i32_0 : i32, i32
  }
  func.func @transform_10(%arg0: i32) -> (i32, i32, i32) {
    %c0_i32 = arith.constant 0 : i32
    %c0_i32_0 = arith.constant 0 : i32
    %c0_i32_1 = arith.constant 0 : i32
    return %arg0, %c0_i32, %c0_i32_0 : i32, i32, i32
  }
}

</mosaic_0001>

<bundles_post_ra>
// kernel: _lambda_.1
= control target key start
LH: loop header
LB: loop body
LE: loop exit
PB: predicated region body
PF: predicated region fallthrough
CT: control target
= control target key end

     0   :  { %s10263_s13 = smov 0   ;;  %s12072_s0 = inlined_call_operand.vmem [shape: bf16[2,324,16], index: 0, kind: input, shape index: {}]   ;;  %s12073_s1 = inlined_call_operand.vmem [shape: f32[286,1], index: 1, kind: input, shape index: {}]   ;;  %s12074_s2 = inlined_call_operand.vmem [shape: bf16[9,16,16], index: 2, kind: input, shape index: {}]   ;;  %s12075_s3 = inlined_call_operand.vmem [shape: f32[1,16], index: 3, kind: input, shape index: {}]   ;;  %s12076_s4 = inlined_call_operand.vmem [shape: f32[1,16], index: 4, kind: input, shape index: {}]   ;;  %s12077_s5 = inlined_call_operand.vmem [shape: f32[1,16], index: 5, kind: input, shape index: {}, may-alias: {5,9}]   ;;  %s12078_s6 = inlined_call_operand.vmem [shape: bf16[9,16,16], index: 6, kind: input, shape index: {}]   ;;  %s12079_s7 = inlined_call_operand.vmem [shape: f32[1,16], index: 7, kind: input, shape index: {}]   ;;  %s12080_s8 = inlined_call_operand.vmem [shape: f32[1,16], index: 8, kind: input, shape index: {}]   ;;  %s12081_s9 = inlined_call_operand.vmem [shape: f32[1,16], index: 9, kind: input, shape index: {}, may-alias: {5,9}]   ;;  %s12082_s10 = inlined_call_operand.vmem [shape: f32[2,286,16], index: 10, kind: output, shape index: {}]  }
   0x1 LB: > { %s7932_s14 = sadd.s32 4294967295, %s10204_s13   ;;  %p7936_p0 = scmp.ge.s32.totalorder %s10204_s13, 1  ;;  %s10204_s13 = sphi %s10263_s13, %s20_s13  }
   0x2   : > { %p312_p1 = scmp.lt.s32.totalorder %s10204_s13, 3 }
   0x4   : > { %p313_p2 = pnand %p7936_p0, %p312_p1 }
   0x5   : > { %v10101_v0 = vld [vmem:[%s12074_s2 + $0x8] sm:$0xff] (!%p313_p2)   ;;  %p350_p3 = scmp.lt.s32.totalorder (!%p313_p2), %s7932_s14, 1  ;;  %v10104_v1 = vld [vmem:[%s12074_s2] sm:$0xff] (!%p313_p2)   ;;  %vm493_vm0 = vsmask.f32 (!%p313_p2), 7424  ;;  %vm643_vm1 = vcmask (!%p313_p2), 130048  }
   0x6   : > { %316 = sbr.rel (%p313_p2) target bundleno = 1703 (0x6a7), region = 60  ;;  %8827 = vmatprep.subr.bf16.mxu0 (!%p313_p2), %v10101_v0  ;;  %v10319_v26 = vld [vmem:[%s12074_s2 + $0x10] sm:$0xff] (!%p313_p2)   ;;  %vm1105_vm2 = vcmask (!%p313_p2), 1046528   ;;  %vm1984_vm3 = vsmask.f32 (!%p313_p2), 6400  ;;  %vm2431_vm4 = vcmask (!%p313_p2), 1045504  }
   0x7   : > { %8828 = vmatpush3.bf16.msra.mxu0 (!%p313_p2), %v10101_v0  ;;  %vm3192_vm5 = vsmask.f32 (!%p313_p2), 5376  ;;  %vm3643_vm6 = vcmask (!%p313_p2), 1044480  }
   0x8   : > { %8865 = vmatprep.subr.bf16.mxu0 (!%p313_p2), %v10104_v1 }
   0xd   : > { %s12084_s14 = smov (!%p350_p3, %s7932_s14), 1 }
   0xe   : > { %s10087_s19 = smul.u32 164, %s12084_s14 }
  0x10   : > { %s10283_s22 = scalar_lea.vmem %s12072_s0, %s10087_s19  ;;  %s10088_s19 = smul.u32 288, %s12084_s14 }
  0x11   : > { %v361_v2 = vld [vmem:[%s10283_s22] sm:$0xf]  ;;  %v10287_v3 = vld [vmem:[%s10283_s22 + $0x4] sm:$0xf]  ;;  %v10293_v5 = vld [vmem:[%s10283_s22 + $0x8] sm:$0xff]  }
  0x12   : > { %v10290_v4 = vcombine.low %v361_v2, %v10287_v3  ;;  %v10296_v6 = vld [vmem:[%s10283_s22 + $0x10] sm:$0xff]   ;;  %v502_v9 = vshll.u32 %v10293_v5, 16  ;;  %v506_v10 = vshrl.u32 %v10293_v5, 16  ;;  %v10304_v12 = vld [vmem:[%s10283_s22 + $0x18] sm:$0xff]   ;;  %v10308_v14 = vld [vmem:[%s10283_s22 + $0x20] sm:$0xff]   ;;  %s11764_s21 = scalar_lea.vmem %s12082_s10, %s10088_s19 }
  0x13   : > { %v510_v11 = vshll.u32 %v10296_v6, 16  ;;  %v514_v13 = vshrl.u32 %v10296_v6, 16  ;;  %v518_v18 = vshll.u32 %v10304_v12, 16  ;;  %v526_v21 = vshll.u32 %v10308_v14, 16  ;;  %v10313_v22 = vld [vmem:[%s10283_s22 + $0x28] sm:$0xff]   ;;  %v10329_v33 = vld [vmem:[%s10283_s22 + $0x30] sm:$0xff]  }
  0x14   : > { %v495_v7 = vshrl.u32 %v10290_v4, 16  ;;  %v497_v8 = vshll.u32 %v10290_v4, 16  ;;  %v504_v16 = vrot.slane %v502_v9, 1  ;;  %v522_v25 = vshrl.u32 %v10304_v12, 16  ;;  %v10333_v37 = vld [vmem:[%s10283_s22 + $0x38] sm:$0xff]   ;;  %v10338_v39 = vld [vmem:[%s10283_s22 + $0x40] sm:$0xff]  }
  0x15   : > { %v512_v17 = vrot.slane %v510_v11, 1  ;;  %v520_v24 = vrot.slane %v518_v18, 1  ;;  %v530_v29 = vshrl.u32 %v10308_v14, 16  ;;  %v534_v30 = vshll.u32 %v10313_v22, 16  ;;  %v10346_v45 = vld [vmem:[%s10283_s22 + $0x48] sm:$0xff]   ;;  %v10349_v46 = vld [vmem:[%s10283_s22 + $0x50] sm:$0xff]  }
  0x16   : > { %v499_v15 = vrot.slane %v497_v8, 1  ;;  %v508_v20 = vor.u32 %v506_v10, %v504_v16  ;;  %v528_v32 = vrot.slane %v526_v21, 1  ;;  %v542_v38 = vshll.u32 %v10329_v33, 16  ;;  %v10354_v49 = vld [vmem:[%s10283_s22 + $0x58] sm:$0xff]   ;;  %v10357_v50 = vld [vmem:[%s10283_s22 + $0x60] sm:$0xff]   ;;  %v10361_v52 = vld [vmem:[%s10283_s22 + $0x68] sm:$0xff]  }
  0x17   : > { %v516_v23 = vor.u32 %v514_v13, %v512_v17  ;;  %v524_v34 = vor.u32 %v522_v25, %v520_v24  ;;  %v536_v36 = vrot.slane %v534_v30, 1  ;;  %v538_v41 = vshrl.u32 %v10313_v22, 16  ;;  %v10384_v21 = vld [vmem:[%s10283_s22 + $0x78] sm:$0xff]  }
  0x18   : > { %v500_v19 = vor.u32 %v499_v15, %v495_v7  ;;  %v513_v28 = vsel %vm493_vm0, %v508_v20, %v512_v17  ;;  %v532_v35 = vor.u32 %v530_v29, %v528_v32  ;;  %v546_v42 = vshrl.u32 %v10329_v33, 16 }
  0x19   : > { %v521_v31 = vsel %vm493_vm0, %v516_v23, %v520_v24  ;;  %v529_v40 = vsel %vm493_vm0, %v524_v34, %v528_v32  ;;  %v550_v44 = vshll.u32 %v10333_v37, 16  ;;  %v544_v47 = vrot.slane %v542_v38, 1  ;;  %v399_v38 = vld [vmem:[%s10283_s22 + $0x8c] sm:$0xf] }
  0x1a   : > { %v505_v27 = vsel %vm493_vm0, %v500_v19, %v504_v16  ;;  %v537_v43 = vsel %vm493_vm0, %v532_v35, %v536_v36  ;;  %v558_v48 = vshll.u32 %v10338_v39, 16  ;;  %v540_v51 = vor.u32 %v538_v41, %v536_v36  ;;  %v395_v35 = vld [vmem:[%s10283_s22 + $0x88] sm:$0xf]  ;;  %v10400_v41 = vld [vmem:[%s10283_s22 + $0x80] sm:$0xff]  }
  0x1b   : > { %8829 = vmatprep.mubr.msk.bf16.mxu0 %vm643_vm1, %v505_v27  ;;  %v548_v53 = vor.u32 %v546_v42, %v544_v47  ;;  %v552_v54 = vrot.slane %v550_v44, 1  ;;  %v566_v55 = vshll.u32 %v10346_v45, 16  ;;  %v554_v56 = vshrl.u32 %v10333_v37, 16 }
  0x1c   : > { %8830 = vmatmul.mubr.msk.bf16.vlgmr.msra.gmra.mrb[0].mxu0 %vm643_vm1, %v513_v28  ;;  %v562_v57 = vshrl.u32 %v10338_v39, 16  ;;  %v574_v58 = vshll.u32 %v10349_v46, 16  ;;  %v560_v59 = vrot.slane %v558_v48, 1  ;;  %v570_v60 = vshrl.u32 %v10346_v45, 16 }
  0x1d   : > { %8866 = vmatpush3.bf16.msra.mxu0 %v10104_v1  ;;  %8833 = vmatprep.mubr.msk.bf16.mxu0 %vm643_vm1, %v521_v31  ;;  %v582_v61 = vshll.u32 %v10354_v49, 16  ;;  %v590_v62 = vshll.u32 %v10357_v50, 16  ;;  %v545_v63 = vsel %vm493_vm0, %v540_v51, %v544_v47  ;;  %v598_v0 = vshll.u32 %v10361_v52, 16  ;;  %v10373_v1 = vld [vmem:[%s10283_s22 + $0x70] sm:$0xff]  }
  0x1e   : > { %8903 = vmatprep.subr.bf16.mxu0 %v10319_v26  ;;  %v553_v2 = vsel %vm493_vm0, %v548_v53, %v552_v54  ;;  %v568_v7 = vrot.slane %v566_v55, 1  ;;  %v578_v8 = vshrl.u32 %v10349_v46, 16  ;;  %v576_v9 = vrot.slane %v574_v58, 1 }
  0x1f   : > { %v586_v10 = vshrl.u32 %v10354_v49, 16  ;;  %v556_v11 = vor.u32 %v554_v56, %v552_v54  ;;  %v584_v13 = vrot.slane %v582_v61, 1  ;;  %v594_v15 = vshrl.u32 %v10357_v50, 16 }
  0x20   : > { %v592_v16 = vrot.slane %v590_v62, 1  ;;  %v600_v17 = vrot.slane %v598_v0, 1  ;;  %v602_v18 = vshrl.u32 %v10361_v52, 16  ;;  %v606_v19 = vshll.u32 %v10373_v1, 16 }
  0x21   : > { %v564_v20 = vor.u32 %v562_v57, %v560_v59  ;;  %v561_v23 = vsel %vm493_vm0, %v556_v11, %v560_v59  ;;  %v610_v25 = vshrl.u32 %v10373_v1, 16  ;;  %v614_v27 = vshll.u32 %v10384_v21, 16 }
  0x22   : > { %v572_v28 = vor.u32 %v570_v60, %v568_v7  ;;  %v608_v29 = vrot.slane %v606_v19, 1  ;;  %v618_v30 = vshrl.u32 %v10384_v21, 16  ;;  %v580_v31 = vor.u32 %v578_v8, %v576_v9  ;;  %v396_v8 = vld [vmem:[%s10283_s22 + $0x8c] sm:$0x7] }
  0x23   : > { %v569_v24 = vsel %vm493_vm0, %v564_v20, %v568_v7  ;;  %v588_v36 = vor.u32 %v586_v10, %v584_v13  ;;  %v616_v47 = vrot.slane %v614_v27, 1  ;;  %v622_v48 = vshll.u32 %v10400_v41, 16  ;;  %v10124_v7 = vld [vmem:[%s12074_s2 + $0x18] sm:$0xff]  }
  0x24   : > { %8834 = vmatmul.mubr.msk.bf16.gmra.mrb[4].mxu0 %vm643_vm1, %v529_v40  ;;  %v577_v32 = vsel %vm493_vm0, %v572_v28, %v576_v9  ;;  %v585_v34 = vsel %vm493_vm0, %v580_v31, %v584_v13  ;;  %v596_v40 = vor.u32 %v594_v15, %v592_v16  ;;  %v604_v51 = vor.u32 %v602_v18, %v600_v17 }
  0x25   : > { %8837 = vmatprep.mubr.msk.bf16.mxu0 %vm643_vm1, %v537_v43  ;;  %v593_v42 = vsel %vm493_vm0, %v588_v36, %v592_v16  ;;  %v10403_v43 = vcombine.low %v395_v35, %v399_v38  ;;  %v626_v53 = vshrl.u32 %v10400_v41, 16  ;;  %v612_v55 = vor.u32 %v610_v25, %v608_v29  ;;  %v10125_v38 = vld [vmem:[%s10283_s22 + $0x8] sm:$0xfe]  }
  0x26   : > { %v601_v44 = vsel %vm493_vm0, %v596_v40, %v600_v17  ;;  %v609_v56 = vsel %vm493_vm0, %v604_v51, %v608_v29  ;;  %v624_v58 = vrot.slane %v622_v48, 1  ;;  %v620_v59 = vor.u32 %v618_v30, %v616_v47 }
  0x27   : > { %v630_v54 = vshll.u32 %v10403_v43, 16  ;;  %v617_v57 = vsel %vm493_vm0, %v612_v55, %v616_v47  ;;  %v634_v0 = vshrl.u32 %v10403_v43, 16  ;;  %v1107_v10 = vrot.slane %v10293_v5, 1  ;;  %v10131_v55 = vld [vmem:[%s10283_s22 + $0x30] sm:$0xff]  }
  0x28   : > { %v628_v61 = vor.u32 %v626_v53, %v624_v58  ;;  %v625_v62 = vsel %vm493_vm0, %v620_v59, %v624_v58  ;;  %v7978_v11 = vcombine.low %v395_v35, %v396_v8  ;;  %v1111_v15 = vrot.slane %v10304_v12, 1  ;;  %v10130_v53 = vld [vmem:[%s10283_s22 + $0x28] sm:$0xff]  }
  0x29   : > { %v632_v60 = vrot.slane %v630_v54, 1  ;;  %v1113_v18 = vrot.slane %v10308_v14, 1  ;;  %v1117_v20 = vrot.slane %v10329_v33, 1  ;;  %v1123_v25 = vrot.slane %v10346_v45, 1 }
  0x2a   : > { %v1139_v35 = vrot.slane %v10403_v43, 1  ;;  %v1543_v40 = vrot.slane %v10125_v38, 1  ;;  %v1552_v58 = vrot.slane %v10131_v55, 1  ;;  %v10601_v55 = vld [vmem:[%s10283_s22 + $0x28] sm:$0xff]  }
  0x2c   : > { %8838 = vmatmul.mubr.msk.bf16.gmra.mrb[8].mxu0 %vm643_vm1, %v545_v63  ;;  %v633_v63 = vsel %vm493_vm0, %v628_v61, %v632_v60 }
  0x2d   : > { %8841 = vmatprep.mubr.msk.bf16.mxu0 %vm643_vm1, %v553_v2  ;;  %v636_v2 = vor.u32 %v634_v0, %v632_v60  ;;  %v10132_v60 = vld [vmem:[%s10283_s22 + $0x38] sm:$0xff]  }
  0x34   : > { %8842 = vmatmul.mubr.msk.bf16.gmra.mrb[12].mxu0 %vm643_vm1, %v561_v23  ;;  %v1119_v23 = vrot.slane %v10333_v37, 1 }
  0x35   : > { %8845 = vmatprep.mubr.msk.bf16.mxu0 %vm643_vm1, %v569_v24 }
  0x3c   : > { %8846 = vmatmul.mubr.msk.bf16.gmra.mrb[16].mxu0 %vm643_vm1, %v577_v32  ;;  %v1135_v32 = vrot.slane %v10384_v21, 1 }
  0x3d   : > { %8849 = vmatprep.mubr.msk.bf16.mxu0 %vm643_vm1, %v585_v34 }
  0x44   : > { %8850 = vmatmul.mubr.msk.bf16.gmra.mrb[20].mxu0 %vm643_vm1, %v593_v42 }
  0x45   : > { %8853 = vmatprep.mubr.msk.bf16.mxu0 %vm643_vm1, %v601_v44  ;;  %v10128_v44 = vld [vmem:[%s10283_s22 + $0x18] sm:$0xff]  }
  0x46   : > { %v1546_v43 = vrot.slane %v10128_v44, 1 }
  0x4c   : > { %8854 = vmatmul.mubr.msk.bf16.gmra.mrb[24].mxu0 %vm643_vm1, %v609_v56  ;;  %v10534_v56 = vld [vmem:[%s12074_s2 + $0x28] sm:$0xff]  }
  0x4d   : > { %8857 = vmatprep.mubr.msk.bf16.mxu0 %vm643_vm1, %v617_v57  ;;  %v1550_v57 = vrot.slane %v10130_v53, 1 }
  0x4f   : > { %v1553_v61 = vsel %vm1105_vm2, %v1550_v57, %v1552_v58 }
  0x54   : > { %8858 = vmatmul.mubr.msk.bf16.gmra.mrb[28].mxu0 %vm643_vm1, %v625_v62  ;;  %v10133_v62 = vld [vmem:[%s10283_s22 + $0x40] sm:$0xff]  }
  0x55   : > { %8861 = vmatprep.mubr.msk.bf16.mxu0 %vm643_vm1, %v633_v63  ;;  %v1554_v63 = vrot.slane %v10132_v60, 1  ;;  %v1556_v0 = vrot.slane %v10133_v62, 1  ;;  %v10605_v60 = vld [vmem:[%s10283_s22 + $0x30] sm:$0xff]   ;;  %v2021_v62 = vshrl.u32 %v10601_v55, 16 }
  0x5c   : > { %8862 = vmatmul.mubr.msk.bf16.gmra.mrb[32].mxu0 %vm643_vm1, %v636_v2  ;;  %v1555_v2 = vsel %vm1105_vm2, %v1552_v58, %v1554_v63 }
  0x5d   : > { %8867 = vmatprep.mubr.msk.bf16.mxu0 %vm643_vm1, %v10290_v4  ;;  %v1098_v4 = vld [vmem:[%s10283_s22] sm:$0xe] }
  0x64   : > { %8868 = vmatmul.mubr.msk.bf16.vlgmr.msra.gmra.mrb[0].mxu0 %vm643_vm1, %v10293_v5  ;;  %v10473_v5 = vld [vmem:[%s12074_s2 + $0x20] sm:$0xff]  }
  0x65   : > { %8904 = vmatpush3.bf16.msra.mxu0 %v10319_v26  ;;  %8871 = vmatprep.mubr.msk.bf16.mxu0 %vm643_vm1, %v10296_v6  ;;  %v8000_v26 = vcombine.low %v1098_v4, %v10287_v3  ;;  %v1109_v3 = vrot.slane %v10296_v6, 1  ;;  %v1115_v6 = vrot.slane %v10313_v22, 1  ;;  %v1557_v4 = vsel %vm1105_vm2, %v1554_v63, %v1556_v0 }
  0x66   : > { %8941 = vmatprep.subr.bf16.mxu0 %v10124_v7  ;;  %v2024_v63 = vshll.u32 %v10601_v55, 16 }
  0x67   : > { %v1106_v9 = vrot.slane %v8000_v26, 1  ;;  %v1110_v16 = vsel %vm1105_vm2, %v1107_v10, %v1109_v3  ;;  %v1112_v17 = vsel %vm1105_vm2, %v1109_v3, %v1111_v15  ;;  %v1116_v19 = vsel %vm1105_vm2, %v1113_v18, %v1115_v6  ;;  %v10135_v26 = vld [vmem:[%s10283_s22 + $0x50] sm:$0xff]   ;;  %v10137_v3 = vld [vmem:[%s10283_s22 + $0x60] sm:$0xff]  }
  0x68   : > { %v1118_v24 = vsel %vm1105_vm2, %v1115_v6, %v1117_v20  ;;  %v10139_v6 = vld [vmem:[%s10283_s22 + $0x70] sm:$0xff]  }
  0x69   : > { %v1108_v13 = vsel %vm1105_vm2, %v1106_v9, %v1107_v10  ;;  %v1560_v9 = vrot.slane %v10135_v26, 1  ;;  %v2023_v26 = vrot.slane %v2021_v62, 1 }
  0x6c   : > { %8872 = vmatmul.mubr.msk.bf16.gmra.mrb[4].mxu0 %vm643_vm1, %v10304_v12  ;;  %v1114_v12 = vsel %vm1105_vm2, %v1111_v15, %v1113_v18 }
  0x6d   : > { %8875 = vmatprep.mubr.msk.bf16.mxu0 %vm643_vm1, %v10308_v14  ;;  %v1120_v14 = vsel %vm1105_vm2, %v1117_v20, %v1119_v23 }
  0x74   : > { %8876 = vmatmul.mubr.msk.bf16.gmra.mrb[8].mxu0 %vm643_vm1, %v10313_v22  ;;  %v1121_v22 = vrot.slane %v10338_v39, 1 }
  0x75   : > { %8879 = vmatprep.mubr.msk.bf16.mxu0 %vm643_vm1, %v10329_v33  ;;  %v1125_v33 = vrot.slane %v10349_v46, 1 }
  0x76   : > { %v1122_v27 = vsel %vm1105_vm2, %v1119_v23, %v1121_v22  ;;  %v1124_v28 = vsel %vm1105_vm2, %v1121_v22, %v1123_v25  ;;  %v10140_v23 = vld [vmem:[%s10283_s22 + $0x78] sm:$0xff]  }
  0x77   : > { %v1126_v29 = vsel %vm1105_vm2, %v1123_v25, %v1125_v33  ;;  %v1570_v22 = vrot.slane %v10140_v23, 1 }
  0x7c   : > { %8880 = vmatmul.mubr.msk.bf16.gmra.mrb[12].mxu0 %vm643_vm1, %v10333_v37  ;;  %v1127_v37 = vrot.slane %v10354_v49, 1 }
  0x7d   : > { %8883 = vmatprep.mubr.msk.bf16.mxu0 %vm643_vm1, %v10338_v39  ;;  %v1129_v39 = vrot.slane %v10357_v50, 1 }
  0x7e   : > { %v1128_v30 = vsel %vm1105_vm2, %v1125_v33, %v1127_v37 }
  0x7f   : > { %v1130_v31 = vsel %vm1105_vm2, %v1127_v37, %v1129_v39  ;;  %v10142_v37 = vld [vmem:[%s10283_s22 + $0x88] sm:$0xff]  }
  0x84   : > { %8884 = vmatmul.mubr.msk.bf16.gmra.mrb[16].mxu0 %vm643_vm1, %v10346_v45  ;;  %v1131_v45 = vrot.slane %v10361_v52, 1 }
  0x85   : > { %8887 = vmatprep.mubr.msk.bf16.mxu0 %vm643_vm1, %v10349_v46 }
  0x86   : > { %v1132_v46 = vsel %vm1105_vm2, %v1129_v39, %v1131_v45 }
  0x8c   : > { %8888 = vmatmul.mubr.msk.bf16.gmra.mrb[20].mxu0 %vm643_vm1, %v10354_v49  ;;  %v1133_v49 = vrot.slane %v10373_v1, 1 }
  0x8d   : > { %8891 = vmatprep.mubr.msk.bf16.mxu0 %vm643_vm1, %v10357_v50 }
  0x8e   : > { %v1134_v34 = vsel %vm1105_vm2, %v1131_v45, %v1133_v49  ;;  %v1136_v50 = vsel %vm1105_vm2, %v1133_v49, %v1135_v32  ;;  %v10580_v45 = vld [vmem:[%s10283_s22 + $0x10] sm:$0xff]  }
  0x94   : > { %8892 = vmatmul.mubr.msk.bf16.gmra.mrb[24].mxu0 %vm643_vm1, %v10361_v52  ;;  %v1137_v52 = vrot.slane %v10400_v41, 1 }
  0x95   : > { %8895 = vmatprep.mubr.msk.bf16.mxu0 %vm643_vm1, %v10373_v1 }
  0x96   : > { %v1138_v36 = vsel %vm1105_vm2, %v1135_v32, %v1137_v52  ;;  %v1140_v1 = vsel %vm1105_vm2, %v1137_v52, %v1139_v35 }
  0x9c   : > { %8896 = vmatmul.mubr.msk.bf16.gmra.mrb[28].mxu0 %vm643_vm1, %v10384_v21  ;;  %v10126_v21 = vld [vmem:[%s10283_s22 + $0x10] sm:$0xff]  }
  0x9d   : > { %8899 = vmatprep.mubr.msk.bf16.mxu0 %vm643_vm1, %v10400_v41  ;;  %v1544_v42 = vrot.slane %v10126_v21, 1  ;;  %v10129_v41 = vld [vmem:[%s10283_s22 + $0x20] sm:$0xff]  }
  0x9e   : > { %v1548_v48 = vrot.slane %v10129_v41, 1 }
  0x9f   : > { %v1545_v47 = vsel %vm1105_vm2, %v1543_v40, %v1544_v42  ;;  %v1547_v51 = vsel %vm1105_vm2, %v1544_v42, %v1546_v43  ;;  %v10592_v42 = vld [vmem:[%s10283_s22 + $0x20] sm:$0xff]  }
  0xa0   : > { %v1549_v54 = vsel %vm1105_vm2, %v1546_v43, %v1548_v48  ;;  %v1551_v59 = vsel %vm1105_vm2, %v1548_v48, %v1550_v57  ;;  %v2012_v48 = vshrl.u32 %v10592_v42, 16 }
  0xa2   : > { %v2014_v58 = vrot.slane %v2012_v48, 1 }
  0xa4   : > { %8900 = vmatmul.mubr.msk.bf16.gmra.mrb[32].mxu0 %vm643_vm1, %v7978_v11  ;;  %v10136_v11 = vld [vmem:[%s10283_s22 + $0x58] sm:$0xff]  }
  0xa5   : > { %8905 = vmatprep.mubr.msk.bf16.mxu0 %vm643_vm1, %v1108_v13  ;;  %v1562_v15 = vrot.slane %v10136_v11, 1 }
  0xac   : > { %8906 = vmatmul.mubr.msk.bf16.vlgmr.msra.gmra.mrb[0].mxu0 %vm643_vm1, %v1110_v16  ;;  %v1564_v16 = vrot.slane %v10137_v3, 1  ;;  %v10619_v3 = vld [vmem:[%s10283_s22 + $0x40] sm:$0xff]  }
  0xad   : > { %8942 = vmatpush3.bf16.msra.mxu0 %v10124_v7  ;;  %8909 = vmatprep.mubr.msk.bf16.mxu0 %vm643_vm1, %v1112_v17  ;;  %v10134_v7 = vld [vmem:[%s10283_s22 + $0x48] sm:$0xff]   ;;  %v1563_v17 = vsel %vm1105_vm2, %v1560_v9, %v1562_v15 }
  0xae   : > { %8979 = vmatprep.subr.bf16.mxu0 %v10473_v5  ;;  %v1558_v8 = vrot.slane %v10134_v7, 1  ;;  %v1565_v18 = vsel %vm1105_vm2, %v1562_v15, %v1564_v16  ;;  %v2033_v7 = vshll.u32 %v10605_v60, 16  ;;  %v10624_v15 = vld [vmem:[%s12074_s2 + $0x30] sm:$0xff]  }
  0xb0   : > { %v1559_v10 = vsel %vm1105_vm2, %v1556_v0, %v1558_v8  ;;  %v1561_v13 = vsel %vm1105_vm2, %v1558_v8, %v1560_v9  ;;  %v2026_v8 = vrot.slane %v2024_v63, 2  ;;  %v10615_v9 = vld [vmem:[%s10283_s22 + $0x38] sm:$0xff]  }
  0xb4   : > { %8910 = vmatmul.mubr.msk.bf16.gmra.mrb[4].mxu0 %vm643_vm1, %v1114_v12 }
  0xb5   : > { %8913 = vmatprep.mubr.msk.bf16.mxu0 %vm643_vm1, %v1116_v19  ;;  %v1568_v19 = vrot.slane %v10139_v6, 1  ;;  %v2048_v6 = vshrl.u32 %v10619_v3, 16 }
  0xb7   : > { %v1571_v33 = vsel %vm1105_vm2, %v1568_v19, %v1570_v22 }
  0xbc   : > { %8914 = vmatmul.mubr.msk.bf16.gmra.mrb[8].mxu0 %vm643_vm1, %v1118_v24 }
  0xbd   : > { %8917 = vmatprep.mubr.msk.bf16.mxu0 %vm643_vm1, %v1120_v14  ;;  %v10141_v14 = vld [vmem:[%s10283_s22 + $0x80] sm:$0xff]  }
  0xbe   : > { %v1572_v25 = vrot.slane %v10141_v14, 1  ;;  %v2050_v14 = vrot.slane %v2048_v6, 1 }
  0xc4   : > { %8918 = vmatmul.mubr.msk.bf16.gmra.mrb[12].mxu0 %vm643_vm1, %v1122_v27  ;;  %v1851_v27 = vld [vmem:[%s10283_s22 + $0x8] sm:$0xe] }
  0xc5   : > { %8921 = vmatprep.mubr.msk.bf16.mxu0 %vm643_vm1, %v1124_v28  ;;  %v10572_v28 = vld [vmem:[%s10283_s22 + $0xc] sm:$0xf] }
  0xc6   : > { %v8061_v39 = vcombine.low %v1851_v27, %v10572_v28 }
  0xc8   : > { %v1986_v49 = vshrl.u32 %v8061_v39, 16  ;;  %v1989_v32 = vshll.u32 %v8061_v39, 16 }
  0xca   : > { %v1991_v38 = vrot.slane %v1989_v32, 2  ;;  %v10650_v32 = vld [vmem:[%s10283_s22 + $0x58] sm:$0xff]  }
  0xcc   : > { %8922 = vmatmul.mubr.msk.bf16.gmra.mrb[16].mxu0 %vm643_vm1, %v1126_v29  ;;  %v10143_v29 = vld [vmem:[%s10283_s22 + $0x90] sm:$0xff]  }
  0xcd   : > { %8925 = vmatprep.mubr.msk.bf16.mxu0 %vm643_vm1, %v1128_v30  ;;  %v1573_v30 = vsel %vm1105_vm2, %v1570_v22, %v1572_v25 }
  0xd4   : > { %8926 = vmatmul.mubr.msk.bf16.gmra.mrb[20].mxu0 %vm643_vm1, %v1130_v31  ;;  %v1574_v31 = vrot.slane %v10142_v37, 1 }
  0xd5   : > { %8929 = vmatprep.mubr.msk.bf16.mxu0 %vm643_vm1, %v1132_v46  ;;  %v1576_v46 = vrot.slane %v10143_v29, 1 }
  0xd6   : > { %v1575_v52 = vsel %vm1105_vm2, %v1572_v25, %v1574_v31  ;;  %v10640_v25 = vld [vmem:[%s10283_s22 + $0x50] sm:$0xff]  }
  0xd7   : > { %v2069_v39 = vshll.u32 %v10640_v25, 16 }
  0xdc   : > { %8930 = vmatmul.mubr.msk.bf16.gmra.mrb[24].mxu0 %vm643_vm1, %v1134_v34  ;;  %v1994_v34 = vshrl.u32 %v10580_v45, 16 }
  0xdd   : > { %8933 = vmatprep.mubr.msk.bf16.mxu0 %vm643_vm1, %v1136_v50  ;;  %v1997_v50 = vshll.u32 %v10580_v45, 16 }
  0xde   : > { %v1996_v21 = vrot.slane %v1994_v34, 1 }
  0xdf   : > { %v1999_v40 = vrot.slane %v1997_v50, 2 }
  0xe1   : > { %v2000_v43 = vor.u32 %v1999_v40, %v1996_v21  ;;  %v2078_v21 = vshll.u32 %v10650_v32, 16 }
  0xe3   : > { %v2080_v48 = vrot.slane %v2078_v21, 2 }
  0xe4   : > { %8934 = vmatmul.mubr.msk.bf16.gmra.mrb[28].mxu0 %vm643_vm1, %v1138_v36  ;;  %v10589_v36 = vld [vmem:[%s10283_s22 + $0x18] sm:$0xff]  }
  0xe5   : > { %8937 = vmatprep.mubr.msk.bf16.mxu0 %vm643_vm1, %v1140_v1  ;;  %v1988_v1 = vrot.slane %v1986_v49, 1  ;;  %v2003_v44 = vshrl.u32 %v10589_v36, 16 }
  0xe7   : > { %v1992_v41 = vor.u32 %v1991_v38, %v1988_v1  ;;  %v2005_v53 = vrot.slane %v2003_v44, 1  ;;  %v2075_v38 = vshrl.u32 %v10650_v32, 16 }
  0xe9   : > { %v2001_v57 = vsel %vm1984_vm3, %v1992_v41, %v2000_v43 }
  0xec   : > { %8938 = vmatmul.mubr.msk.bf16.gmra.mrb[32].mxu0 %vm643_vm1, %v1139_v35  ;;  %v1577_v35 = vsel %vm1105_vm2, %v1574_v31, %v1576_v46 }
  0xed   : > { %8943 = vmatprep.mubr.msk.bf16.mxu0 %vm643_vm1, %v1545_v47  ;;  %v2006_v47 = vshll.u32 %v10589_v36, 16 }
  0xf4   : > { %8944 = vmatmul.mubr.msk.bf16.vlgmr.msra.gmra.mrb[0].mxu0 %vm643_vm1, %v1547_v51  ;;  %v2015_v51 = vshll.u32 %v10592_v42, 16 }
  0xf5   : > { %8980 = vmatpush3.bf16.msra.mxu0 %v10473_v5  ;;  %8947 = vmatprep.mubr.msk.bf16.mxu0 %vm643_vm1, %v1549_v54  ;;  %v10138_v5 = vld [vmem:[%s10283_s22 + $0x68] sm:$0xff]   ;;  %v2008_v54 = vrot.slane %v2006_v47, 2 }
  0xf6   : > { %9017 = vmatprep.subr.bf16.mxu0 %v10534_v56  ;;  %v1566_v12 = vrot.slane %v10138_v5, 1  ;;  %v2042_v5 = vshll.u32 %v10615_v9, 16 }
  0xf8   : > { %v1567_v20 = vsel %vm1105_vm2, %v1564_v16, %v1566_v12  ;;  %v1569_v24 = vsel %vm1105_vm2, %v1566_v12, %v1568_v19  ;;  %v2027_v16 = vor.u32 %v2026_v8, %v2023_v26  ;;  %v2051_v12 = vshll.u32 %v10619_v3, 16  ;;  %v10678_v8 = vld [vmem:[%s10283_s22 + $0x78] sm:$0xff]  }
  0xf9   : > { %v2044_v23 = vrot.slane %v2042_v5, 2  ;;  %v2111_v5 = vshrl.u32 %v10678_v8, 16 }
  0xfa   : > { %v2053_v22 = vrot.slane %v2051_v12, 2 }
  0xfc   : > { %8948 = vmatmul.mubr.msk.bf16.gmra.mrb[4].mxu0 %vm643_vm1, %v1551_v59  ;;  %v2017_v59 = vrot.slane %v2015_v51, 2  ;;  %v2054_v29 = vor.u32 %v2053_v22, %v2050_v14  ;;  %v10664_v51 = vld [vmem:[%s10283_s22 + $0x68] sm:$0xff]  }
  0xfd   : > { %8951 = vmatprep.mubr.msk.bf16.mxu0 %vm643_vm1, %v1553_v61  ;;  %v2009_v61 = vor.u32 %v2008_v54, %v2005_v53  ;;  %v2096_v62 = vshll.u32 %v10664_v51, 16  ;;  %v10692_v14 = vld [vmem:[%s10283_s22 + $0x88] sm:$0xff]  }
  0xfe   : > { %v2018_v0 = vor.u32 %v2017_v59, %v2014_v58  ;;  %v10668_v58 = vld [vmem:[%s10283_s22 + $0x70] sm:$0xff]  }
  0xff   : > { %v2098_v26 = vrot.slane %v2096_v62, 2 }
 0x100   : > { %v2028_v19 = vsel %vm1984_vm3, %v2018_v0, %v2027_v16 }
 0x104   : > { %8952 = vmatmul.mubr.msk.bf16.gmra.mrb[8].mxu0 %vm643_vm1, %v1555_v2  ;;  %v2030_v2 = vshrl.u32 %v10605_v60, 16 }
 0x105   : > { %8955 = vmatprep.mubr.msk.bf16.mxu0 %vm643_vm1, %v1557_v4  ;;  %v2010_v4 = vsel %vm1984_vm3, %v2000_v43, %v2009_v61  ;;  %v2077_v43 = vrot.slane %v2075_v38, 1 }
 0x106   : > { %v2032_v11 = vrot.slane %v2030_v2, 1  ;;  %v2105_v2 = vshll.u32 %v10668_v58, 16 }
 0x107   : > { %v2081_v59 = vor.u32 %v2080_v48, %v2077_v43 }
 0x10c   : > { %8956 = vmatmul.mubr.msk.bf16.gmra.mrb[12].mxu0 %vm643_vm1, %v1559_v10  ;;  %v2019_v10 = vsel %vm1984_vm3, %v2009_v61, %v2018_v0  ;;  %v2093_v61 = vshrl.u32 %v10664_v51, 16  ;;  %v2102_v0 = vshrl.u32 %v10668_v58, 16 }
 0x10d   : > { %8959 = vmatprep.mubr.msk.bf16.mxu0 %vm643_vm1, %v1561_v13  ;;  %v2035_v13 = vrot.slane %v2033_v7, 2 }
 0x114   : > { %8960 = vmatmul.mubr.msk.bf16.gmra.mrb[16].mxu0 %vm643_vm1, %v1563_v17  ;;  %v2039_v17 = vshrl.u32 %v10615_v9, 16 }
 0x115   : > { %8963 = vmatprep.mubr.msk.bf16.mxu0 %vm643_vm1, %v1565_v18  ;;  %v2036_v18 = vor.u32 %v2035_v13, %v2032_v11  ;;  %v2104_v11 = vrot.slane %v2102_v0, 1  ;;  %v2107_v13 = vrot.slane %v2105_v2, 2  ;;  %v2435_v0 = vrot.slane %v10589_v36, 2 }
 0x116   : > { %v2441_v36 = vrot.slane %v10605_v60, 2 }
 0x117   : > { %v2108_v6 = vor.u32 %v2107_v13, %v2104_v11  ;;  %v2449_v13 = vrot.slane %v10640_v25, 2 }
 0x11c   : > { %8964 = vmatmul.mubr.msk.bf16.gmra.mrb[20].mxu0 %vm643_vm1, %v1567_v20  ;;  %v2041_v20 = vrot.slane %v2039_v17, 1 }
 0x11d   : > { %8967 = vmatprep.mubr.msk.bf16.mxu0 %vm643_vm1, %v1569_v24  ;;  %v2037_v24 = vsel %vm1984_vm3, %v2027_v16, %v2036_v18  ;;  %v10682_v16 = vld [vmem:[%s10283_s22 + $0x80] sm:$0xff]  }
 0x11e   : > { %v2045_v27 = vor.u32 %v2044_v23, %v2041_v20  ;;  %v2120_v12 = vshrl.u32 %v10682_v16, 16  ;;  %v2113_v23 = vrot.slane %v2111_v5, 1 }
 0x120   : > { %v2046_v31 = vsel %vm1984_vm3, %v2036_v18, %v2045_v27  ;;  %v2055_v34 = vsel %vm1984_vm3, %v2045_v27, %v2054_v29  ;;  %v2114_v18 = vshll.u32 %v10678_v8, 16  ;;  %v2122_v27 = vrot.slane %v2120_v12, 1 }
 0x124   : > { %8968 = vmatmul.mubr.msk.bf16.gmra.mrb[24].mxu0 %vm643_vm1, %v1571_v33 }
 0x125   : > { %8971 = vmatprep.mubr.msk.bf16.mxu0 %vm643_vm1, %v1573_v30  ;;  %v2066_v30 = vshrl.u32 %v10640_v25, 16  ;;  %v2457_v25 = vrot.slane %v10668_v58, 2 }
 0x127   : > { %v2068_v50 = vrot.slane %v2066_v30, 1  ;;  %v2129_v30 = vshrl.u32 %v10692_v14, 16 }
 0x12c   : > { %8972 = vmatmul.mubr.msk.bf16.gmra.mrb[28].mxu0 %vm643_vm1, %v1575_v52  ;;  %v2071_v52 = vrot.slane %v2069_v39, 2  ;;  %v2132_v39 = vshll.u32 %v10692_v14, 16 }
 0x12d   : > { %8975 = vmatprep.mubr.msk.bf16.mxu0 %vm643_vm1, %v1577_v35  ;;  %v10654_v35 = vld [vmem:[%s10283_s22 + $0x60] sm:$0xff]  }
 0x12e   : > { %v2072_v40 = vor.u32 %v2071_v52, %v2068_v50  ;;  %v2084_v44 = vshrl.u32 %v10654_v35, 16  ;;  %v2087_v47 = vshll.u32 %v10654_v35, 16  ;;  %v2131_v50 = vrot.slane %v2129_v30, 1 }
 0x12f   : > { %v2134_v52 = vrot.slane %v2132_v39, 2  ;;  %v10793_v39 = vld [vmem:[%s10283_s22 + $0x20] sm:$0xff]  }
 0x130   : > { %v2086_v54 = vrot.slane %v2084_v44, 1  ;;  %v2082_v7 = vsel %vm1984_vm3, %v2072_v40, %v2081_v59  ;;  %v10709_v44 = vld [vmem:[%s10283_s22 + $0x98] ss:$0 sps:$4 sm:$0x11]  }
 0x131   : > { %v2147_v48 = vshll.u32 %v10709_v44, 16 }
 0x134   : > { %8976 = vmatmul.mubr.msk.bf16.gmra.mrb[32].mxu0 %vm643_vm1, %v1576_v46 }
 0x135   : > { %8981 = vmatprep.mubr.msk.bf16.mxu0 %vm643_vm1, %v2001_v57  ;;  %v2089_v57 = vrot.slane %v2087_v47, 2 }
 0x137   : > { %v2090_v63 = vor.u32 %v2089_v57, %v2086_v54  ;;  %v2149_v57 = vrot.slane %v2147_v48, 2  ;;  %v10828_v48 = vld [vmem:[%s10283_s22 + $0x48] sm:$0xff]  }
 0x13c   : > { %8982 = vmatmul.mubr.msk.bf16.vlgmr.msra.gmra.mrb[0].mxu0 %vm643_vm1, %v2010_v4  ;;  %v2095_v4 = vrot.slane %v2093_v61, 1  ;;  %v2433_v61 = vrot.slane %v10580_v45, 2  ;;  %v10730_v45 = vld [vmem:[%s12074_s2 + $0x38] sm:$0xff]  }
 0x13d   : > { %9018 = vmatpush3.bf16.msra.mxu0 %v10534_v56  ;;  %8985 = vmatprep.mubr.msk.bf16.mxu0 %vm643_vm1, %v2019_v10  ;;  %v10636_v56 = vld [vmem:[%s10283_s22 + $0x48] sm:$0xff]   ;;  %v2091_v10 = vsel %vm1984_vm3, %v2081_v59, %v2090_v63 }
 0x13e   : > { %9055 = vmatprep.subr.bf16.mxu0 %v10624_v15  ;;  %v2057_v33 = vshrl.u32 %v10636_v56, 16  ;;  %v2060_v37 = vshll.u32 %v10636_v56, 16  ;;  %v2099_v17 = vor.u32 %v2098_v26, %v2095_v4  ;;  %v2436_v2 = vsel %vm2431_vm4, %v2433_v61, %v2435_v0 }
 0x13f   : > { %v2439_v4 = vrot.slane %v10601_v55, 2  ;;  %v2447_v60 = vrot.slane %v10636_v56, 2  ;;  %v2455_v56 = vrot.slane %v10664_v51, 2  ;;  %v2463_v51 = vrot.slane %v10692_v14, 2 }
 0x140   : > { %v2059_v46 = vrot.slane %v2057_v33, 1  ;;  %v2062_v49 = vrot.slane %v2060_v37, 2  ;;  %v2100_v20 = vsel %vm1984_vm3, %v2090_v63, %v2099_v17  ;;  %v2109_v22 = vsel %vm1984_vm3, %v2099_v17, %v2108_v6  ;;  %v10696_v37 = vld [vmem:[%s10283_s22 + $0x90] sm:$0xff]  }
 0x141   : > { %v2442_v26 = vsel %vm2431_vm4, %v2439_v4, %v2441_v36  ;;  %v2450_v5 = vsel %vm2431_vm4, %v2447_v60, %v2449_v13  ;;  %v2465_v58 = vrot.slane %v10696_v37, 2  ;;  %v2467_v14 = vrot.slane %v10709_v44, 2 }
 0x142   : > { %v2063_v1 = vor.u32 %v2062_v49, %v2059_v46  ;;  %v2138_v46 = vshrl.u32 %v10696_v37, 16  ;;  %v2141_v49 = vshll.u32 %v10696_v37, 16 }
 0x143   : > { %v2468_v30 = vsel %vm2431_vm4, %v2465_v58, %v2467_v14 }
 0x144   : > { %8986 = vmatmul.mubr.msk.bf16.gmra.mrb[4].mxu0 %vm643_vm1, %v2028_v19  ;;  %v2064_v41 = vsel %vm1984_vm3, %v2054_v29, %v2063_v1  ;;  %v2073_v53 = vsel %vm1984_vm3, %v2063_v1, %v2072_v40  ;;  %v2123_v19 = vshll.u32 %v10682_v16, 16  ;;  %v2140_v38 = vrot.slane %v2138_v46, 1  ;;  %v10797_v46 = vld [vmem:[%s10283_s22 + $0x28] sm:$0xff]  }
 0x145   : > { %8989 = vmatprep.mubr.msk.bf16.mxu0 %vm643_vm1, %v2037_v24  ;;  %v2116_v24 = vrot.slane %v2114_v18, 2  ;;  %v2143_v21 = vrot.slane %v2141_v49, 2  ;;  %v2135_v40 = vor.u32 %v2134_v52, %v2131_v50  ;;  %v2878_v49 = vrot.slane %v10793_v39, 2  ;;  %v10805_v52 = vld [vmem:[%s10283_s22 + $0x30] sm:$0xff]  }
 0x146   : > { %v2125_v33 = vrot.slane %v2123_v19, 2  ;;  %v2461_v19 = vrot.slane %v10682_v16, 2  ;;  %v2466_v16 = vsel %vm2431_vm4, %v2463_v51, %v2465_v58  ;;  %v4203_v58 = vld [vmem:[%s12073_s1 + $0x30] sm:$0xff] }
 0x147   : > { %v2117_v29 = vor.u32 %v2116_v24, %v2113_v23  ;;  %v2144_v47 = vor.u32 %v2143_v21, %v2140_v38  ;;  %v2742_v24 = vld [vmem:[%s10283_s22 + $0x10] sm:$0xc]  ;;  %v10809_v38 = vld [vmem:[%s10283_s22 + $0x38] sm:$0xff]   ;;  %v10814_v21 = vld [vmem:[%s12074_s2 + $0x40] sm:$0xff]  }
 0x148   : > { %v2884_v44 = vrot.slane %v10809_v38, 2 }
 0x149   : > { %v2150_v62 = vsel %vm1984_vm3, %v2144_v47, %v2149_v57 }
 0x14c   : > { %8990 = vmatmul.mubr.msk.bf16.gmra.mrb[8].mxu0 %vm643_vm1, %v2046_v31  ;;  %v2126_v31 = vor.u32 %v2125_v33, %v2122_v27  ;;  %v10784_v33 = vld [vmem:[%s10283_s22 + $0x18] sm:$0xff]  }
 0x14d   : > { %8993 = vmatprep.mubr.msk.bf16.mxu0 %vm643_vm1, %v2055_v34  ;;  %v2118_v34 = vsel %vm1984_vm3, %v2108_v6, %v2117_v29 }
 0x14e   : > { %v2127_v1 = vsel %vm1984_vm3, %v2117_v29, %v2126_v31  ;;  %v2136_v43 = vsel %vm1984_vm3, %v2126_v31, %v2135_v40  ;;  %v2876_v29 = vrot.slane %v10784_v33, 2 }
 0x150   : > { %v2879_v50 = vsel %vm2431_vm4, %v2876_v29, %v2878_v49 }
 0x154   : > { %8994 = vmatmul.mubr.msk.bf16.gmra.mrb[12].mxu0 %vm643_vm1, %v2064_v41  ;;  %v2424_v41 = vld [vmem:[%s10283_s22 + $0x8] sm:$0xc] }
 0x155   : > { %8997 = vmatprep.mubr.msk.bf16.mxu0 %vm643_vm1, %v2073_v53  ;;  %v2145_v53 = vsel %vm1984_vm3, %v2135_v40, %v2144_v47  ;;  %v8101_v54 = vcombine.low %v2424_v41, %v10572_v28  ;;  %v2437_v28 = vrot.slane %v10592_v42, 2  ;;  %v2882_v40 = vrot.slane %v10805_v52, 2  ;;  %v10824_v41 = vld [vmem:[%s10283_s22 + $0x40] sm:$0xff]  }
 0x157   : > { %v2432_v59 = vrot.slane %v8101_v54, 2  ;;  %v2440_v42 = vsel %vm2431_vm4, %v2437_v28, %v2439_v4  ;;  %v2888_v54 = vrot.slane %v10828_v48, 2 }
 0x159   : > { %v2434_v63 = vsel %vm2431_vm4, %v2432_v59, %v2433_v61  ;;  %v10836_v59 = vld [vmem:[%s10283_s22 + $0x50] sm:$0xff]  }
 0x15c   : > { %8998 = vmatmul.mubr.msk.bf16.gmra.mrb[16].mxu0 %vm643_vm1, %v2082_v7  ;;  %v2438_v7 = vsel %vm2431_vm4, %v2435_v0, %v2437_v28 }
 0x15d   : > { %9001 = vmatprep.mubr.msk.bf16.mxu0 %vm643_vm1, %v2091_v10  ;;  %v2443_v10 = vrot.slane %v10615_v9, 2  ;;  %v2451_v9 = vrot.slane %v10650_v32, 2  ;;  %v2458_v32 = vsel %vm2431_vm4, %v2455_v56, %v2457_v25 }
 0x15f   : > { %v2444_v11 = vsel %vm2431_vm4, %v2441_v36, %v2443_v10  ;;  %v2452_v18 = vsel %vm2431_vm4, %v2449_v13, %v2451_v9 }
 0x164   : > { %9002 = vmatmul.mubr.msk.bf16.gmra.mrb[20].mxu0 %vm643_vm1, %v2100_v20 }
 0x165   : > { %9005 = vmatprep.mubr.msk.bf16.mxu0 %vm643_vm1, %v2109_v22  ;;  %v10776_v22 = vld [vmem:[%s10283_s22 + $0x14] sm:$0xf] }
 0x166   : > { %v10781_v27 = vcombine.low %v2742_v24, %v10776_v22 }
 0x168   : > { %v2875_v37 = vrot.slane %v10781_v27, 2  ;;  %v3197_v14 = vshll.u32 %v10781_v27, 16 }
 0x16a   : > { %v2877_v31 = vsel %vm2431_vm4, %v2875_v37, %v2876_v29  ;;  %v3202_v37 = vshrl.u32 %v10784_v33, 16  ;;  %v3205_v29 = vshll.u32 %v10784_v33, 16 }
 0x16c   : > { %9006 = vmatmul.mubr.msk.bf16.gmra.mrb[24].mxu0 %vm643_vm1, %v2118_v34  ;;  %v2880_v34 = vrot.slane %v10797_v46, 2 }
 0x16d   : > { %9009 = vmatprep.mubr.msk.bf16.mxu0 %vm643_vm1, %v2127_v1 }
 0x16e   : > { %v2881_v1 = vsel %vm2431_vm4, %v2878_v49, %v2880_v34  ;;  %v2883_v47 = vsel %vm2431_vm4, %v2880_v34, %v2882_v40 }
 0x174   : > { %9010 = vmatmul.mubr.msk.bf16.gmra.mrb[28].mxu0 %vm643_vm1, %v2136_v43  ;;  %v2885_v43 = vsel %vm2431_vm4, %v2882_v40, %v2884_v44  ;;  %v3204_v40 = vrot.slane %v3202_v37, 2  ;;  %v4215_v37 = vld [vmem:[%s12073_s1 + $0x90] sm:$0xff] }
 0x175   : > { %9013 = vmatprep.mubr.msk.bf16.mxu0 %vm643_vm1, %v2145_v53  ;;  %v2886_v53 = vrot.slane %v10824_v41, 2 }
 0x177   : > { %v2887_v57 = vsel %vm2431_vm4, %v2884_v44, %v2886_v53  ;;  %v2889_v61 = vsel %vm2431_vm4, %v2886_v53, %v2888_v54  ;;  %v3207_v44 = vrot.slane %v3205_v29, 3 }
 0x17c   : > { %9014 = vmatmul.mubr.msk.bf16.gmra.mrb[32].mxu0 %vm643_vm1, %v2150_v62  ;;  %v10840_v62 = vld [vmem:[%s10283_s22 + $0x58] sm:$0xff]  }
 0x17d   : > { %9019 = vmatprep.mubr.msk.bf16.mxu0 %vm643_vm1, %v2434_v63  ;;  %v2890_v63 = vrot.slane %v10836_v59, 2  ;;  %v2892_v0 = vrot.slane %v10840_v62, 2 }
 0x17f   : > { %v2891_v28 = vsel %vm2431_vm4, %v2888_v54, %v2890_v63  ;;  %v3211_v54 = vshrl.u32 %v10793_v39, 16 }
 0x184   : > { %9020 = vmatmul.mubr.msk.bf16.vlgmr.msra.gmra.mrb[0].mxu0 %vm643_vm1, %v2436_v2  ;;  %v10848_v2 = vld [vmem:[%s10283_s22 + $0x60] sm:$0xff]  }
 0x185   : > { %9056 = vmatpush3.bf16.msra.mxu0 %v10624_v15  ;;  %9023 = vmatprep.mubr.msk.bf16.mxu0 %vm643_vm1, %v2438_v7  ;;  %v2445_v15 = vrot.slane %v10619_v3, 2  ;;  %v2453_v3 = vrot.slane %v10654_v35, 2  ;;  %v2459_v35 = vrot.slane %v10678_v8, 2  ;;  %v2464_v8 = vsel %vm2431_vm4, %v2461_v19, %v2463_v51  ;;  %v4202_v51 = vld [vmem:[%s12073_s1 + $0x28] sm:$0xff] }
 0x186   : > { %9093 = vmatprep.subr.bf16.mxu0 %v10730_v45  ;;  %v2893_v7 = vsel %vm2431_vm4, %v2890_v63, %v2892_v0  ;;  %v2894_v4 = vrot.slane %v10848_v2, 2  ;;  %v3208_v63 = vor.u32 %v3207_v44, %v3204_v40 }
 0x187   : > { %v2446_v55 = vsel %vm2431_vm4, %v2443_v10, %v2445_v15  ;;  %v2448_v17 = vsel %vm2431_vm4, %v2445_v15, %v2447_v60  ;;  %v2454_v6 = vsel %vm2431_vm4, %v2451_v9, %v2453_v3  ;;  %v2456_v12 = vsel %vm2431_vm4, %v2453_v3, %v2455_v56  ;;  %v10864_v15 = vld [vmem:[%s10283_s22 + $0x78] sm:$0xff]   ;;  %v10879_v3 = vld [vmem:[%s10283_s22 + $0x88] sm:$0xff]  }
 0x188   : > { %v2460_v20 = vsel %vm2431_vm4, %v2457_v25, %v2459_v35  ;;  %v2462_v23 = vsel %vm2431_vm4, %v2459_v35, %v2461_v19  ;;  %v10206_v60 = vmov 0   ;;  %v2900_v13 = vrot.slane %v10864_v15, 2  ;;  %v10899_v19 = vld [vmem:[%s10283_s22 + $0x90] sm:$0xff]  }
 0x189   : > { %10099 = vset.pattern.permute.xlu0 %v10206_v60  ;;  %10100 = vset.pattern.permute.xlu1 %v10206_v60  ;;  %v2904_v25 = vrot.slane %v10879_v3, 2  ;;  %v2906_v24 = vrot.slane %v10899_v19, 2 }
 0x18b   : > { %v2907_v49 = vsel %vm2431_vm4, %v2904_v25, %v2906_v24 }
 0x18c   : > { %9024 = vmatmul.mubr.msk.bf16.gmra.mrb[4].mxu0 %vm643_vm1, %v2440_v42  ;;  %v2895_v42 = vsel %vm2431_vm4, %v2892_v0, %v2894_v4  ;;  %v3220_v0 = vshrl.u32 %v10797_v46, 16 }
 0x18d   : > { %9027 = vmatprep.mubr.msk.bf16.mxu0 %vm643_vm1, %v2442_v26  ;;  %v10860_v26 = vld [vmem:[%s10283_s22 + $0x70] sm:$0xff]  }
 0x194   : > { %9028 = vmatmul.mubr.msk.bf16.gmra.mrb[8].mxu0 %vm643_vm1, %v2444_v11  ;;  %v4197_v11 = vld [vmem:[%s12073_s1] sm:$0xff] }
 0x195   : > { %9031 = vmatprep.mubr.msk.bf16.mxu0 %vm643_vm1, %v2446_v55  ;;  %v2898_v55 = vrot.slane %v10860_v26, 2  ;;  %4235 = vperm.xlu0 %10099, %v4197_v11  }
 0x197   : > { %v2901_v9 = vsel %vm2431_vm4, %v2898_v55, %v2900_v13 }
 0x19c   : > { %9032 = vmatmul.mubr.msk.bf16.gmra.mrb[12].mxu0 %vm643_vm1, %v2448_v17 }
 0x19d   : > { %9035 = vmatprep.mubr.msk.bf16.mxu0 %vm643_vm1, %v2450_v5  ;;  %v10875_v5 = vld [vmem:[%s10283_s22 + $0x80] sm:$0xff]  }
 0x19e   : > { %v2902_v56 = vrot.slane %v10875_v5, 2 }
 0x1a0   : > { %v2903_v35 = vsel %vm2431_vm4, %v2900_v13, %v2902_v56  ;;  %v4210_v13 = vld [vmem:[%s12073_s1 + $0x68] sm:$0xff] }
 0x1a4   : > { %9036 = vmatmul.mubr.msk.bf16.gmra.mrb[16].mxu0 %vm643_vm1, %v2452_v18  ;;  %v4199_v18 = vld [vmem:[%s12073_s1 + $0x10] sm:$0xff] }
 0x1a5   : > { %9039 = vmatprep.mubr.msk.bf16.mxu0 %vm643_vm1, %v2454_v6  ;;  %v4198_v6 = vld [vmem:[%s12073_s1 + $0x8] sm:$0xff]  ;;  %4245 = vperm.xlu1 %10100, %v4199_v18   ;;  %v3229_v18 = vshrl.u32 %v10805_v52, 16 }
 0x1a6   : > { %4240 = vperm.xlu0 %10099, %v4198_v6   ;;  %v3232_v6 = vshll.u32 %v10805_v52, 16 }
 0x1ac   : > { %9040 = vmatmul.mubr.msk.bf16.gmra.mrb[20].mxu0 %vm643_vm1, %v2456_v12  ;;  %v4200_v12 = vld [vmem:[%s12073_s1 + $0x18] sm:$0xff] }
 0x1ad   : > { %9043 = vmatprep.mubr.msk.bf16.mxu0 %vm643_vm1, %v2458_v32  ;;  %v4201_v32 = vld [vmem:[%s12073_s1 + $0x20] sm:$0xff]  ;;  %4250 = vperm.xlu1 %10100, %v4200_v12   ;;  %v3241_v12 = vshll.u32 %v10809_v38, 16 }
 0x1ae   : > { %4255 = vperm.xlu0 %10099, %v4201_v32   ;;  %v4212_v32 = vld [vmem:[%s12073_s1 + $0x78] sm:$0xff] }
 0x1b1   : > { %4260 = vperm.xlu1 %10100, %v4202_v51   ;;  %v3231_v51 = vrot.slane %v3229_v18, 2  ;;  %v4223_v18 = vld [vmem:[%s12073_s1 + $0xd0] sm:$0xff] }
 0x1b2   : > { %4265 = vperm.xlu0 %10099, %v4203_v58   ;;  %v3234_v58 = vrot.slane %v3232_v6, 3 }
 0x1b4   : > { %9044 = vmatmul.mubr.msk.bf16.gmra.mrb[24].mxu0 %vm643_vm1, %v2460_v20  ;;  %v10902_v20 = vld [vmem:[%s10283_s22 + $0x98] sm:$0xff]   ;;  %v3235_v29 = vor.u32 %v3234_v58, %v3231_v51  ;;  %v4225_v51 = vld [vmem:[%s12073_s1 + $0xe0] sm:$0xff] }
 0x1b5   : > { %9047 = vmatprep.mubr.msk.bf16.mxu0 %vm643_vm1, %v2462_v23  ;;  %v2905_v23 = vsel %vm2431_vm4, %v2902_v56, %v2904_v25  ;;  %v3238_v25 = vshrl.u32 %v10809_v38, 16 }
 0x1bc   : > { %9048 = vmatmul.mubr.msk.bf16.gmra.mrb[28].mxu0 %vm643_vm1, %v2464_v8  ;;  %v2908_v8 = vrot.slane %v10902_v20, 2 }
 0x1bd   : > { %9051 = vmatprep.mubr.msk.bf16.mxu0 %vm643_vm1, %v2466_v16  ;;  %v3194_v16 = vshrl.u32 %v10781_v27, 16 }
 0x1be   : > { %v2909_v34 = vsel %vm2431_vm4, %v2906_v24, %v2908_v8 }
 0x1bf   : > { %v3196_v27 = vrot.slane %v3194_v16, 2  ;;  %v3243_v16 = vrot.slane %v3241_v12, 3 }
 0x1c4   : > { %9052 = vmatmul.mubr.msk.bf16.gmra.mrb[32].mxu0 %vm643_vm1, %v2468_v30  ;;  %v4204_v30 = vld [vmem:[%s12073_s1 + $0x38] sm:$0xff] }
 0x1c5   : > { %9057 = vmatprep.mubr.msk.bf16.mxu0 %vm643_vm1, %v2877_v31  ;;  %v4205_v31 = vld [vmem:[%s12073_s1 + $0x40] sm:$0xff]  ;;  %4270 = vperm.xlu1 %10100, %v4204_v30   ;;  %v3247_v30 = vshrl.u32 %v10824_v41, 16 }
 0x1c6   : > { %4275 = vperm.xlu0 %10099, %v4205_v31   ;;  %v3250_v31 = vshll.u32 %v10824_v41, 16 }
 0x1c7   : > { %v3249_v40 = vrot.slane %v3247_v30, 2  ;;  %v4227_v30 = vld [vmem:[%s12073_s1 + $0xf0] sm:$0xff] }
 0x1c8   : > { %v3252_v44 = vrot.slane %v3250_v31, 3 }
 0x1cc   : > { %9058 = vmatmul.mubr.msk.bf16.vlgmr.msra.gmra.mrb[0].mxu0 %vm643_vm1, %v2879_v50  ;;  %v10185_v50 = vld [vmem:[%s10283_s22 + $0xa0] ss:$0 sps:$4 sm:$0x11]  }
 0x1cd   : > { %9094 = vmatpush3.bf16.msra.mxu0 %v10730_v45  ;;  %9061 = vmatprep.mubr.msk.bf16.mxu0 %vm643_vm1, %v2881_v1  ;;  %v10852_v45 = vld [vmem:[%s10283_s22 + $0x68] sm:$0xff]   ;;  %v3199_v1 = vrot.slane %v3197_v14, 3  ;;  %v2910_v53 = vrot.slane %v10185_v50, 2  ;;  %v3259_v50 = vshll.u32 %v10828_v48, 16 }
 0x1ce   : > { %9131 = vmatprep.subr.bf16.mxu0 %v10814_v21  ;;  %v2896_v36 = vrot.slane %v10852_v45, 2  ;;  %v4214_v14 = vld [vmem:[%s12073_s1 + $0x88] sm:$0xff] }
 0x1d0   : > { %v2897_v10 = vsel %vm2431_vm4, %v2894_v4, %v2896_v36  ;;  %v2899_v17 = vsel %vm2431_vm4, %v2896_v36, %v2898_v55  ;;  %v4209_v4 = vld [vmem:[%s12073_s1 + $0x60] sm:$0xff]  ;;  %v2911_v36 = vsel %vm2431_vm4, %v2908_v8, %v2910_v53  ;;  %v3222_v55 = vrot.slane %v3220_v0, 2 }
 0x1d1   : > { %v3240_v8 = vrot.slane %v3238_v25, 2  ;;  %v3261_v53 = vrot.slane %v3259_v50, 3  ;;  %v3268_v0 = vshll.u32 %v10836_v59, 16  ;;  %v3286_v25 = vshll.u32 %v10848_v2, 16 }
 0x1d4   : > { %9062 = vmatmul.mubr.msk.bf16.gmra.mrb[4].mxu0 %vm643_vm1, %v2883_v47  ;;  %v4206_v47 = vld [vmem:[%s12073_s1 + $0x48] sm:$0xff] }
 0x1d5   : > { %9065 = vmatprep.mubr.msk.bf16.mxu0 %vm643_vm1, %v2885_v43  ;;  %v4207_v43 = vld [vmem:[%s12073_s1 + $0x50] sm:$0xff]  ;;  %4280 = vperm.xlu1 %10100, %v4206_v47  }
 0x1d6   : > { %4285 = vperm.xlu0 %10099, %v4207_v43  }
 0x1da   : > { %4295 = vperm.xlu0 %10099, %v4209_v4   ;;  %v3277_v4 = vshll.u32 %v10840_v62, 16 }
 0x1dc   : > { %9066 = vmatmul.mubr.msk.bf16.gmra.mrb[8].mxu0 %vm643_vm1, %v2887_v57  ;;  %v3214_v57 = vshll.u32 %v10793_v39, 16 }
 0x1dd   : > { %9069 = vmatprep.mubr.msk.bf16.mxu0 %vm643_vm1, %v2889_v61  ;;  %v3200_v61 = vor.u32 %v3199_v1, %v3196_v27  ;;  %v4216_v27 = vld [vmem:[%s12073_s1 + $0x98] sm:$0xff] }
 0x1df   : > { %v3209_v11 = vsel %vm3192_vm5, %v3200_v61, %v3208_v63  ;;  %v3253_v61 = vor.u32 %v3252_v44, %v3249_v40  ;;  %v4229_v40 = vld [vmem:[%s12073_s1 + $0x100] sm:$0xff] }
 0x1e4   : > { %9070 = vmatmul.mubr.msk.bf16.gmra.mrb[12].mxu0 %vm643_vm1, %v2891_v28  ;;  %v3223_v28 = vshll.u32 %v10797_v46, 16 }
 0x1e5   : > { %9073 = vmatprep.mubr.msk.bf16.mxu0 %vm643_vm1, %v2893_v7  ;;  %v4208_v7 = vld [vmem:[%s12073_s1 + $0x58] sm:$0xff] }
 0x1e6   : > { %4290 = vperm.xlu1 %10100, %v4208_v7   ;;  %v3225_v60 = vrot.slane %v3223_v28, 3  ;;  %v3274_v7 = vshrl.u32 %v10840_v62, 16 }
 0x1e8   : > { %v3226_v56 = vor.u32 %v3225_v60, %v3222_v55  ;;  %v3270_v55 = vrot.slane %v3268_v0, 3 }
 0x1ea   : > { %4300 = vperm.xlu1 %10100, %v4210_v13   ;;  %v3236_v1 = vsel %vm3192_vm5, %v3226_v56, %v3235_v29  ;;  %v3276_v13 = vrot.slane %v3274_v7, 2  ;;  %v3322_v7 = vshll.u32 %v10875_v5, 16 }
 0x1ec   : > { %9074 = vmatmul.mubr.msk.bf16.gmra.mrb[16].mxu0 %vm643_vm1, %v2895_v42  ;;  %v3213_v42 = vrot.slane %v3211_v54, 2  ;;  %v4218_v54 = vld [vmem:[%s12073_s1 + $0xa8] sm:$0xff] }
 0x1ed   : > { %9077 = vmatprep.mubr.msk.bf16.mxu0 %vm643_vm1, %v2897_v10  ;;  %v3216_v10 = vrot.slane %v3214_v57, 3  ;;  %v4219_v57 = vld [vmem:[%s12073_s1 + $0xb0] sm:$0xff] }
 0x1ee   : > { %4310 = vperm.xlu1 %10100, %v4212_v32   ;;  %v3292_v32 = vshrl.u32 %v10852_v45, 16 }
 0x1f2   : > { %4320 = vperm.xlu1 %10100, %v4214_v14   ;;  %v3294_v14 = vrot.slane %v3292_v32, 2  ;;  %v3349_v32 = vshll.u32 %v10902_v20, 16 }
 0x1f4   : > { %9078 = vmatmul.mubr.msk.bf16.gmra.mrb[20].mxu0 %vm643_vm1, %v2899_v17  ;;  %v4211_v17 = vld [vmem:[%s12073_s1 + $0x70] sm:$0xff] }
 0x1f5   : > { %9081 = vmatprep.mubr.msk.bf16.mxu0 %vm643_vm1, %v2901_v9  ;;  %v3217_v9 = vor.u32 %v3216_v10, %v3213_v42  ;;  %4305 = vperm.xlu0 %10099, %v4211_v17   ;;  %v4221_v42 = vld [vmem:[%s12073_s1 + $0xc0] sm:$0xff]  ;;  %v3279_v17 = vrot.slane %v3277_v4, 3 }
 0x1f6   : > { %4330 = vperm.xlu1 %10100, %v4216_v27   ;;  %v3310_v27 = vshrl.u32 %v10864_v15, 16 }
 0x1f7   : > { %v3227_v24 = vsel %vm3192_vm5, %v3217_v9, %v3226_v56  ;;  %v3283_v56 = vshrl.u32 %v10848_v2, 16  ;;  %v3280_v12 = vor.u32 %v3279_v17, %v3276_v13 }
 0x1fa   : > { %4340 = vperm.xlu1 %10100, %v4218_v54   ;;  %v3312_v54 = vrot.slane %v3310_v27, 2 }
 0x1fc   : > { %9082 = vmatmul.mubr.msk.bf16.gmra.mrb[24].mxu0 %vm643_vm1, %v2903_v35  ;;  %v4213_v35 = vld [vmem:[%s12073_s1 + $0x80] sm:$0xff] }
 0x1fd   : > { %9085 = vmatprep.mubr.msk.bf16.mxu0 %vm643_vm1, %v2905_v23  ;;  %v3218_v23 = vsel %vm3192_vm5, %v3208_v63, %v3217_v9  ;;  %4315 = vperm.xlu0 %10099, %v4213_v35   ;;  %v3265_v63 = vshrl.u32 %v10836_v59, 16  ;;  %v4222_v9 = vld [vmem:[%s12073_s1 + $0xc8] sm:$0xff]  ;;  %v3295_v35 = vshll.u32 %v10852_v45, 16 }
 0x201   : > { %4325 = vperm.xlu0 %10099, %v4215_v37   ;;  %v3297_v37 = vrot.slane %v3295_v35, 3 }
 0x203   : > { %v3298_v50 = vor.u32 %v3297_v37, %v3294_v14 }
 0x204   : > { %9086 = vmatmul.mubr.msk.bf16.gmra.mrb[28].mxu0 %vm643_vm1, %v2907_v49  ;;  %v3244_v49 = vor.u32 %v3243_v16, %v3240_v8  ;;  %v3288_v8 = vrot.slane %v3286_v25, 3 }
 0x205   : > { %9089 = vmatprep.mubr.msk.bf16.mxu0 %vm643_vm1, %v2909_v34  ;;  %v3256_v34 = vshrl.u32 %v10828_v48, 16 }
 0x206   : > { %v3245_v47 = vsel %vm3192_vm5, %v3235_v29, %v3244_v49  ;;  %v3254_v10 = vsel %vm3192_vm5, %v3244_v49, %v3253_v61  ;;  %v4226_v29 = vld [vmem:[%s12073_s1 + $0xe8] sm:$0xff]  ;;  %v3301_v49 = vshrl.u32 %v10860_v26, 16 }
 0x207   : > { %v3258_v43 = vrot.slane %v3256_v34, 2  ;;  %v3304_v34 = vshll.u32 %v10860_v26, 16 }
 0x209   : > { %v3262_v28 = vor.u32 %v3261_v53, %v3258_v43  ;;  %v3306_v43 = vrot.slane %v3304_v34, 3 }
 0x20b   : > { %v3263_v60 = vsel %vm3192_vm5, %v3253_v61, %v3262_v28  ;;  %v4230_v61 = vld [vmem:[%s12073_s1 + $0x108] sm:$0xff] }
 0x20c   : > { %9090 = vmatmul.mubr.msk.bf16.gmra.mrb[32].mxu0 %vm643_vm1, %v2911_v36  ;;  %v4220_v36 = vld [vmem:[%s12073_s1 + $0xb8] sm:$0xff] }
 0x20d   : > { %9095 = vmatprep.mubr.msk.bf16.mxu0 %vm643_vm1, %v3209_v11  ;;  %v3267_v11 = vrot.slane %v3265_v63, 2  ;;  %4350 = vperm.xlu1 %10100, %v4220_v36   ;;  %v4231_v63 = vld [vmem:[%s12073_s1 + $0x110] sm:$0xff]  ;;  %v3328_v36 = vshrl.u32 %v10879_v3, 16 }
 0x20f   : > { %v3271_v6 = vor.u32 %v3270_v55, %v3267_v11  ;;  %v3330_v17 = vrot.slane %v3328_v36, 2 }
 0x211   : > { %4360 = vperm.xlu1 %10100, %v4222_v9   ;;  %v3272_v58 = vsel %vm3192_vm5, %v3262_v28, %v3271_v6  ;;  %v3281_v16 = vsel %vm3192_vm5, %v3271_v6, %v3280_v12  ;;  %v3319_v28 = vshrl.u32 %v10875_v5, 16  ;;  %v3337_v6 = vshrl.u32 %v10899_v19, 16 }
 0x213   : > { %v3321_v55 = vrot.slane %v3319_v28, 2 }
 0x214   : > { %9096 = vmatmul.mubr.msk.bf16.vlgmr.msra.gmra.mrb[0].mxu0 %vm643_vm1, %v3218_v23  ;;  %v4224_v23 = vld [vmem:[%s12073_s1 + $0xd8] sm:$0xff] }
 0x215   : > { %9132 = vmatpush3.bf16.msra.mxu0 %v10814_v21  ;;  %9099 = vmatprep.mubr.msk.bf16.mxu0 %vm643_vm1, %v3227_v24  ;;  %v4217_v21 = vld [vmem:[%s12073_s1 + $0xa0] sm:$0xff]  ;;  %v3285_v24 = vrot.slane %v3283_v56, 2  ;;  %v3340_v56 = vshll.u32 %v10899_v19, 16 }
 0x216   : > { %4335 = vperm.xlu0 %10099, %v4217_v21   ;;  %4370 = vperm.xlu1 %10100, %v4224_v23   ;;  %v3313_v21 = vshll.u32 %v10864_v15, 16  ;;  %v3339_v23 = vrot.slane %v3337_v6, 2 }
 0x217   : > { %v3289_v31 = vor.u32 %v3288_v8, %v3285_v24 }
 0x219   : > { %v3290_v44 = vsel %vm3192_vm5, %v3280_v12, %v3289_v31  ;;  %v3299_v53 = vsel %vm3192_vm5, %v3289_v31, %v3298_v50  ;;  %v3346_v12 = vshrl.u32 %v10902_v20, 16  ;;  %v3636_v31 = vld [vmem:[%s10283_s22 + $0x10] sm:$0x8] }
 0x21a   : > { %4345 = vperm.xlu0 %10099, %v4219_v57   ;;  %4380 = vperm.xlu1 %10100, %v4226_v29   ;;  %v3315_v57 = vrot.slane %v3313_v21, 3  ;;  %v8185_v21 = vcombine.low %v3636_v31, %v10776_v22  ;;  %v3649_v22 = vrot.slane %v10797_v46, 3  ;;  %v3657_v46 = vrot.slane %v10828_v48, 3  ;;  %v11255_v31 = vld [vmem:[%s12076_s4] ss:$0 sm:$0xff] }
 0x21b   : > { %v3348_v8 = vrot.slane %v3346_v12, 2  ;;  %v3665_v48 = vrot.slane %v10852_v45, 3  ;;  %v3673_v45 = vrot.slane %v10879_v3, 3  ;;  %v4236_v12 = vpop.permute.xlu0 %4235 }
 0x21c   : > { %9100 = vmatmul.mubr.msk.bf16.gmra.mrb[4].mxu0 %vm643_vm1, %v3236_v1  ;;  %v4228_v1 = vld [vmem:[%s12073_s1 + $0xf8] sm:$0xff]  ;;  %v3316_v4 = vor.u32 %v3315_v57, %v3312_v54 }
 0x21d   : > { %9103 = vmatprep.mubr.msk.bf16.mxu0 %vm643_vm1, %v3245_v47  ;;  %v3303_v47 = vrot.slane %v3301_v49, 2 }
 0x21e   : > { %4355 = vperm.xlu0 %10099, %v4221_v42   ;;  %4390 = vperm.xlu1 %10100, %v4228_v1   ;;  %v3331_v42 = vshll.u32 %v10879_v3, 16 }
 0x21f   : > { %v3307_v0 = vor.u32 %v3306_v43, %v3303_v47 }
 0x220   : > { %v3333_v9 = vrot.slane %v3331_v42, 3 }
 0x221   : > { %v3308_v11 = vsel %vm3192_vm5, %v3298_v50, %v3307_v0  ;;  %v3317_v13 = vsel %vm3192_vm5, %v3307_v0, %v3316_v4 }
 0x222   : > { %4365 = vperm.xlu0 %10099, %v4223_v18   ;;  %4400 = vperm.xlu1 %10100, %v4230_v61   ;;  %v3334_v25 = vor.u32 %v3333_v9, %v3330_v17  ;;  %v3653_v61 = vrot.slane %v10809_v38, 3  ;;  %v3661_v38 = vrot.slane %v10840_v62, 3  ;;  %v3669_v62 = vrot.slane %v10864_v15, 3 }
 0x223   : > { %v3677_v15 = vrot.slane %v10902_v20, 3 }
 0x224   : > { %9104 = vmatmul.mubr.msk.bf16.gmra.mrb[8].mxu0 %vm643_vm1, %v3254_v10  ;;  %v4232_v10 = vld [vmem:[%s12073_s1 + $0x118] sm:$0x3f] }
 0x225   : > { %9107 = vmatprep.mubr.msk.bf16.mxu0 %vm643_vm1, %v3263_v60  ;;  %v3324_v60 = vrot.slane %v3322_v7, 3 }
 0x226   : > { %4375 = vperm.xlu0 %10099, %v4225_v51   ;;  %4410 = vperm.xlu1 %10100, %v4232_v10   ;;  %v3342_v51 = vrot.slane %v3340_v56, 3 }
 0x227   : > { %v3325_v18 = vor.u32 %v3324_v60, %v3321_v55 }
 0x228   : > { %v3343_v14 = vor.u32 %v3342_v51, %v3339_v23 }
 0x229   : > { %v3326_v35 = vsel %vm3192_vm5, %v3316_v4, %v3325_v18  ;;  %v3335_v24 = vsel %vm3192_vm5, %v3325_v18, %v3334_v25  ;;  %v10207_v18 = vmov 0.0  }
 0x22a   : > { %4385 = vperm.xlu0 %10099, %v4227_v30   ;;  %v3344_v49 = vsel %vm3192_vm5, %v3334_v25, %v3343_v14  ;;  %4159 = vst.msk [vmem:[#allocation2 + $0x20] sm:$0xff] %vm643_vm1, %v10207_v18  ;;  %4160 = vst.msk [vmem:[#allocation2 + $0x28] sm:$0xff] %vm643_vm1, %v10207_v18  ;;  %v11230_v25 = vld [vmem:[%s12078_s6] sm:$0xff]  }
 0x22b   : > { %4155 = vst.msk [vmem:[#allocation2] sm:$0xff] %vm643_vm1, %v10207_v18  ;;  %4156 = vst.msk [vmem:[#allocation2 + $0x8] sm:$0xff] %vm643_vm1, %v10207_v18 }
 0x22c   : > { %9108 = vmatmul.mubr.msk.bf16.gmra.mrb[12].mxu0 %vm643_vm1, %v3272_v58  ;;  %v11074_v58 = vld [vmem:[%s10283_s22 + $0xa0] ss:$0 sps:$4 sm:$0x33]   ;;  %4157 = vst.msk [vmem:[#allocation2 + $0x10] sm:$0xff] %vm643_vm1, %v10207_v18  ;;  %4158 = vst.msk [vmem:[#allocation2 + $0x18] sm:$0xff] %vm643_vm1, %v10207_v18 }
 0x22d   : > { %9111 = vmatprep.mubr.msk.bf16.mxu0 %vm643_vm1, %v3281_v16  ;;  %v3351_v16 = vrot.slane %v3349_v32, 3  ;;  %v3355_v37 = vshrl.u32 %v11074_v58, 16  ;;  %v3358_v29 = vshll.u32 %v11074_v58, 16  ;;  %4161 = vst.msk [vmem:[#allocation2 + $0x30] sm:$0xff] %vm643_vm1, %v10207_v18  ;;  %4162 = vst.msk [vmem:[#allocation2 + $0x38] sm:$0xff] %vm643_vm1, %v10207_v18  ;;  %v4246_v32 = vpop.permute.xlu1 %4245 }
 0x22e   : > { %4395 = vperm.xlu0 %10099, %v4229_v40   ;;  %v3644_v40 = vrot.slane %v8185_v21, 3  ;;  %4163 = vst.msk [vmem:[#allocation2 + $0x40] sm:$0xff] %vm643_vm1, %v10207_v18  ;;  %4164 = vst.msk [vmem:[#allocation2 + $0x48] sm:$0xff] %vm643_vm1, %v10207_v18 }
 0x22f   : > { %v3352_v30 = vor.u32 %v3351_v16, %v3348_v8  ;;  %v3357_v34 = vrot.slane %v3355_v37, 2  ;;  %v3360_v50 = vrot.slane %v3358_v29, 3  ;;  %4165 = vst.msk [vmem:[#allocation2 + $0x50] sm:$0xff] %vm643_vm1, %v10207_v18  ;;  %4166 = vst.msk [vmem:[#allocation2 + $0x58] sm:$0xff] %vm643_vm1, %v10207_v18  ;;  %v11248_v37 = vld [vmem:[%s12075_s3] ss:$0 sm:$0xff] }
 0x230   : > { %4167 = vst.msk [vmem:[#allocation2 + $0x60] sm:$0xff] %vm643_vm1, %v10207_v18  ;;  %4168 = vst.msk [vmem:[#allocation2 + $0x68] sm:$0xff] %vm643_vm1, %v10207_v18 }
 0x231   : > { %v3353_v27 = vsel %vm3192_vm5, %v3343_v14, %v3352_v30  ;;  %v3361_v1 = vor.u32 %v3360_v50, %v3357_v34  ;;  %4169 = vst.msk [vmem:[#allocation2 + $0x70] sm:$0xff] %vm643_vm1, %v10207_v18  ;;  %4170 = vst.msk [vmem:[#allocation2 + $0x78] sm:$0xff] %vm643_vm1, %v10207_v18  ;;  %v4251_v23 = vpop.permute.xlu1 %4250 }
 0x232   : > { %4405 = vperm.xlu0 %10099, %v4231_v63   ;;  %4171 = vst.msk [vmem:[#allocation2 + $0x80] sm:$0xff] %vm643_vm1, %v10207_v18  ;;  %4172 = vst.msk [vmem:[#allocation2 + $0x88] sm:$0xff] %vm643_vm1, %v10207_v18  ;;  %v4542_v20 = vld [vmem:[#allocation2 + $0x1] sm:$0xff] }
 0x233   : > { %v3362_v47 = vsel %vm3192_vm5, %v3352_v30, %v3361_v1  ;;  %4173 = vst.msk [vmem:[#allocation2 + $0x90] sm:$0xff] %vm643_vm1, %v10207_v18  ;;  %4174 = vst.msk [vmem:[#allocation2 + $0x98] sm:$0xff] %vm643_vm1, %v10207_v18  ;;  %v4543_v6 = vld [vmem:[#allocation2 + $0x9] sm:$0xff] }
 0x234   : > { %9112 = vmatmul.mubr.msk.bf16.gmra.mrb[16].mxu0 %vm643_vm1, %v3290_v44  ;;  %v3645_v44 = vrot.slane %v10784_v33, 3  ;;  %v3651_v33 = vrot.slane %v10805_v52, 3  ;;  %v3659_v52 = vrot.slane %v10836_v59, 3  ;;  %v3667_v59 = vrot.slane %v10860_v26, 3  ;;  %4175 = vst.msk [vmem:[#allocation2 + $0xa0] sm:$0xff] %vm643_vm1, %v10207_v18  ;;  %4176 = vst.msk [vmem:[#allocation2 + $0xa8] sm:$0xff] %vm643_vm1, %v10207_v18 }
 0x235   : > { %9115 = vmatprep.mubr.msk.bf16.mxu0 %vm643_vm1, %v3299_v53  ;;  %v3647_v53 = vrot.slane %v10793_v39, 3  ;;  %v3655_v39 = vrot.slane %v10824_v41, 3  ;;  %v3663_v41 = vrot.slane %v10848_v2, 3  ;;  %v3671_v2 = vrot.slane %v10875_v5, 3  ;;  %4177 = vst.msk [vmem:[#allocation2 + $0xb0] sm:$0xff] %vm643_vm1, %v10207_v18  ;;  %4178 = vst.msk [vmem:[#allocation2 + $0xb8] sm:$0xff] %vm643_vm1, %v10207_v18 }
 0x236   : > { %v3646_v43 = vsel %vm3643_vm6, %v3644_v40, %v3645_v44  ;;  %v3652_v63 = vsel %vm3643_vm6, %v3649_v22, %v3651_v33  ;;  %v3654_v0 = vsel %vm3643_vm6, %v3651_v33, %v3653_v61  ;;  %v3660_v4 = vsel %vm3643_vm6, %v3657_v46, %v3659_v52  ;;  %4179 = vst.msk [vmem:[#allocation2 + $0xc0] sm:$0xff] %vm643_vm1, %v10207_v18 }
 0x237   : > { %v3648_v54 = vsel %vm3643_vm6, %v3645_v44, %v3647_v53  ;;  %v3650_v57 = vsel %vm3643_vm6, %v3647_v53, %v3649_v22  ;;  %v3656_v28 = vsel %vm3643_vm6, %v3653_v61, %v3655_v39  ;;  %v3658_v7 = vsel %vm3643_vm6, %v3655_v39, %v3657_v46  ;;  %4180 = vst.msk [vmem:[#allocation2 + $0xc8] sm:$0xff] %vm643_vm1, %v10207_v18 }
 0x238   : > { %v3662_v36 = vsel %vm3643_vm6, %v3659_v52, %v3661_v38  ;;  %v3664_v42 = vsel %vm3643_vm6, %v3661_v38, %v3663_v41  ;;  %v3666_v10 = vsel %vm3643_vm6, %v3663_v41, %v3665_v48  ;;  %v3670_v55 = vsel %vm3643_vm6, %v3667_v59, %v3669_v62  ;;  %4181 = vst.msk [vmem:[#allocation2 + $0xd0] sm:$0xff] %vm643_vm1, %v10207_v18 }
 0x239   : > { %v3672_v60 = vsel %vm3643_vm6, %v3669_v62, %v3671_v2  ;;  %v3675_v26 = vrot.slane %v10899_v19, 3  ;;  %v3679_v5 = vrot.slane %v11074_v58, 3  ;;  %4182 = vst.msk [vmem:[#allocation2 + $0xd8] sm:$0xff] %vm643_vm1, %v10207_v18  ;;  %4183 = vst.msk [vmem:[#allocation2 + $0xe0] sm:$0xff] %vm643_vm1, %v10207_v18  ;;  %v10189_v19 = vld [vmem:[%s12078_s6 + $0x8] sm:$0xff]   ;;  %v4578_v56 = vpack.c.bf16 %v4543_v6, %v4542_v20  ;;  %v11235_v58 = vpop.permute.xlu1 %4260 }
 0x23a   : > { %4184 = vst.msk [vmem:[#allocation2 + $0xe8] sm:$0xff] %vm643_vm1, %v10207_v18  ;;  %4185 = vst.msk [vmem:[#allocation2 + $0xf0] sm:$0xff] %vm643_vm1, %v10207_v18  ;;  %9169 = vmatprep.subr.bf16.mxu1 %v10189_v19 }
 0x23b   : > { %v3676_v17 = vsel %vm3643_vm6, %v3673_v45, %v3675_v26  ;;  %v3678_v9 = vsel %vm3643_vm6, %v3675_v26, %v3677_v15  ;;  %v3680_v3 = vsel %vm3643_vm6, %v3677_v15, %v3679_v5  ;;  %4186 = vst.msk [vmem:[#allocation2 + $0xf8] sm:$0xff] %vm643_vm1, %v10207_v18  ;;  %4187 = vst.msk [vmem:[#allocation2 + $0x100] sm:$0xff] %vm643_vm1, %v10207_v18  ;;  %9170 = vmatpush3.bf16.msra.mxu1 %v10189_v19 }
 0x23c   : > { %9116 = vmatmul.mubr.msk.bf16.gmra.mrb[20].mxu0 %vm643_vm1, %v3308_v11  ;;  %v3668_v11 = vsel %vm3643_vm6, %v3665_v48, %v3667_v59  ;;  %4188 = vst.msk [vmem:[#allocation2 + $0x108] sm:$0xff] %vm643_vm1, %v10207_v18  ;;  %4189 = vst.msk [vmem:[#allocation2 + $0x110] sm:$0xff] %vm643_vm1, %v10207_v18  ;;  %9171 = vmatprep.mubr.msk.bf16.mxu1 %vm643_vm1, %v4578_v56 }
 0x23d   : > { %9119 = vmatprep.mubr.msk.bf16.mxu0 %vm643_vm1, %v3317_v13  ;;  %v3674_v13 = vsel %vm3643_vm6, %v3671_v2, %v3673_v45  ;;  %4190 = vst.msk [vmem:[#allocation2 + $0x118] sm:$0xff] %vm643_vm1, %v10207_v18  ;;  %4191 = vst.msk [vmem:[#allocation2 + $0x120] sm:$0xff] %vm643_vm1, %v10207_v18  ;;  %9207 = vmatprep.subr.bf16.mxu1 %v11230_v25 }
 0x23e   : > { %4192 = vst.msk [vmem:[#allocation2 + $0x128] sm:$0xff] %vm643_vm1, %v10207_v18  ;;  %4193 = vst.msk [vmem:[#allocation2 + $0x130] sm:$0xff] %vm643_vm1, %v10207_v18 }
 0x23f   : > { %4194 = vst.msk [vmem:[#allocation2 + $0x138] sm:$0xff] %vm643_vm1, %v10207_v18 }
 0x244   : > { %9120 = vmatmul.mubr.msk.bf16.gmra.mrb[24].mxu0 %vm643_vm1, %v3326_v35  ;;  %v4241_v35 = vpop.permute.xlu0 %4240  ;;  %v11239_v8 = vpop.permute.xlu1 %4270 }
 0x245   : > { %9123 = vmatprep.mubr.msk.bf16.mxu0 %vm643_vm1, %v3335_v24 }
 0x248   : > { %v11233_v51 = vpop.permute.xlu0 %4255 }
 0x24c   : > { %9124 = vmatmul.mubr.msk.bf16.gmra.mrb[28].mxu0 %vm643_vm1, %v3344_v49  ;;  %v11237_v24 = vpop.permute.xlu0 %4265 }
 0x24d   : > { %9127 = vmatprep.mubr.msk.bf16.mxu0 %vm643_vm1, %v3353_v27  ;;  %v11263_v27 = vld [vmem:[%s12077_s5] ss:$0 sm:$0xff] }
 0x250   : > { %v11241_v16 = vpop.permute.xlu0 %4275 }
 0x254   : > { %9128 = vmatmul.mubr.msk.bf16.gmra.mrb[32].mxu0 %vm643_vm1, %v3362_v47  ;;  %v11243_v14 = vpop.permute.xlu1 %4280 }
 0x255   : > { %9133 = vmatprep.mubr.msk.bf16.mxu0 %vm643_vm1, %v3646_v43  ;;  %v11250_v29 = vpop.permute.xlu0 %4285 }
 0x259   : > { %v11270_v22 = vpop.permute.xlu0 %4295 }
 0x25c   : > { %9134 = vmatmul.mubr.msk.bf16.vlgmr.msra.gmra.mrb[0].mxu0 %vm643_vm1, %v3648_v54 }
 0x25d   : > { %9137 = vmatprep.mubr.msk.bf16.mxu0 %vm643_vm1, %v3650_v57 }
 0x264   : > { %9138 = vmatmul.mubr.msk.bf16.gmra.mrb[4].mxu0 %vm643_vm1, %v3652_v63 }
 0x265   : > { %9141 = vmatprep.mubr.msk.bf16.mxu0 %vm643_vm1, %v3654_v0  ;;  %v11257_v49 = vpop.permute.xlu1 %4290 }
 0x269   : > { %v11276_v63 = vpop.permute.xlu1 %4300 }
 0x26c   : > { %9142 = vmatmul.mubr.msk.bf16.gmra.mrb[8].mxu0 %vm643_vm1, %v3656_v28 }
 0x26d   : > { %9145 = vmatprep.mubr.msk.bf16.mxu0 %vm643_vm1, %v3658_v7  ;;  %v11291_v26 = vpop.permute.xlu1 %4310 }
 0x274   : > { %9146 = vmatmul.mubr.msk.bf16.gmra.mrb[12].mxu0 %vm643_vm1, %v3660_v4  ;;  %v11283_v62 = vpop.permute.xlu0 %4305 }
 0x275   : > { %9149 = vmatprep.mubr.msk.bf16.mxu0 %vm643_vm1, %v3662_v36 }
 0x27c   : > { %9150 = vmatmul.mubr.msk.bf16.gmra.mrb[16].mxu0 %vm643_vm1, %v3664_v42 }
 0x27d   : > { %9153 = vmatprep.mubr.msk.bf16.mxu0 %vm643_vm1, %v3666_v10 }
 0x284   : > { %9154 = vmatmul.mubr.msk.bf16.gmra.mrb[20].mxu0 %vm643_vm1, %v3668_v11 }
 0x285   : > { %9157 = vmatprep.mubr.msk.bf16.mxu0 %vm643_vm1, %v3670_v55 }
 0x28c   : > { %9158 = vmatmul.mubr.msk.bf16.gmra.mrb[24].mxu0 %vm643_vm1, %v3672_v60 }
 0x28d   : > { %9161 = vmatprep.mubr.msk.bf16.mxu0 %vm643_vm1, %v3674_v13 }
 0x294   : > { %9162 = vmatmul.mubr.msk.bf16.gmra.mrb[28].mxu0 %vm643_vm1, %v3676_v17 }
 0x295   : > { %9165 = vmatprep.mubr.msk.bf16.mxu0 %vm643_vm1, %v3678_v9 }
 0x29c   : > { %9166 = vmatmul.mubr.msk.bf16.gmra.mrb[32].mxu0 %vm643_vm1, %v3680_v3 }
 0x32f   : > { %v9135_v30 = vpop.f32.mrb[0].mxu0 }
 0x330   : > { %v3963_v34 = vmul.f32 %v9135_v30, %v11248_v37  ;;  %v3775_v50 = vpop.f32.mrb[1].mxu0 }
 0x331   : > { %v3961_v21 = vmul.f32 %v11248_v37, %v3775_v50  ;;  %v9136_v1 = vpop.f32.mrb[2].mxu0 }
 0x332   : > { %v4006_v40 = vadd.f32 %v11255_v31, %v3963_v34  ;;  %v3964_v44 = vmul.f32 %v9136_v1, %v11248_v37  ;;  %v3778_v47 = vpop.f32.mrb[3].mxu0 }
 0x333   : > { %v4004_v43 = vadd.f32 %v11255_v31, %v3961_v21  ;;  %v3962_v53 = vmul.f32 %v11248_v37, %v3778_v47 }
 0x334   : > { %vm4042_vm7 = vcmp.gt.f32.partialorder %v4006_v40, 0.0  ;;  %v4085_v54 = vmul.f32 %v11263_v27, %v4006_v40  ;;  %v4007_v57 = vadd.f32 %v11255_v31, %v3964_v44 }
 0x335   : > { %vm4040_vm8 = vcmp.gt.f32.partialorder %v4004_v43, 0.0  ;;  %v4083_v33 = vmul.f32 %v11263_v27, %v4004_v43  ;;  %v4005_v61 = vadd.f32 %v11255_v31, %v3962_v53 }
 0x336   : > { %v4121_v0 = vsel %vm4042_vm7, %v4006_v40, %v4085_v54  ;;  %vm4043_vm9 = vcmp.gt.f32.partialorder %v4007_v57, 0.0  ;;  %v4086_v39 = vmul.f32 %v11263_v27, %v4007_v57  ;;  %v11308_v40 = vpop.permute.xlu1 %4320 }
 0x337   : > { %v4415_v46 = vmul.f32 %v4246_v32, %v4121_v0  ;;  %v4119_v28 = vsel %vm4040_vm8, %v4004_v43, %v4083_v33  ;;  %vm4041_vm10 = vcmp.gt.f32.partialorder %v4005_v61, 0.0  ;;  %v4084_v7 = vmul.f32 %v11263_v27, %v4005_v61  ;;  %v9139_v52 = vpop.f32.mrb[4].mxu0  ;;  %v11301_v32 = vpop.permute.xlu0 %4315 }
 0x338   : > { %v4413_v38 = vmul.f32 %v4236_v12, %v4119_v28  ;;  %v4122_v4 = vsel %vm4043_vm9, %v4007_v57, %v4086_v39  ;;  %v3967_v36 = vmul.f32 %v9139_v52, %v11248_v37  ;;  %v3791_v41 = vpop.f32.mrb[5].mxu0 }
 0x339   : > { %4451 = vst.msk [vmem:[#allocation2 + $0x23] sm:$0xff] %vm643_vm1, %v4415_v46  ;;  %v4416_v48 = vmul.f32 %v4251_v23, %v4122_v4  ;;  %v4120_v42 = vsel %vm4041_vm10, %v4005_v61, %v4084_v7  ;;  %v3965_v10 = vmul.f32 %v11248_v37, %v3791_v41  ;;  %v9140_v59 = vpop.f32.mrb[6].mxu0  ;;  %v11323_v46 = vld [vmem:[%s12078_s6 + $0x10] sm:$0xff]  }
 0x33a   : > { %4449 = vst.msk [vmem:[#allocation2 + $0x13] sm:$0xff] %vm643_vm1, %v4413_v38  ;;  %v4414_v11 = vmul.f32 %v4241_v35, %v4120_v42  ;;  %v4010_v55 = vadd.f32 %v11255_v31, %v3967_v36  ;;  %v3968_v2 = vmul.f32 %v9140_v59, %v11248_v37  ;;  %v3794_v45 = vpop.f32.mrb[7].mxu0  ;;  %v11335_v59 = vpop.permute.xlu1 %4330 }
 0x33b   : > { %4452 = vst.msk [vmem:[#allocation2 + $0x2b] sm:$0xff] %vm643_vm1, %v4416_v48  ;;  %v4008_v60 = vadd.f32 %v11255_v31, %v3965_v10  ;;  %v3966_v13 = vmul.f32 %v11248_v37, %v3794_v45  ;;  %v11327_v38 = vpop.permute.xlu0 %4325 }
 0x33c   : > { %4450 = vst.msk [vmem:[#allocation2 + $0x1b] sm:$0xff] %vm643_vm1, %v4414_v11  ;;  %vm4046_vm11 = vcmp.gt.f32.partialorder %v4010_v55, 0.0  ;;  %v4089_v15 = vmul.f32 %v11263_v27, %v4010_v55  ;;  %v4011_v17 = vadd.f32 %v11255_v31, %v3968_v2 }
 0x33d   : > { %vm4044_vm12 = vcmp.gt.f32.partialorder %v4008_v60, 0.0  ;;  %v4087_v9 = vmul.f32 %v11263_v27, %v4008_v60  ;;  %v4009_v5 = vadd.f32 %v11255_v31, %v3966_v13 }
 0x33e   : > { %v4125_v3 = vsel %vm4046_vm11, %v4010_v55, %v4089_v15  ;;  %vm4047_vm13 = vcmp.gt.f32.partialorder %v4011_v17, 0.0  ;;  %v4090_v19 = vmul.f32 %v11263_v27, %v4011_v17 }
 0x33f   : > { %v4419_v20 = vmul.f32 %v11237_v24, %v4125_v3  ;;  %v4123_v6 = vsel %vm4044_vm12, %v4008_v60, %v4087_v9  ;;  %vm4045_vm14 = vcmp.gt.f32.partialorder %v4009_v5, 0.0  ;;  %v4088_v56 = vmul.f32 %v11263_v27, %v4009_v5  ;;  %v9143_v12 = vpop.f32.mrb[8].mxu0 }
 0x340   : > { %v4417_v35 = vmul.f32 %v11233_v51, %v4123_v6  ;;  %v4126_v23 = vsel %vm4047_vm13, %v4011_v17, %v4090_v19  ;;  %v3971_v30 = vmul.f32 %v9143_v12, %v11248_v37  ;;  %v3807_v34 = vpop.f32.mrb[9].mxu0 }
 0x341   : > { %4455 = vst.msk [vmem:[#allocation2 + $0x43] sm:$0xff] %vm643_vm1, %v4419_v20  ;;  %v4420_v50 = vmul.f32 %v11239_v8, %v4126_v23  ;;  %v4124_v21 = vsel %vm4045_vm14, %v4009_v5, %v4088_v56  ;;  %v3969_v24 = vmul.f32 %v11248_v37, %v3807_v34  ;;  %v9144_v1 = vpop.f32.mrb[10].mxu0  ;;  %v4544_v57 = vld [vmem:[#allocation2 + $0x11] sm:$0xff]  ;;  %v11350_v56 = vpop.permute.xlu0 %4335 }
 0x342   : > { %4453 = vst.msk [vmem:[#allocation2 + $0x33] sm:$0xff] %vm643_vm1, %v4417_v35  ;;  %v4418_v44 = vmul.f32 %v11235_v58, %v4124_v21  ;;  %v4014_v51 = vadd.f32 %v11255_v31, %v3971_v30  ;;  %v3972_v47 = vmul.f32 %v9144_v1, %v11248_v37  ;;  %v3810_v43 = vpop.f32.mrb[11].mxu0  ;;  %v4547_v53 = vld [vmem:[#allocation2 + $0x29] sm:$0xff] }
 0x343   : > { %4456 = vst.msk [vmem:[#allocation2 + $0x4b] sm:$0xff] %vm643_vm1, %v4420_v50  ;;  %v4012_v8 = vadd.f32 %v11255_v31, %v3969_v24  ;;  %v3970_v54 = vmul.f32 %v11248_v37, %v3810_v43  ;;  %v4545_v33 = vld [vmem:[#allocation2 + $0x19] sm:$0xff]  ;;  %v4546_v61 = vld [vmem:[#allocation2 + $0x21] sm:$0xff]  ;;  %v11357_v50 = vpop.permute.xlu1 %4340 }
 0x344   : > { %4454 = vst.msk [vmem:[#allocation2 + $0x3b] sm:$0xff] %vm643_vm1, %v4418_v44  ;;  %vm4050_vm15 = vcmp.gt.f32.partialorder %v4014_v51, 0.0  ;;  %v4093_v58 = vmul.f32 %v11263_v27, %v4014_v51  ;;  %v4015_v0 = vadd.f32 %v11255_v31, %v3972_v47  ;;  %v4579_v39 = vpack.c.bf16 %v4545_v33, %v4544_v57 }
 0x345   : > { %vm4048_vm0 = vcmp.gt.f32.partialorder %v4012_v8, 0.0  ;;  %v4091_v28 = vmul.f32 %v11263_v27, %v4012_v8  ;;  %v4013_v7 = vadd.f32 %v11255_v31, %v3970_v54  ;;  %v4580_v52 = vpack.c.bf16 %v4547_v53, %v4546_v61 }
 0x346   : > { %v4129_v4 = vsel %vm4050_vm15, %v4014_v51, %v4093_v58  ;;  %vm4051_vm2 = vcmp.gt.f32.partialorder %v4015_v0, 0.0  ;;  %v4094_v36 = vmul.f32 %v11263_v27, %v4015_v0  ;;  %9172 = vmatmul.mubr.msk.bf16.vlgmr.msra.gmra.mrb[0].mxu1 %vm643_vm1, %v4579_v39  ;;  %v11369_v58 = vpop.permute.xlu0 %4345 }
 0x347   : > { %v4423_v41 = vmul.f32 %v11250_v29, %v4129_v4  ;;  %v4127_v48 = vsel %vm4048_vm0, %v4012_v8, %v4091_v28  ;;  %vm4049_vm3 = vcmp.gt.f32.partialorder %v4013_v7, 0.0  ;;  %v4092_v42 = vmul.f32 %v11263_v27, %v4013_v7  ;;  %9208 = vmatpush3.bf16.msra.mxu1 %v11230_v25  ;;  %v9147_v10 = vpop.f32.mrb[12].mxu0  ;;  %9175 = vmatprep.mubr.msk.bf16.mxu1 %vm643_vm1, %v4580_v52 }
 0x348   : > { %v4421_v11 = vmul.f32 %v11241_v16, %v4127_v48  ;;  %v4130_v55 = vsel %vm4051_vm2, %v4015_v0, %v4094_v36  ;;  %v3975_v2 = vmul.f32 %v9147_v10, %v11248_v37  ;;  %v3823_v45 = vpop.f32.mrb[13].mxu0  ;;  %9245 = vmatprep.subr.bf16.mxu1 %v11323_v46  ;;  %v11378_v48 = vpop.permute.xlu1 %4350 }
 0x349   : > { %4459 = vst.msk [vmem:[#allocation2 + $0x63] sm:$0xff] %vm643_vm1, %v4423_v41  ;;  %v4424_v29 = vmul.f32 %v11257_v49, %v4130_v55  ;;  %v4128_v60 = vsel %vm4049_vm3, %v4013_v7, %v4092_v42  ;;  %v3973_v25 = vmul.f32 %v11248_v37, %v3823_v45  ;;  %v9148_v13 = vpop.f32.mrb[14].mxu0  ;;  %v4548_v19 = vld [vmem:[#allocation2 + $0x31] sm:$0xff] }
 0x34a   : > { %4457 = vst.msk [vmem:[#allocation2 + $0x53] sm:$0xff] %vm643_vm1, %v4421_v11  ;;  %v4422_v15 = vmul.f32 %v11243_v14, %v4128_v60  ;;  %v4018_v16 = vadd.f32 %v11255_v31, %v3975_v2  ;;  %v3976_v17 = vmul.f32 %v9148_v13, %v11248_v37  ;;  %v3826_v9 = vpop.f32.mrb[15].mxu0  ;;  %v4551_v5 = vld [vmem:[#allocation2 + $0x49] sm:$0xff] }
 0x34b   : > { %4460 = vst.msk [vmem:[#allocation2 + $0x6b] sm:$0xff] %vm643_vm1, %v4424_v29  ;;  %v4016_v3 = vadd.f32 %v11255_v31, %v3973_v25  ;;  %v3974_v49 = vmul.f32 %v11248_v37, %v3826_v9  ;;  %v4549_v20 = vld [vmem:[#allocation2 + $0x39] sm:$0xff]  ;;  %v4550_v6 = vld [vmem:[#allocation2 + $0x41] sm:$0xff] }
 0x34c   : > { %4458 = vst.msk [vmem:[#allocation2 + $0x5b] sm:$0xff] %vm643_vm1, %v4422_v15  ;;  %vm4054_vm4 = vcmp.gt.f32.partialorder %v4018_v16, 0.0  ;;  %v4097_v14 = vmul.f32 %v11263_v27, %v4018_v16  ;;  %v4019_v12 = vadd.f32 %v11255_v31, %v3976_v17  ;;  %v4581_v35 = vpack.c.bf16 %v4549_v20, %v4548_v19 }
 0x34d   : > { %vm4052_vm5 = vcmp.gt.f32.partialorder %v4016_v3, 0.0  ;;  %v4095_v23 = vmul.f32 %v11263_v27, %v4016_v3  ;;  %v4017_v30 = vadd.f32 %v11255_v31, %v3974_v49  ;;  %v4582_v34 = vpack.c.bf16 %v4551_v5, %v4550_v6  ;;  %v11397_v6 = vpop.permute.xlu1 %4360 }
 0x34e   : > { %v4133_v21 = vsel %vm4054_vm4, %v4018_v16, %v4097_v14  ;;  %vm4055_vm7 = vcmp.gt.f32.partialorder %v4019_v12, 0.0  ;;  %v4098_v24 = vmul.f32 %v11263_v27, %v4019_v12  ;;  %9176 = vmatmul.mubr.msk.bf16.gmra.mrb[4].mxu1 %vm643_vm1, %v4581_v35  ;;  %v11390_v16 = vpop.permute.xlu0 %4355 }
 0x34f   : > { %v4427_v1 = vmul.f32 %v11283_v62, %v4133_v21  ;;  %v4131_v44 = vsel %vm4052_vm5, %v4016_v3, %v4095_v23  ;;  %vm4053_vm8 = vcmp.gt.f32.partialorder %v4017_v30, 0.0  ;;  %v4096_v51 = vmul.f32 %v11263_v27, %v4017_v30  ;;  %v9151_v47 = vpop.f32.mrb[16].mxu0  ;;  %9179 = vmatprep.mubr.msk.bf16.mxu1 %vm643_vm1, %v4582_v34 }
 0x350   : > { %v4425_v43 = vmul.f32 %v11270_v22, %v4131_v44  ;;  %v4134_v53 = vsel %vm4055_vm7, %v4019_v12, %v4098_v24  ;;  %v3979_v8 = vmul.f32 %v9151_v47, %v11248_v37  ;;  %v3839_v54 = vpop.f32.mrb[17].mxu0 }
 0x351   : > { %4463 = vst.msk [vmem:[#allocation2 + $0x83] sm:$0xff] %vm643_vm1, %v4427_v1  ;;  %v4428_v57 = vmul.f32 %v11291_v26, %v4134_v53  ;;  %v4132_v33 = vsel %vm4053_vm8, %v4017_v30, %v4096_v51  ;;  %v3977_v62 = vmul.f32 %v11248_v37, %v3839_v54  ;;  %v9152_v61 = vpop.f32.mrb[18].mxu0  ;;  %v4552_v4 = vld [vmem:[#allocation2 + $0x51] sm:$0xff] }
 0x352   : > { %4461 = vst.msk [vmem:[#allocation2 + $0x73] sm:$0xff] %vm643_vm1, %v4425_v43  ;;  %v4426_v0 = vmul.f32 %v11276_v63, %v4132_v33  ;;  %v4022_v22 = vadd.f32 %v11255_v31, %v3979_v8  ;;  %v3980_v39 = vmul.f32 %v9152_v61, %v11248_v37  ;;  %v3842_v28 = vpop.f32.mrb[19].mxu0  ;;  %v4555_v7 = vld [vmem:[#allocation2 + $0x69] sm:$0xff]  ;;  %v4366_v53 = vpop.permute.xlu0 %4365 }
 0x353   : > { %4464 = vst.msk [vmem:[#allocation2 + $0x8b] sm:$0xff] %vm643_vm1, %v4428_v57  ;;  %v4020_v26 = vadd.f32 %v11255_v31, %v3977_v62  ;;  %v3978_v52 = vmul.f32 %v11248_v37, %v3842_v28  ;;  %v4553_v36 = vld [vmem:[#allocation2 + $0x59] sm:$0xff]  ;;  %v4554_v41 = vld [vmem:[#allocation2 + $0x61] sm:$0xff] }
 0x354   : > { %4462 = vst.msk [vmem:[#allocation2 + $0x7b] sm:$0xff] %vm643_vm1, %v4426_v0  ;;  %vm4058_vm9 = vcmp.gt.f32.partialorder %v4022_v22, 0.0  ;;  %v4101_v63 = vmul.f32 %v11263_v27, %v4022_v22  ;;  %v4023_v42 = vadd.f32 %v11255_v31, %v3980_v39  ;;  %v4583_v10 = vpack.c.bf16 %v4553_v36, %v4552_v4  ;;  %v4371_v0 = vpop.permute.xlu1 %4370 }
 0x355   : > { %vm4056_vm10 = vcmp.gt.f32.partialorder %v4020_v26, 0.0  ;;  %v4099_v11 = vmul.f32 %v11263_v27, %v4020_v26  ;;  %v4021_v55 = vadd.f32 %v11255_v31, %v3978_v52  ;;  %v4584_v2 = vpack.c.bf16 %v4555_v7, %v4554_v41 }
 0x356   : > { %v4137_v45 = vsel %vm4058_vm9, %v4022_v22, %v4101_v63  ;;  %vm4059_vm11 = vcmp.gt.f32.partialorder %v4023_v42, 0.0  ;;  %v4102_v29 = vmul.f32 %v11263_v27, %v4023_v42  ;;  %9180 = vmatmul.mubr.msk.bf16.gmra.mrb[8].mxu1 %vm643_vm1, %v4583_v10 }
 0x357   : > { %v4431_v60 = vmul.f32 %v11327_v38, %v4137_v45  ;;  %v4135_v25 = vsel %vm4056_vm10, %v4020_v26, %v4099_v11  ;;  %vm4057_vm12 = vcmp.gt.f32.partialorder %v4021_v55, 0.0  ;;  %v4100_v13 = vmul.f32 %v11263_v27, %v4021_v55  ;;  %v9155_v15 = vpop.f32.mrb[20].mxu0  ;;  %9183 = vmatprep.mubr.msk.bf16.mxu1 %vm643_vm1, %v4584_v2  ;;  %v11428_v45 = vpop.permute.xlu0 %4375 }
 0x358   : > { %v4429_v17 = vmul.f32 %v11301_v32, %v4135_v25  ;;  %v4138_v9 = vsel %vm4059_vm11, %v4023_v42, %v4102_v29  ;;  %v3983_v5 = vmul.f32 %v9155_v15, %v11248_v37  ;;  %v3855_v3 = vpop.f32.mrb[21].mxu0 }
 0x359   : > { %4467 = vst.msk [vmem:[#allocation2 + $0xa3] sm:$0xff] %vm643_vm1, %v4431_v60  ;;  %v4432_v49 = vmul.f32 %v11335_v59, %v4138_v9  ;;  %v4136_v38 = vsel %vm4057_vm12, %v4021_v55, %v4100_v13  ;;  %v3981_v19 = vmul.f32 %v11248_v37, %v3855_v3  ;;  %v9156_v20 = vpop.f32.mrb[22].mxu0  ;;  %v4556_v34 = vld [vmem:[#allocation2 + $0x71] sm:$0xff] }
 0x35a   : > { %4465 = vst.msk [vmem:[#allocation2 + $0x93] sm:$0xff] %vm643_vm1, %v4429_v17  ;;  %v4430_v14 = vmul.f32 %v11308_v40, %v4136_v38  ;;  %v4026_v32 = vadd.f32 %v11255_v31, %v3983_v5  ;;  %v3984_v12 = vmul.f32 %v9156_v20, %v11248_v37  ;;  %v3858_v35 = vpop.f32.mrb[23].mxu0  ;;  %v4559_v23 = vld [vmem:[#allocation2 + $0x89] sm:$0xff]  ;;  %v11435_v17 = vpop.permute.xlu1 %4380 }
 0x35b   : > { %4468 = vst.msk [vmem:[#allocation2 + $0xab] sm:$0xff] %vm643_vm1, %v4432_v49  ;;  %v4024_v59 = vadd.f32 %v11255_v31, %v3981_v19  ;;  %v3982_v30 = vmul.f32 %v11248_v37, %v3858_v35  ;;  %v4557_v21 = vld [vmem:[#allocation2 + $0x79] sm:$0xff]  ;;  %v4558_v24 = vld [vmem:[#allocation2 + $0x81] sm:$0xff] }
 0x35c   : > { %4466 = vst.msk [vmem:[#allocation2 + $0x9b] sm:$0xff] %vm643_vm1, %v4430_v14  ;;  %vm4062_vm13 = vcmp.gt.f32.partialorder %v4026_v32, 0.0  ;;  %v4105_v40 = vmul.f32 %v11263_v27, %v4026_v32  ;;  %v4027_v1 = vadd.f32 %v11255_v31, %v3984_v12  ;;  %v4585_v44 = vpack.c.bf16 %v4557_v21, %v4556_v34  ;;  %v4386_v34 = vpop.permute.xlu0 %4385 }
 0x35d   : > { %vm4060_vm14 = vcmp.gt.f32.partialorder %v4024_v59, 0.0  ;;  %v4103_v51 = vmul.f32 %v11263_v27, %v4024_v59  ;;  %v4025_v47 = vadd.f32 %v11255_v31, %v3982_v30  ;;  %v4586_v43 = vpack.c.bf16 %v4559_v23, %v4558_v24 }
 0x35e   : > { %v4141_v8 = vsel %vm4062_vm13, %v4026_v32, %v4105_v40  ;;  %vm4063_vm15 = vcmp.gt.f32.partialorder %v4027_v1, 0.0  ;;  %v4106_v54 = vmul.f32 %v11263_v27, %v4027_v1  ;;  %9184 = vmatmul.mubr.msk.bf16.gmra.mrb[12].mxu1 %vm643_vm1, %v4585_v44 }
 0x35f   : > { %v4435_v57 = vmul.f32 %v11369_v58, %v4141_v8  ;;  %v4139_v33 = vsel %vm4060_vm14, %v4024_v59, %v4103_v51  ;;  %vm4061_vm0 = vcmp.gt.f32.partialorder %v4025_v47, 0.0  ;;  %v4104_v62 = vmul.f32 %v11263_v27, %v4025_v47  ;;  %v9159_v61 = vpop.f32.mrb[24].mxu0  ;;  %9187 = vmatprep.mubr.msk.bf16.mxu1 %vm643_vm1, %v4586_v43  ;;  %v4391_v8 = vpop.permute.xlu1 %4390 }
 0x360   : > { %v4433_v22 = vmul.f32 %v11350_v56, %v4139_v33  ;;  %v4142_v39 = vsel %vm4063_vm15, %v4027_v1, %v4106_v54  ;;  %v3987_v28 = vmul.f32 %v9159_v61, %v11248_v37  ;;  %v3871_v7 = vpop.f32.mrb[25].mxu0  ;;  %vm4484_vm15 = vcmask 128000  }
 0x361   : > { %4471 = vst.msk [vmem:[#allocation2 + $0xc3] sm:$0xff] %vm643_vm1, %v4435_v57  ;;  %v4436_v26 = vmul.f32 %v11378_v48, %v4142_v39  ;;  %v4140_v52 = vsel %vm4061_vm0, %v4025_v47, %v4104_v62  ;;  %v3985_v58 = vmul.f32 %v11248_v37, %v3871_v7  ;;  %v9160_v4 = vpop.f32.mrb[26].mxu0  ;;  %v4560_v11 = vld [vmem:[#allocation2 + $0x91] sm:$0xff]  ;;  %vm4195_vm0 = vcmask 125952  }
 0x362   : > { %4469 = vst.msk [vmem:[#allocation2 + $0xb3] sm:$0xff] %vm643_vm1, %v4433_v22  ;;  %v4434_v36 = vmul.f32 %v11357_v50, %v4140_v52  ;;  %v4030_v41 = vadd.f32 %v11255_v31, %v3987_v28  ;;  %v3988_v56 = vmul.f32 %v9160_v4, %v11248_v37  ;;  %v3874_v63 = vpop.f32.mrb[27].mxu0  ;;  %v4563_v42 = vld [vmem:[#allocation2 + $0xa9] sm:$0xff]  ;;  %v4396_v52 = vpop.permute.xlu0 %4395 }
 0x363   : > { %4472 = vst.msk [vmem:[#allocation2 + $0xcb] sm:$0xff] %vm643_vm1, %v4436_v26  ;;  %v4028_v10 = vadd.f32 %v11255_v31, %v3985_v58  ;;  %v3986_v48 = vmul.f32 %v11248_v37, %v3874_v63  ;;  %v4561_v55 = vld [vmem:[#allocation2 + $0x99] sm:$0xff]  ;;  %v4562_v2 = vld [vmem:[#allocation2 + $0xa1] sm:$0xff] }
 0x364   : > { %4470 = vst.msk [vmem:[#allocation2 + $0xbb] sm:$0xff] %vm643_vm1, %v4434_v36  ;;  %vm4066_vm2 = vcmp.gt.f32.partialorder %v4030_v41, 0.0  ;;  %v4109_v50 = vmul.f32 %v11263_v27, %v4030_v41  ;;  %v4031_v29 = vadd.f32 %v11255_v31, %v3988_v56  ;;  %v4587_v60 = vpack.c.bf16 %v4561_v55, %v4560_v11 }
 0x365   : > { %vm4064_vm3 = vcmp.gt.f32.partialorder %v4028_v10, 0.0  ;;  %v4107_v25 = vmul.f32 %v11263_v27, %v4028_v10  ;;  %v4029_v13 = vadd.f32 %v11255_v31, %v3986_v48  ;;  %v4588_v15 = vpack.c.bf16 %v4563_v42, %v4562_v2  ;;  %v4401_v48 = vpop.permute.xlu1 %4400  ;;  %4196 = vst.msk [vmem:[#allocation2 + $0x140] sm:$0xf] %vm4195_vm0, %v10207_v18  ;;  %v6078_v18 = vld [vmem:[#allocation2 + $0x8c] sm:$0xff] }
 0x366   : > { %v4145_v9 = vsel %vm4066_vm2, %v4030_v41, %v4109_v50  ;;  %vm4067_vm4 = vcmp.gt.f32.partialorder %v4031_v29, 0.0  ;;  %v4110_v5 = vmul.f32 %v11263_v27, %v4031_v29  ;;  %9188 = vmatmul.mubr.msk.bf16.gmra.mrb[16].mxu1 %vm643_vm1, %v4587_v60 }
 0x367   : > { %v4439_v3 = vmul.f32 %v4366_v53, %v4145_v9  ;;  %v4143_v49 = vsel %vm4064_vm3, %v4028_v10, %v4107_v25  ;;  %vm4065_vm5 = vcmp.gt.f32.partialorder %v4029_v13, 0.0  ;;  %v4108_v38 = vmul.f32 %v11263_v27, %v4029_v13  ;;  %v9163_v19 = vpop.f32.mrb[28].mxu0  ;;  %9191 = vmatprep.mubr.msk.bf16.mxu1 %vm643_vm1, %v4588_v15 }
 0x368   : > { %v4437_v20 = vmul.f32 %v11390_v16, %v4143_v49  ;;  %v4146_v14 = vsel %vm4067_vm4, %v4031_v29, %v4110_v5  ;;  %v3991_v32 = vmul.f32 %v9163_v19, %v11248_v37  ;;  %v3887_v12 = vpop.f32.mrb[29].mxu0  ;;  %v4406_v19 = vpop.permute.xlu0 %4405 }
 0x369   : > { %4475 = vst.msk [vmem:[#allocation2 + $0xe3] sm:$0xff] %vm643_vm1, %v4439_v3  ;;  %v4440_v35 = vmul.f32 %v4371_v0, %v4146_v14  ;;  %v4144_v23 = vsel %vm4065_vm5, %v4029_v13, %v4108_v38  ;;  %v3989_v59 = vmul.f32 %v11248_v37, %v3887_v12  ;;  %v9164_v30 = vpop.f32.mrb[30].mxu0  ;;  %v4564_v47 = vld [vmem:[#allocation2 + $0xb1] sm:$0xff] }
 0x36a   : > { %4473 = vst.msk [vmem:[#allocation2 + $0xd3] sm:$0xff] %vm643_vm1, %v4437_v20  ;;  %v4438_v21 = vmul.f32 %v11397_v6, %v4144_v23  ;;  %v4034_v24 = vadd.f32 %v11255_v31, %v3991_v32  ;;  %v3992_v16 = vmul.f32 %v9164_v30, %v11248_v37  ;;  %v3890_v40 = vpop.f32.mrb[31].mxu0  ;;  %v4567_v1 = vld [vmem:[#allocation2 + $0xc9] sm:$0xff] }
 0x36b   : > { %4476 = vst.msk [vmem:[#allocation2 + $0xeb] sm:$0xff] %vm643_vm1, %v4440_v35  ;;  %v4032_v44 = vadd.f32 %v11255_v31, %v3989_v59  ;;  %v3990_v51 = vmul.f32 %v11248_v37, %v3890_v40  ;;  %v4565_v43 = vld [vmem:[#allocation2 + $0xb9] sm:$0xff]  ;;  %v4566_v53 = vld [vmem:[#allocation2 + $0xc1] sm:$0xff]  ;;  %v4411_v35 = vpop.permute.xlu1 %4410 }
 0x36c   : > { %4474 = vst.msk [vmem:[#allocation2 + $0xdb] sm:$0xff] %vm643_vm1, %v4438_v21  ;;  %vm4070_vm7 = vcmp.gt.f32.partialorder %v4034_v24, 0.0  ;;  %v4113_v6 = vmul.f32 %v11263_v27, %v4034_v24  ;;  %v4035_v54 = vadd.f32 %v11255_v31, %v3992_v16  ;;  %v4589_v57 = vpack.c.bf16 %v4565_v43, %v4564_v47 }
 0x36d   : > { %vm4068_vm8 = vcmp.gt.f32.partialorder %v4032_v44, 0.0  ;;  %v4111_v33 = vmul.f32 %v11263_v27, %v4032_v44  ;;  %v4033_v62 = vadd.f32 %v11255_v31, %v3990_v51  ;;  %v4590_v61 = vpack.c.bf16 %v4567_v1, %v4566_v53  ;;  %v4487_v51 = vld [vmem:[#allocation2 + $0x8] sm:$0xff] }
 0x36e   : > { %v4149_v0 = vsel %vm4070_vm7, %v4034_v24, %v4113_v6  ;;  %vm4071_vm9 = vcmp.gt.f32.partialorder %v4035_v54, 0.0  ;;  %v4114_v22 = vmul.f32 %v11263_v27, %v4035_v54  ;;  %9192 = vmatmul.mubr.msk.bf16.gmra.mrb[20].mxu1 %vm643_vm1, %v4589_v57  ;;  %v4489_v6 = vld [vmem:[#allocation2 + $0x18] sm:$0xff]  ;;  %v4491_v57 = vld [vmem:[#allocation2 + $0x28] sm:$0xff] }
 0x36f   : > { %v4443_v39 = vmul.f32 %v4386_v34, %v4149_v0  ;;  %v4147_v28 = vsel %vm4068_vm8, %v4032_v44, %v4111_v33  ;;  %vm4069_vm10 = vcmp.gt.f32.partialorder %v4033_v62, 0.0  ;;  %v4112_v7 = vmul.f32 %v11263_v27, %v4033_v62  ;;  %v9167_v26 = vpop.f32.mrb[32].mxu0  ;;  %9195 = vmatprep.mubr.msk.bf16.mxu1 %vm643_vm1, %v4590_v61  ;;  %v4486_v44 = vld [vmem:[#allocation2] sm:$0xff]  ;;  %v4488_v33 = vld [vmem:[#allocation2 + $0x10] sm:$0xff]  ;;  %v11492_v61 = vld [vmem:[%s12078_s6 + $0x18] sm:$0xff]  }
 0x370   : > { %v4441_v58 = vmul.f32 %v11428_v45, %v4147_v28  ;;  %v4150_v4 = vsel %vm4071_vm9, %v4035_v54, %v4114_v22  ;;  %v3995_v36 = vmul.f32 %v9167_v26, %v11248_v37  ;;  %v3903_v41 = vpop.f32.mrb[33].mxu0  ;;  %v4522_v53 = vpack.c.bf16 %v4487_v51, %v4486_v44  ;;  %v4490_v54 = vld [vmem:[#allocation2 + $0x20] sm:$0xff]  ;;  %v4493_v22 = vld [vmem:[#allocation2 + $0x38] sm:$0xff]  ;;  %v4495_v28 = vld [vmem:[#allocation2 + $0x48] sm:$0xff] }
 0x371   : > { %4479 = vst.msk [vmem:[#allocation2 + $0x103] sm:$0xff] %vm643_vm1, %v4443_v39  ;;  %v4444_v56 = vmul.f32 %v4391_v8, %v4150_v4  ;;  %v4148_v63 = vsel %vm4069_vm10, %v4033_v62, %v4112_v7  ;;  %v3993_v42 = vmul.f32 %v11248_v37, %v3903_v41  ;;  %v9168_v10 = vpop.f32.mrb[34].mxu0  ;;  %v4568_v25 = vld [vmem:[#allocation2 + $0xd1] sm:$0xff]  ;;  %v4523_v62 = vpack.c.bf16 %v4489_v6, %v4488_v33  ;;  %v4494_v39 = vld [vmem:[#allocation2 + $0x40] sm:$0xff] }
 0x372   : > { %4477 = vst.msk [vmem:[#allocation2 + $0xf3] sm:$0xff] %vm643_vm1, %v4441_v58  ;;  %v4442_v11 = vmul.f32 %v11435_v17, %v4148_v63  ;;  %v4038_v55 = vadd.f32 %v11255_v31, %v3995_v36  ;;  %v3996_v2 = vmul.f32 %v9168_v10, %v11248_v37  ;;  %v3906_v45 = vpop.f32.mrb[35].mxu0  ;;  %v4571_v50 = vld [vmem:[#allocation2 + $0xe9] sm:$0xff]  ;;  %v4524_v0 = vpack.c.bf16 %v4491_v57, %v4490_v54  ;;  %v4497_v58 = vld [vmem:[#allocation2 + $0x58] sm:$0xff]  ;;  %v4498_v4 = vld [vmem:[#allocation2 + $0x60] sm:$0xff] }
 0x373   : > { %4480 = vst.msk [vmem:[#allocation2 + $0x10b] sm:$0xff] %vm643_vm1, %v4444_v56  ;;  %v4036_v29 = vadd.f32 %v11255_v31, %v3993_v42  ;;  %v3994_v60 = vmul.f32 %v11248_v37, %v3906_v45  ;;  %v4569_v13 = vld [vmem:[#allocation2 + $0xd9] sm:$0xff]  ;;  %v4570_v15 = vld [vmem:[#allocation2 + $0xe1] sm:$0xff]  ;;  %v4492_v7 = vld [vmem:[#allocation2 + $0x30] sm:$0xff] }
 0x374   : > { %4478 = vst.msk [vmem:[#allocation2 + $0xfb] sm:$0xff] %vm643_vm1, %v4442_v11  ;;  %vm4074_vm11 = vcmp.gt.f32.partialorder %v4038_v55, 0.0  ;;  %v4117_v17 = vmul.f32 %v11263_v27, %v4038_v55  ;;  %v4039_v9 = vadd.f32 %v11255_v31, %v3996_v2  ;;  %v4591_v5 = vpack.c.bf16 %v4569_v13, %v4568_v25  ;;  %v4499_v36 = vld [vmem:[#allocation2 + $0x68] sm:$0xff]  ;;  %v4496_v41 = vld [vmem:[#allocation2 + $0x50] sm:$0xff]  ;;  %v4501_v63 = vld [vmem:[#allocation2 + $0x78] sm:$0xff] }
 0x375   : > { %vm4072_vm12 = vcmp.gt.f32.partialorder %v4036_v29, 0.0  ;;  %v4115_v3 = vmul.f32 %v11263_v27, %v4036_v29  ;;  %v4037_v49 = vadd.f32 %v11255_v31, %v3994_v60  ;;  %v4592_v38 = vpack.c.bf16 %v4571_v50, %v4570_v15  ;;  %v4502_v42 = vld [vmem:[#allocation2 + $0x80] sm:$0xff]  ;;  %v4503_v10 = vld [vmem:[#allocation2 + $0x88] sm:$0xff]  ;;  %v4505_v2 = vld [vmem:[#allocation2 + $0x98] sm:$0xff] }
 0x376   : > { %v4153_v20 = vsel %vm4074_vm11, %v4038_v55, %v4117_v17  ;;  %vm4075_vm13 = vcmp.gt.f32.partialorder %v4039_v9, 0.0  ;;  %v4118_v37 = vmul.f32 %v11263_v27, %v4039_v9  ;;  %9196 = vmatmul.mubr.msk.bf16.gmra.mrb[24].mxu1 %vm643_vm1, %v4591_v5  ;;  %v4525_v26 = vpack.c.bf16 %v4493_v22, %v4492_v7  ;;  %v4506_v45 = vld [vmem:[#allocation2 + $0xa0] sm:$0xff]  ;;  %v4507_v50 = vld [vmem:[#allocation2 + $0xa8] sm:$0xff]  ;;  %v4509_v13 = vld [vmem:[#allocation2 + $0xb8] sm:$0xff] }
 0x377   : > { %v4447_v14 = vmul.f32 %v4406_v19, %v4153_v20  ;;  %v4151_v32 = vsel %vm4072_vm12, %v4036_v29, %v4115_v3  ;;  %vm4073_vm14 = vcmp.gt.f32.partialorder %v4037_v49, 0.0  ;;  %v4116_v12 = vmul.f32 %v11263_v27, %v4037_v49  ;;  %9199 = vmatprep.mubr.msk.bf16.mxu1 %vm643_vm1, %v4592_v38  ;;  %v4504_v29 = vld [vmem:[#allocation2 + $0x90] sm:$0xff]  ;;  %v4510_v15 = vld [vmem:[#allocation2 + $0xc0] sm:$0xff]  ;;  %v4511_v17 = vld [vmem:[#allocation2 + $0xc8] sm:$0xff] }
 0x378   : > { %v4445_v23 = vmul.f32 %v4396_v52, %v4151_v32  ;;  %v4154_v59 = vsel %vm4075_vm13, %v4039_v9, %v4118_v37  ;;  %v4526_v52 = vpack.c.bf16 %v4495_v28, %v4494_v39  ;;  %v4527_v56 = vpack.c.bf16 %v4497_v58, %v4496_v41  ;;  %v4508_v9 = vld [vmem:[#allocation2 + $0xb0] sm:$0xff]  ;;  %v4514_v38 = vld [vmem:[#allocation2 + $0xe0] sm:$0xff]  ;;  %v4515_v19 = vld [vmem:[#allocation2 + $0xe8] sm:$0xff] }
 0x379   : > { %4483 = vst.msk [vmem:[#allocation2 + $0x123] sm:$0xff] %vm643_vm1, %v4447_v14  ;;  %v4448_v31 = vmul.f32 %v4411_v35, %v4154_v59  ;;  %v4152_v30 = vsel %vm4073_vm14, %v4037_v49, %v4116_v12  ;;  %v4572_v24 = vld [vmem:[#allocation2 + $0xf1] sm:$0xff]  ;;  %v4530_v55 = vpack.c.bf16 %v4503_v10, %v4502_v42  ;;  %v4531_v60 = vpack.c.bf16 %v4505_v2, %v4504_v29  ;;  %v5081_v6 = vld [vmem:[#allocation2 + $0x42] sm:$0xff] }
 0x37a   : > { %4481 = vst.msk [vmem:[#allocation2 + $0x113] sm:$0xff] %vm643_vm1, %v4445_v23  ;;  %v4446_v34 = vmul.f32 %v4401_v48, %v4152_v30  ;;  %v4575_v21 = vld [vmem:[#allocation2 + $0x109] sm:$0xff]  ;;  %v4532_v25 = vpack.c.bf16 %v4507_v50, %v4506_v45  ;;  %v4533_v5 = vpack.c.bf16 %v4509_v13, %v4508_v9  ;;  %v4534_v3 = vpack.c.bf16 %v4511_v17, %v4510_v15  ;;  %v4513_v49 = vld [vmem:[#allocation2 + $0xd8] sm:$0xff] }
 0x37b   : > { %4485 = vst.msk [vmem:[#allocation2 + $0x12b] sm:$0x3f] %vm4484_vm15, %v4448_v31  ;;  %v4573_v16 = vld [vmem:[#allocation2 + $0xf9] sm:$0xff]  ;;  %v4574_v40 = vld [vmem:[#allocation2 + $0x101] sm:$0xff]  ;;  %v4500_v48 = vld [vmem:[#allocation2 + $0x70] sm:$0xff]  ;;  %v4536_v14 = vpack.c.bf16 %v4515_v19, %v4514_v38 }
 0x37c   : > { %4482 = vst.msk [vmem:[#allocation2 + $0x11b] sm:$0xff] %vm643_vm1, %v4446_v34  ;;  %v4593_v27 = vpack.c.bf16 %v4573_v16, %v4572_v24  ;;  %v4594_v1 = vpack.c.bf16 %v4575_v21, %v4574_v40  ;;  %v4529_v11 = vpack.c.bf16 %v4501_v63, %v4500_v48  ;;  %v4512_v20 = vld [vmem:[#allocation2 + $0xd0] sm:$0xff]  ;;  %v4517_v32 = vld [vmem:[#allocation2 + $0xf8] sm:$0xff]  ;;  %v4518_v12 = vld [vmem:[#allocation2 + $0x100] sm:$0xff] }
 0x37d   : > { %v4535_v37 = vpack.c.bf16 %v4513_v49, %v4512_v20  ;;  %v4519_v35 = vld [vmem:[#allocation2 + $0x108] sm:$0xff]  ;;  %v4516_v23 = vld [vmem:[#allocation2 + $0xf0] sm:$0xff] }
 0x37e   : > { %9200 = vmatmul.mubr.msk.bf16.gmra.mrb[28].mxu1 %vm643_vm1, %v4593_v27  ;;  %v4537_v59 = vpack.c.bf16 %v4517_v32, %v4516_v23  ;;  %v4538_v31 = vpack.c.bf16 %v4519_v35, %v4518_v12  ;;  %v5073_v30 = vld [vmem:[#allocation2 + $0x2] sm:$0xff]  ;;  %v5074_v34 = vld [vmem:[#allocation2 + $0xa] sm:$0xff]  ;;  %v5076_v27 = vld [vmem:[#allocation2 + $0x1a] sm:$0xff] }
 0x37f   : > { %9203 = vmatprep.mubr.msk.bf16.mxu1 %vm643_vm1, %v4594_v1  ;;  %v5109_v16 = vpack.c.bf16 %v5074_v34, %v5073_v30  ;;  %v5077_v1 = vld [vmem:[#allocation2 + $0x22] sm:$0xff]  ;;  %v5078_v44 = vld [vmem:[#allocation2 + $0x2a] sm:$0xff]  ;;  %v5075_v51 = vld [vmem:[#allocation2 + $0x12] sm:$0xff] }
 0x380   : > { %v5082_v54 = vld [vmem:[#allocation2 + $0x4a] sm:$0xff]  ;;  %v5079_v57 = vld [vmem:[#allocation2 + $0x32] sm:$0xff]  ;;  %v5085_v22 = vld [vmem:[#allocation2 + $0x62] sm:$0xff] }
 0x381   : > { %v4576_v47 = vld [vmem:[#allocation2 + $0x111] sm:$0xff]  ;;  %v10194_v12 = vld [vmem:[%s12078_s6 + $0x28] sm:$0xff]   ;;  %v5734_v30 = vld [vmem:[#allocation2 + $0x1b] sm:$0xff] }
 0x382   : > { %v4520_v24 = vld [vmem:[#allocation2 + $0x110] sm:$0xff] }
 0x383   : > { %v4577_v43 = vld [vmem:[#allocation2 + $0x119] sm:$0x3f]  ;;  %v5086_v39 = vld [vmem:[#allocation2 + $0x6a] sm:$0xff] }
 0x384   : > { %v4595_v8 = vpack.c.bf16 %v4577_v43, %v4576_v47  ;;  %v4521_v21 = vld [vmem:[#allocation2 + $0x118] sm:$0x3f]  ;;  %v11514_v47 = vpack.c.bf16 %v5076_v27, %v5075_v51  ;;  %v11519_v43 = vld [vmem:[%s12078_s6 + $0x20] sm:$0xff]   ;;  %v5115_v7 = vpack.c.bf16 %v5086_v39, %v5085_v22  ;;  %v5090_v58 = vld [vmem:[#allocation2 + $0x8a] sm:$0xff] }
 0x385   : > { %v4539_v40 = vpack.c.bf16 %v4521_v21, %v4520_v24  ;;  %v5083_v28 = vld [vmem:[#allocation2 + $0x52] sm:$0xff]  ;;  %v5094_v63 = vld [vmem:[#allocation2 + $0xaa] sm:$0xff]  ;;  %v5436_v35 = vld [vmem:[#allocation2 + $0x11a] sm:$0xff] }
 0x386   : > { %9204 = vmatmul.mubr.msk.bf16.gmra.mrb[32].mxu1 %vm643_vm1, %v4595_v8  ;;  %v5080_v8 = vld [vmem:[#allocation2 + $0x3a] sm:$0xff]  ;;  %v5091_v42 = vld [vmem:[#allocation2 + $0x92] sm:$0xff]  ;;  %v5098_v2 = vld [vmem:[#allocation2 + $0xca] sm:$0xff] }
 0x387   : > { %9209 = vmatprep.mubr.msk.bf16.mxu1 %vm643_vm1, %v4522_v53  ;;  %v11521_v53 = vpack.c.bf16 %v5078_v44, %v5077_v1  ;;  %v5112_v33 = vpack.c.bf16 %v5080_v8, %v5079_v57  ;;  %v5095_v45 = vld [vmem:[#allocation2 + $0xb2] sm:$0xff]  ;;  %v5102_v13 = vld [vmem:[#allocation2 + $0xea] sm:$0xff] }
 0x388   : > { %v5099_v15 = vld [vmem:[#allocation2 + $0xd2] sm:$0xff]  ;;  %v5106_v49 = vld [vmem:[#allocation2 + $0x10a] sm:$0xff] }
 0x389   : > { %v5103_v38 = vld [vmem:[#allocation2 + $0xf2] sm:$0xff]  ;;  %v5735_v27 = vld [vmem:[#allocation2 + $0x23] sm:$0xff] }
 0x38a   : > { %v5733_v21 = vld [vmem:[#allocation2 + $0x13] sm:$0xff]  ;;  %v5739_v8 = vld [vmem:[#allocation2 + $0x43] sm:$0xff] }
 0x38b   : > { %v5769_v24 = vpack.c.bf16 %v5734_v30, %v5733_v21  ;;  %v5737_v44 = vld [vmem:[#allocation2 + $0x33] sm:$0xff] }
 0x38c   : > { %v11572_v51 = vld [vmem:[%s12078_s6 + $0x30] sm:$0xff]  }
 0x38d   : > { %v5745_v39 = vld [vmem:[#allocation2 + $0x73] sm:$0xff] }
 0x38e   : > { %9210 = vmatmul.mubr.msk.bf16.vlgmr.msra.gmra.mrb[0].mxu1 %vm643_vm1, %v4523_v62  ;;  %v5113_v62 = vpack.c.bf16 %v5082_v54, %v5081_v6  ;;  %v5741_v54 = vld [vmem:[#allocation2 + $0x53] sm:$0xff] }
 0x38f   : > { %9246 = vmatpush3.bf16.msra.mxu1 %v11323_v46  ;;  %9213 = vmatprep.mubr.msk.bf16.mxu1 %vm643_vm1, %v4524_v0  ;;  %v4528_v46 = vpack.c.bf16 %v4499_v36, %v4498_v4  ;;  %v5084_v0 = vld [vmem:[#allocation2 + $0x5a] sm:$0xff]  ;;  %v5087_v4 = vld [vmem:[#allocation2 + $0x72] sm:$0xff] }
 0x390   : > { %9283 = vmatprep.subr.bf16.mxu1 %v11492_v61 }
 0x396   : > { %9214 = vmatmul.mubr.msk.bf16.gmra.mrb[4].mxu1 %vm643_vm1, %v4525_v26  ;;  %v5088_v26 = vld [vmem:[#allocation2 + $0x7a] sm:$0xff] }
 0x397   : > { %9217 = vmatprep.mubr.msk.bf16.mxu1 %vm643_vm1, %v4526_v52  ;;  %v5089_v52 = vld [vmem:[#allocation2 + $0x82] sm:$0xff]  ;;  %v5116_v36 = vpack.c.bf16 %v5088_v26, %v5087_v4 }
 0x398   : > { %v5117_v41 = vpack.c.bf16 %v5090_v58, %v5089_v52  ;;  %v5747_v26 = vld [vmem:[#allocation2 + $0x83] sm:$0xff]  ;;  %v5749_v58 = vld [vmem:[#allocation2 + $0x93] sm:$0xff] }
 0x39e   : > { %9218 = vmatmul.mubr.msk.bf16.gmra.mrb[8].mxu1 %vm643_vm1, %v4527_v56  ;;  %v5092_v56 = vld [vmem:[#allocation2 + $0x9a] sm:$0xff] }
 0x39f   : > { %9221 = vmatprep.mubr.msk.bf16.mxu1 %vm643_vm1, %v4528_v46  ;;  %v5093_v46 = vld [vmem:[#allocation2 + $0xa2] sm:$0xff]  ;;  %v5118_v10 = vpack.c.bf16 %v5092_v56, %v5091_v42 }
 0x3a0   : > { %v5119_v48 = vpack.c.bf16 %v5094_v63, %v5093_v46  ;;  %v5751_v56 = vld [vmem:[#allocation2 + $0xa3] sm:$0xff]  ;;  %v5753_v63 = vld [vmem:[#allocation2 + $0xb3] sm:$0xff] }
 0x3a6   : > { %9222 = vmatmul.mubr.msk.bf16.gmra.mrb[12].mxu1 %vm643_vm1, %v4529_v11  ;;  %v5096_v11 = vld [vmem:[#allocation2 + $0xba] sm:$0xff] }
 0x3a7   : > { %9225 = vmatprep.mubr.msk.bf16.mxu1 %vm643_vm1, %v4530_v55  ;;  %v5097_v55 = vld [vmem:[#allocation2 + $0xc2] sm:$0xff]  ;;  %v5120_v50 = vpack.c.bf16 %v5096_v11, %v5095_v45 }
 0x3a8   : > { %v5121_v29 = vpack.c.bf16 %v5098_v2, %v5097_v55  ;;  %v5755_v11 = vld [vmem:[#allocation2 + $0xc3] sm:$0xff]  ;;  %v5757_v2 = vld [vmem:[#allocation2 + $0xd3] sm:$0xff] }
 0x3ae   : > { %9226 = vmatmul.mubr.msk.bf16.gmra.mrb[16].mxu1 %vm643_vm1, %v4531_v60  ;;  %v5100_v60 = vld [vmem:[#allocation2 + $0xda] sm:$0xff] }
 0x3af   : > { %9229 = vmatprep.mubr.msk.bf16.mxu1 %vm643_vm1, %v4532_v25  ;;  %v5101_v25 = vld [vmem:[#allocation2 + $0xe2] sm:$0xff]  ;;  %v5122_v17 = vpack.c.bf16 %v5100_v60, %v5099_v15 }
 0x3b0   : > { %v5123_v9 = vpack.c.bf16 %v5102_v13, %v5101_v25  ;;  %v5759_v60 = vld [vmem:[#allocation2 + $0xe3] sm:$0xff]  ;;  %v5761_v13 = vld [vmem:[#allocation2 + $0xf3] sm:$0xff] }
 0x3b6   : > { %9230 = vmatmul.mubr.msk.bf16.gmra.mrb[20].mxu1 %vm643_vm1, %v4533_v5  ;;  %v5104_v5 = vld [vmem:[#allocation2 + $0xfa] sm:$0xff] }
 0x3b7   : > { %9233 = vmatprep.mubr.msk.bf16.mxu1 %vm643_vm1, %v4534_v3  ;;  %v5105_v3 = vld [vmem:[#allocation2 + $0x102] sm:$0xff]  ;;  %v5124_v19 = vpack.c.bf16 %v5104_v5, %v5103_v38 }
 0x3b8   : > { %v5125_v20 = vpack.c.bf16 %v5106_v49, %v5105_v3  ;;  %v5763_v5 = vld [vmem:[#allocation2 + $0x103] sm:$0xff]  ;;  %v5765_v49 = vld [vmem:[#allocation2 + $0x113] sm:$0xff] }
 0x3be   : > { %9234 = vmatmul.mubr.msk.bf16.gmra.mrb[24].mxu1 %vm643_vm1, %v4535_v37  ;;  %v5108_v37 = vld [vmem:[#allocation2 + $0x11a] sm:$0x3f] }
 0x3bf   : > { %9237 = vmatprep.mubr.msk.bf16.mxu1 %vm643_vm1, %v4536_v14  ;;  %v5107_v14 = vld [vmem:[#allocation2 + $0x112] sm:$0xff] }
 0x3c0   : > { %v5126_v32 = vpack.c.bf16 %v5108_v37, %v5107_v14  ;;  %v5455_v23 = vpack.c.bf16 %v5436_v35, %v5107_v14  ;;  %v6064_v37 = vld [vmem:[#allocation2 + $0x1c] sm:$0xff]  ;;  %v6066_v35 = vld [vmem:[#allocation2 + $0x2c] sm:$0xff] }
 0x3c1   : > { %v5767_v14 = vld [vmem:[#allocation2 + $0x123] sm:$0xff] }
 0x3c6   : > { %9238 = vmatmul.mubr.msk.bf16.gmra.mrb[28].mxu1 %vm643_vm1, %v4537_v59  ;;  %v5437_v59 = vld [vmem:[#allocation2 + $0x122] sm:$0xff] }
 0x3c7   : > { %9241 = vmatprep.mubr.msk.bf16.mxu1 %vm643_vm1, %v4538_v31  ;;  %v5438_v31 = vld [vmem:[#allocation2 + $0x12a] sm:$0x3f] }
 0x3c8   : > { %v5456_v34 = vpack.c.bf16 %v5438_v31, %v5437_v59  ;;  %v6068_v59 = vld [vmem:[#allocation2 + $0x3c] sm:$0xff]  ;;  %v6065_v31 = vld [vmem:[#allocation2 + $0x24] sm:$0xff] }
 0x3c9   : > { %v11593_v30 = vpack.c.bf16 %v6066_v35, %v6065_v31  ;;  %v6729_v31 = vld [vmem:[#allocation2 + $0x55] sm:$0xff] }
 0x3ce   : > { %9242 = vmatmul.mubr.msk.bf16.gmra.mrb[32].mxu1 %vm643_vm1, %v4539_v40  ;;  %v5738_v40 = vld [vmem:[#allocation2 + $0x3b] sm:$0xff] }
 0x3cf   : > { %9247 = vmatprep.mubr.msk.bf16.mxu1 %vm643_vm1, %v5109_v16  ;;  %v5736_v16 = vld [vmem:[#allocation2 + $0x2b] sm:$0xff] }
 0x3d0   : > { %v5770_v1 = vpack.c.bf16 %v5736_v16, %v5735_v27  ;;  %v6071_v16 = vld [vmem:[#allocation2 + $0x54] sm:$0xff]  ;;  %v6069_v27 = vld [vmem:[#allocation2 + $0x44] sm:$0xff] }
 0x3d6   : > { %9248 = vmatmul.mubr.msk.bf16.vlgmr.msra.gmra.mrb[0].mxu1 %vm643_vm1, %v11514_v47 }
 0x3d7   : > { %9284 = vmatpush3.bf16.msra.mxu1 %v11492_v61  ;;  %9251 = vmatprep.mubr.msk.bf16.mxu1 %vm643_vm1, %v11521_v53  ;;  %v5114_v61 = vpack.c.bf16 %v5084_v0, %v5083_v28  ;;  %v5743_v0 = vld [vmem:[#allocation2 + $0x63] sm:$0xff] }
 0x3d8   : > { %9321 = vmatprep.subr.bf16.mxu1 %v11519_v43 }
 0x3de   : > { %9252 = vmatmul.mubr.msk.bf16.gmra.mrb[4].mxu1 %vm643_vm1, %v5112_v33 }
 0x3df   : > { %9255 = vmatprep.mubr.msk.bf16.mxu1 %vm643_vm1, %v5113_v62 }
 0x3e6   : > { %9256 = vmatmul.mubr.msk.bf16.gmra.mrb[8].mxu1 %vm643_vm1, %v5114_v61 }
 0x3e7   : > { %9259 = vmatprep.mubr.msk.bf16.mxu1 %vm643_vm1, %v5115_v7 }
 0x3ee   : > { %9260 = vmatmul.mubr.msk.bf16.gmra.mrb[12].mxu1 %vm643_vm1, %v5116_v36 }
 0x3ef   : > { %9263 = vmatprep.mubr.msk.bf16.mxu1 %vm643_vm1, %v5117_v41 }
 0x3f6   : > { %9264 = vmatmul.mubr.msk.bf16.gmra.mrb[16].mxu1 %vm643_vm1, %v5118_v10 }
 0x3f7   : > { %9267 = vmatprep.mubr.msk.bf16.mxu1 %vm643_vm1, %v5119_v48 }
 0x3fe   : > { %9268 = vmatmul.mubr.msk.bf16.gmra.mrb[20].mxu1 %vm643_vm1, %v5120_v50 }
 0x3ff   : > { %9271 = vmatprep.mubr.msk.bf16.mxu1 %vm643_vm1, %v5121_v29 }
 0x406   : > { %9272 = vmatmul.mubr.msk.bf16.gmra.mrb[24].mxu1 %vm643_vm1, %v5122_v17 }
 0x407   : > { %9275 = vmatprep.mubr.msk.bf16.mxu1 %vm643_vm1, %v5123_v9 }
 0x40e   : > { %9276 = vmatmul.mubr.msk.bf16.gmra.mrb[28].mxu1 %vm643_vm1, %v5124_v19 }
 0x40f   : > { %9279 = vmatprep.mubr.msk.bf16.mxu1 %vm643_vm1, %v5125_v20 }
 0x416   : > { %9280 = vmatmul.mubr.msk.bf16.gmra.mrb[32].mxu1 %vm643_vm1, %v5126_v32 }
 0x417   : > { %9285 = vmatprep.mubr.msk.bf16.mxu1 %vm643_vm1, %v11514_v47  ;;  %v5771_v47 = vpack.c.bf16 %v5738_v40, %v5737_v44  ;;  %v6072_v40 = vld [vmem:[#allocation2 + $0x5c] sm:$0xff] }
 0x418   : > { %v6103_v44 = vpack.c.bf16 %v6072_v40, %v6071_v16  ;;  %v6733_v40 = vld [vmem:[#allocation2 + $0x75] sm:$0xff] }
 0x41e   : > { %9286 = vmatmul.mubr.msk.bf16.vlgmr.msra.gmra.mrb[0].mxu1 %vm643_vm1, %v11521_v53  ;;  %v5742_v53 = vld [vmem:[#allocation2 + $0x5b] sm:$0xff] }
 0x41f   : > { %9322 = vmatpush3.bf16.msra.mxu1 %v11519_v43  ;;  %9289 = vmatprep.mubr.msk.bf16.mxu1 %vm643_vm1, %v5112_v33  ;;  %v5740_v43 = vld [vmem:[#allocation2 + $0x4b] sm:$0xff]  ;;  %v5773_v57 = vpack.c.bf16 %v5742_v53, %v5741_v54  ;;  %v6079_v54 = vld [vmem:[#allocation2 + $0x94] sm:$0xff] }
 0x420   : > { %9359 = vmatprep.subr.bf16.mxu1 %v10194_v12  ;;  %v5772_v6 = vpack.c.bf16 %v5740_v43, %v5739_v8  ;;  %v5744_v33 = vld [vmem:[#allocation2 + $0x6b] sm:$0xff]  ;;  %v6076_v43 = vld [vmem:[#allocation2 + $0x7c] sm:$0xff] }
 0x421   : > { %v5774_v22 = vpack.c.bf16 %v5744_v33, %v5743_v0  ;;  %v6073_v53 = vld [vmem:[#allocation2 + $0x64] sm:$0xff] }
 0x422   : > { %v6077_v33 = vld [vmem:[#allocation2 + $0x84] sm:$0xff] }
 0x426   : > { %9290 = vmatmul.mubr.msk.bf16.gmra.mrb[4].mxu1 %vm643_vm1, %v5113_v62  ;;  %v5746_v62 = vld [vmem:[#allocation2 + $0x7b] sm:$0xff] }
 0x427   : > { %9293 = vmatprep.mubr.msk.bf16.mxu1 %vm643_vm1, %v5114_v61  ;;  %v5775_v28 = vpack.c.bf16 %v5746_v62, %v5745_v39  ;;  %v5748_v61 = vld [vmem:[#allocation2 + $0x8b] sm:$0xff]  ;;  %v6106_v62 = vpack.c.bf16 %v6078_v18, %v6077_v33  ;;  %v6083_v39 = vld [vmem:[#allocation2 + $0xb4] sm:$0xff]  ;;  %v6742_v33 = vld [vmem:[#allocation2 + $0xbd] sm:$0xff] }
 0x428   : > { %v5776_v52 = vpack.c.bf16 %v5748_v61, %v5747_v26  ;;  %v6081_v61 = vld [vmem:[#allocation2 + $0xa4] sm:$0xff] }
 0x429   : > { %v6739_v18 = vld [vmem:[#allocation2 + $0xa5] sm:$0xff] }
 0x42e   : > { %9294 = vmatmul.mubr.msk.bf16.gmra.mrb[8].mxu1 %vm643_vm1, %v5115_v7  ;;  %v5750_v7 = vld [vmem:[#allocation2 + $0x9b] sm:$0xff] }
 0x42f   : > { %9297 = vmatprep.mubr.msk.bf16.mxu1 %vm643_vm1, %v5116_v36  ;;  %v5777_v4 = vpack.c.bf16 %v5750_v7, %v5749_v58  ;;  %v5752_v36 = vld [vmem:[#allocation2 + $0xab] sm:$0xff]  ;;  %v6087_v58 = vld [vmem:[#allocation2 + $0xd4] sm:$0xff] }
 0x430   : > { %v5778_v46 = vpack.c.bf16 %v5752_v36, %v5751_v56  ;;  %v6085_v36 = vld [vmem:[#allocation2 + $0xc4] sm:$0xff] }
 0x436   : > { %9298 = vmatmul.mubr.msk.bf16.gmra.mrb[12].mxu1 %vm643_vm1, %v5117_v41  ;;  %v5754_v41 = vld [vmem:[#allocation2 + $0xbb] sm:$0xff] }
 0x437   : > { %9301 = vmatprep.mubr.msk.bf16.mxu1 %vm643_vm1, %v5118_v10  ;;  %v5779_v42 = vpack.c.bf16 %v5754_v41, %v5753_v63  ;;  %v5756_v10 = vld [vmem:[#allocation2 + $0xcb] sm:$0xff]  ;;  %v6091_v63 = vld [vmem:[#allocation2 + $0xf4] sm:$0xff] }
 0x438   : > { %v5780_v55 = vpack.c.bf16 %v5756_v10, %v5755_v11  ;;  %v6089_v10 = vld [vmem:[#allocation2 + $0xe4] sm:$0xff] }
 0x43e   : > { %9302 = vmatmul.mubr.msk.bf16.gmra.mrb[16].mxu1 %vm643_vm1, %v5119_v48  ;;  %v5758_v48 = vld [vmem:[#allocation2 + $0xdb] sm:$0xff] }
 0x43f   : > { %9305 = vmatprep.mubr.msk.bf16.mxu1 %vm643_vm1, %v5120_v50  ;;  %v5781_v45 = vpack.c.bf16 %v5758_v48, %v5757_v2  ;;  %v5760_v50 = vld [vmem:[#allocation2 + $0xeb] sm:$0xff]  ;;  %v6095_v2 = vld [vmem:[#allocation2 + $0x114] sm:$0xff] }
 0x440   : > { %v5782_v25 = vpack.c.bf16 %v5760_v50, %v5759_v60  ;;  %v6093_v50 = vld [vmem:[#allocation2 + $0x104] sm:$0xff] }
 0x446   : > { %9306 = vmatmul.mubr.msk.bf16.gmra.mrb[20].mxu1 %vm643_vm1, %v5121_v29  ;;  %v5762_v29 = vld [vmem:[#allocation2 + $0xfb] sm:$0xff] }
 0x447   : > { %9309 = vmatprep.mubr.msk.bf16.mxu1 %vm643_vm1, %v5122_v17  ;;  %v5783_v15 = vpack.c.bf16 %v5762_v29, %v5761_v13  ;;  %v5764_v17 = vld [vmem:[#allocation2 + $0x10b] sm:$0xff] }
 0x448   : > { %v5784_v3 = vpack.c.bf16 %v5764_v17, %v5763_v5  ;;  %v6098_v13 = vld [vmem:[#allocation2 + $0x12c] sm:$0x3f]  ;;  %v10197_v17 = vld [vmem:[%s12078_s6 + $0x40] sm:$0xff]  }
 0x44e   : > { %9310 = vmatmul.mubr.msk.bf16.gmra.mrb[24].mxu1 %vm643_vm1, %v5123_v9  ;;  %v5766_v9 = vld [vmem:[#allocation2 + $0x11b] sm:$0xff] }
 0x44f   : > { %9313 = vmatprep.mubr.msk.bf16.mxu1 %vm643_vm1, %v5124_v19  ;;  %v5785_v38 = vpack.c.bf16 %v5766_v9, %v5765_v49  ;;  %v5768_v19 = vld [vmem:[#allocation2 + $0x12b] sm:$0x3f]  ;;  %v6428_v49 = vld [vmem:[#allocation2 + $0x13c] sm:$0x3f] }
 0x450   : > { %v5786_v32 = vpack.c.bf16 %v5768_v19, %v5767_v14  ;;  %v6426_v9 = vld [vmem:[#allocation2 + $0x12c] sm:$0xff]  ;;  %v6725_v14 = vld [vmem:[#allocation2 + $0x35] sm:$0xff] }
 0x451   : > { %v6724_v19 = vld [vmem:[#allocation2 + $0x2d] sm:$0xff] }
 0x456   : > { %9314 = vmatmul.mubr.msk.bf16.gmra.mrb[28].mxu1 %vm643_vm1, %v5125_v20  ;;  %v6063_v20 = vld [vmem:[#allocation2 + $0x14] sm:$0xff] }
 0x457   : > { %9317 = vmatprep.mubr.msk.bf16.mxu1 %vm643_vm1, %v5455_v23  ;;  %v6067_v23 = vld [vmem:[#allocation2 + $0x34] sm:$0xff] }
 0x458   : > { %v11600_v21 = vpack.c.bf16 %v6068_v59, %v6067_v23  ;;  %v6727_v23 = vld [vmem:[#allocation2 + $0x45] sm:$0xff] }
 0x45e   : > { %9318 = vmatmul.mubr.msk.bf16.gmra.mrb[32].mxu1 %vm643_vm1, %v5456_v34  ;;  %v11598_v34 = vld [vmem:[%s12078_s6 + $0x38] sm:$0xff]  }
 0x45f   : > { %9323 = vmatprep.mubr.msk.bf16.mxu1 %vm643_vm1, %v5769_v24  ;;  %v6070_v24 = vld [vmem:[#allocation2 + $0x4c] sm:$0xff] }
 0x466   : > { %9324 = vmatmul.mubr.msk.bf16.vlgmr.msra.gmra.mrb[0].mxu1 %vm643_vm1, %v5770_v1  ;;  %v6102_v1 = vpack.c.bf16 %v6070_v24, %v6069_v27  ;;  %v6731_v24 = vld [vmem:[#allocation2 + $0x65] sm:$0xff]  ;;  %v6734_v27 = vld [vmem:[#allocation2 + $0x7d] sm:$0xff] }
 0x467   : > { %9360 = vmatpush3.bf16.msra.mxu1 %v10194_v12  ;;  %9327 = vmatprep.mubr.msk.bf16.mxu1 %vm643_vm1, %v5771_v47  ;;  %v6099_v12 = vpack.c.bf16 %v6064_v37, %v6063_v20  ;;  %v6074_v47 = vld [vmem:[#allocation2 + $0x6c] sm:$0xff] }
 0x468   : > { %9397 = vmatprep.subr.bf16.mxu1 %v11572_v51  ;;  %v6104_v8 = vpack.c.bf16 %v6074_v47, %v6073_v53  ;;  %v6723_v20 = vld [vmem:[#allocation2 + $0x25] sm:$0xff]  ;;  %v6738_v53 = vld [vmem:[#allocation2 + $0x9d] sm:$0xff] }
 0x469   : > { %v6759_v37 = vpack.c.bf16 %v6724_v19, %v6723_v20  ;;  %v6735_v47 = vld [vmem:[#allocation2 + $0x85] sm:$0xff]  ;;  %v7062_v20 = vld [vmem:[#allocation2 + $0x6e] sm:$0xff] }
 0x46a   : > { %v7060_v19 = vld [vmem:[#allocation2 + $0x5e] sm:$0xff] }
 0x46e   : > { %9328 = vmatmul.mubr.msk.bf16.gmra.mrb[4].mxu1 %vm643_vm1, %v5772_v6 }
 0x46f   : > { %9331 = vmatprep.mubr.msk.bf16.mxu1 %vm643_vm1, %v5773_v57  ;;  %v6080_v57 = vld [vmem:[#allocation2 + $0x9c] sm:$0xff] }
 0x470   : > { %v6107_v0 = vpack.c.bf16 %v6080_v57, %v6079_v54  ;;  %v6741_v57 = vld [vmem:[#allocation2 + $0xb5] sm:$0xff] }
 0x476   : > { %9332 = vmatmul.mubr.msk.bf16.gmra.mrb[8].mxu1 %vm643_vm1, %v5774_v22  ;;  %v6082_v22 = vld [vmem:[#allocation2 + $0xac] sm:$0xff] }
 0x477   : > { %9335 = vmatprep.mubr.msk.bf16.mxu1 %vm643_vm1, %v5775_v28  ;;  %v6084_v28 = vld [vmem:[#allocation2 + $0xbc] sm:$0xff]  ;;  %v6108_v7 = vpack.c.bf16 %v6082_v22, %v6081_v61  ;;  %v6743_v22 = vld [vmem:[#allocation2 + $0xc5] sm:$0xff] }
 0x478   : > { %v6109_v26 = vpack.c.bf16 %v6084_v28, %v6083_v39  ;;  %v6745_v28 = vld [vmem:[#allocation2 + $0xd5] sm:$0xff]  ;;  %v6746_v61 = vld [vmem:[#allocation2 + $0xdd] sm:$0xff] }
 0x47e   : > { %9336 = vmatmul.mubr.msk.bf16.gmra.mrb[12].mxu1 %vm643_vm1, %v5776_v52  ;;  %v6086_v52 = vld [vmem:[#allocation2 + $0xcc] sm:$0xff] }
 0x47f   : > { %9339 = vmatprep.mubr.msk.bf16.mxu1 %vm643_vm1, %v5777_v4  ;;  %v6088_v4 = vld [vmem:[#allocation2 + $0xdc] sm:$0xff]  ;;  %v6110_v41 = vpack.c.bf16 %v6086_v52, %v6085_v36  ;;  %v6747_v52 = vld [vmem:[#allocation2 + $0xe5] sm:$0xff] }
 0x480   : > { %v6111_v56 = vpack.c.bf16 %v6088_v4, %v6087_v58  ;;  %v6749_v4 = vld [vmem:[#allocation2 + $0xf5] sm:$0xff]  ;;  %v6750_v36 = vld [vmem:[#allocation2 + $0xfd] sm:$0xff] }
 0x486   : > { %9340 = vmatmul.mubr.msk.bf16.gmra.mrb[16].mxu1 %vm643_vm1, %v5778_v46  ;;  %v6090_v46 = vld [vmem:[#allocation2 + $0xec] sm:$0xff] }
 0x487   : > { %9343 = vmatprep.mubr.msk.bf16.mxu1 %vm643_vm1, %v5779_v42  ;;  %v6092_v42 = vld [vmem:[#allocation2 + $0xfc] sm:$0xff]  ;;  %v6112_v48 = vpack.c.bf16 %v6090_v46, %v6089_v10  ;;  %v6751_v46 = vld [vmem:[#allocation2 + $0x105] sm:$0xff] }
 0x488   : > { %v6113_v11 = vpack.c.bf16 %v6092_v42, %v6091_v63  ;;  %v6753_v42 = vld [vmem:[#allocation2 + $0x115] sm:$0xff]  ;;  %v6754_v10 = vld [vmem:[#allocation2 + $0x11d] sm:$0xff] }
 0x48e   : > { %9344 = vmatmul.mubr.msk.bf16.gmra.mrb[20].mxu1 %vm643_vm1, %v5780_v55  ;;  %v6094_v55 = vld [vmem:[#allocation2 + $0x10c] sm:$0xff] }
 0x48f   : > { %9347 = vmatprep.mubr.msk.bf16.mxu1 %vm643_vm1, %v5781_v45  ;;  %v6096_v45 = vld [vmem:[#allocation2 + $0x11c] sm:$0xff]  ;;  %v6114_v29 = vpack.c.bf16 %v6094_v55, %v6093_v50  ;;  %v6774_v55 = vpack.c.bf16 %v6754_v10, %v6753_v42  ;;  %v7584_v42 = vld [vmem:[%s10283_s22 + $0x8] sm:$0xe]  ;;  %v7585_v10 = vld [vmem:[%s10283_s22 + $0xc] sm:$0xf] }
 0x490   : > { %v6115_v60 = vpack.c.bf16 %v6096_v45, %v6095_v2  ;;  %v6757_v45 = vld [vmem:[#allocation2 + $0x135] sm:$0xff]  ;;  %v6758_v50 = vld [vmem:[#allocation2 + $0x13d] sm:$0x3f] }
 0x496   : > { %9348 = vmatmul.mubr.msk.bf16.gmra.mrb[24].mxu1 %vm643_vm1, %v5782_v25  ;;  %v6097_v25 = vld [vmem:[#allocation2 + $0x124] sm:$0xff] }
 0x497   : > { %9351 = vmatprep.mubr.msk.bf16.mxu1 %vm643_vm1, %v5783_v15  ;;  %v6116_v15 = vpack.c.bf16 %v6098_v13, %v6097_v25  ;;  %v6445_v5 = vpack.c.bf16 %v6426_v9, %v6097_v25  ;;  %v7053_v25 = vld [vmem:[#allocation2 + $0x26] sm:$0xff]  ;;  %v7058_v9 = vld [vmem:[#allocation2 + $0x4e] sm:$0xff] }
 0x49e   : > { %9352 = vmatmul.mubr.msk.bf16.gmra.mrb[28].mxu1 %vm643_vm1, %v5784_v3  ;;  %v6427_v3 = vld [vmem:[#allocation2 + $0x134] sm:$0xff] }
 0x49f   : > { %9355 = vmatprep.mubr.msk.bf16.mxu1 %vm643_vm1, %v5785_v38  ;;  %v6446_v38 = vpack.c.bf16 %v6428_v49, %v6427_v3  ;;  %v7057_v3 = vld [vmem:[#allocation2 + $0x46] sm:$0xff] }
 0x4a0   : > { %v7091_v49 = vpack.c.bf16 %v7058_v9, %v7057_v3  ;;  %v8473_v9 = vld [vmem:[%s10283_s22 + $0x38] sm:$0xff]  }
 0x4a6   : > { %9356 = vmatmul.mubr.msk.bf16.gmra.mrb[32].mxu1 %vm643_vm1, %v5786_v32  ;;  %v6726_v32 = vld [vmem:[#allocation2 + $0x3d] sm:$0xff] }
 0x4a7   : > { %9361 = vmatprep.mubr.msk.bf16.mxu1 %vm643_vm1, %v6099_v12  ;;  %v6728_v12 = vld [vmem:[#allocation2 + $0x4d] sm:$0xff]  ;;  %v6760_v35 = vpack.c.bf16 %v6726_v32, %v6725_v14 }
 0x4a8   : > { %v6761_v59 = vpack.c.bf16 %v6728_v12, %v6727_v23  ;;  %v7061_v14 = vld [vmem:[#allocation2 + $0x66] sm:$0xff]  ;;  %v7063_v12 = vld [vmem:[#allocation2 + $0x76] sm:$0xff]  ;;  %v7066_v23 = vld [vmem:[#allocation2 + $0x8e] sm:$0xff] }
 0x4a9   : > { %v7093_v32 = vpack.c.bf16 %v7062_v20, %v7061_v14 }
 0x4ae   : > { %9362 = vmatmul.mubr.msk.bf16.vlgmr.msra.gmra.mrb[0].mxu1 %vm643_vm1, %v11593_v30 }
 0x4af   : > { %9398 = vmatpush3.bf16.msra.mxu1 %v11572_v51  ;;  %9365 = vmatprep.mubr.msk.bf16.mxu1 %vm643_vm1, %v11600_v21  ;;  %v6075_v51 = vld [vmem:[#allocation2 + $0x74] sm:$0xff] }
 0x4b0   : > { %9435 = vmatprep.subr.bf16.mxu1 %v11598_v34  ;;  %v6105_v6 = vpack.c.bf16 %v6076_v43, %v6075_v51  ;;  %v6737_v43 = vld [vmem:[#allocation2 + $0x95] sm:$0xff] }
 0x4b6   : > { %9366 = vmatmul.mubr.msk.bf16.gmra.mrb[4].mxu1 %vm643_vm1, %v6102_v1 }
 0x4b7   : > { %9369 = vmatprep.mubr.msk.bf16.mxu1 %vm643_vm1, %v6103_v44 }
 0x4be   : > { %9370 = vmatmul.mubr.msk.bf16.gmra.mrb[8].mxu1 %vm643_vm1, %v6104_v8 }
 0x4bf   : > { %9373 = vmatprep.mubr.msk.bf16.mxu1 %vm643_vm1, %v6105_v6 }
 0x4c6   : > { %9374 = vmatmul.mubr.msk.bf16.gmra.mrb[12].mxu1 %vm643_vm1, %v6106_v62 }
 0x4c7   : > { %9377 = vmatprep.mubr.msk.bf16.mxu1 %vm643_vm1, %v6107_v0 }
 0x4ce   : > { %9378 = vmatmul.mubr.msk.bf16.gmra.mrb[16].mxu1 %vm643_vm1, %v6108_v7 }
 0x4cf   : > { %9381 = vmatprep.mubr.msk.bf16.mxu1 %vm643_vm1, %v6109_v26 }
 0x4d6   : > { %9382 = vmatmul.mubr.msk.bf16.gmra.mrb[20].mxu1 %vm643_vm1, %v6110_v41 }
 0x4d7   : > { %9385 = vmatprep.mubr.msk.bf16.mxu1 %vm643_vm1, %v6111_v56 }
 0x4de   : > { %9386 = vmatmul.mubr.msk.bf16.gmra.mrb[24].mxu1 %vm643_vm1, %v6112_v48 }
 0x4df   : > { %9389 = vmatprep.mubr.msk.bf16.mxu1 %vm643_vm1, %v6113_v11 }
 0x4e6   : > { %9390 = vmatmul.mubr.msk.bf16.gmra.mrb[28].mxu1 %vm643_vm1, %v6114_v29 }
 0x4e7   : > { %9393 = vmatprep.mubr.msk.bf16.mxu1 %vm643_vm1, %v6115_v60 }
 0x4ee   : > { %9394 = vmatmul.mubr.msk.bf16.gmra.mrb[32].mxu1 %vm643_vm1, %v6116_v15  ;;  %v7055_v15 = vld [vmem:[#allocation2 + $0x36] sm:$0xff] }
 0x4ef   : > { %9399 = vmatprep.mubr.msk.bf16.mxu1 %vm643_vm1, %v11593_v30  ;;  %v6730_v30 = vld [vmem:[#allocation2 + $0x5d] sm:$0xff] }
 0x4f6   : > { %9400 = vmatmul.mubr.msk.bf16.vlgmr.msra.gmra.mrb[0].mxu1 %vm643_vm1, %v11600_v21  ;;  %v6762_v21 = vpack.c.bf16 %v6730_v30, %v6729_v31  ;;  %v7065_v31 = vld [vmem:[#allocation2 + $0x86] sm:$0xff] }
 0x4f7   : > { %9436 = vmatpush3.bf16.msra.mxu1 %v11598_v34  ;;  %9403 = vmatprep.mubr.msk.bf16.mxu1 %vm643_vm1, %v6102_v1  ;;  %v6732_v34 = vld [vmem:[#allocation2 + $0x6d] sm:$0xff]  ;;  %v7095_v30 = vpack.c.bf16 %v7066_v23, %v7065_v31 }
 0x4f8   : > { %9473 = vmatprep.subr.bf16.mxu1 %v10197_v17  ;;  %v6763_v16 = vpack.c.bf16 %v6732_v34, %v6731_v24  ;;  %v6736_v1 = vld [vmem:[#allocation2 + $0x8d] sm:$0xff]  ;;  %v7067_v34 = vld [vmem:[#allocation2 + $0x96] sm:$0xff] }
 0x4f9   : > { %v6765_v51 = vpack.c.bf16 %v6736_v1, %v6735_v47  ;;  %v7070_v24 = vld [vmem:[#allocation2 + $0xae] sm:$0xff]  ;;  %v7071_v1 = vld [vmem:[#allocation2 + $0xb6] sm:$0xff] }
 0x4fa   : > { %v7074_v47 = vld [vmem:[#allocation2 + $0xce] sm:$0xff] }
 0x4fe   : > { %9404 = vmatmul.mubr.msk.bf16.gmra.mrb[4].mxu1 %vm643_vm1, %v6103_v44  ;;  %v6764_v44 = vpack.c.bf16 %v6734_v27, %v6733_v40  ;;  %v7069_v40 = vld [vmem:[#allocation2 + $0xa6] sm:$0xff] }
 0x4ff   : > { %9407 = vmatprep.mubr.msk.bf16.mxu1 %vm643_vm1, %v6104_v8  ;;  %v6740_v8 = vld [vmem:[#allocation2 + $0xad] sm:$0xff]  ;;  %v7097_v27 = vpack.c.bf16 %v7070_v24, %v7069_v40 }
 0x500   : > { %v6767_v54 = vpack.c.bf16 %v6740_v8, %v6739_v18  ;;  %v7075_v8 = vld [vmem:[#allocation2 + $0xd6] sm:$0xff]  ;;  %v7078_v18 = vld [vmem:[#allocation2 + $0xee] sm:$0xff] }
 0x506   : > { %9408 = vmatmul.mubr.msk.bf16.gmra.mrb[8].mxu1 %vm643_vm1, %v6105_v6  ;;  %v6766_v6 = vpack.c.bf16 %v6738_v53, %v6737_v43  ;;  %v7073_v43 = vld [vmem:[#allocation2 + $0xc6] sm:$0xff] }
 0x507   : > { %9411 = vmatprep.mubr.msk.bf16.mxu1 %vm643_vm1, %v6106_v62  ;;  %v6744_v62 = vld [vmem:[#allocation2 + $0xcd] sm:$0xff]  ;;  %v7099_v53 = vpack.c.bf16 %v7074_v47, %v7073_v43 }
 0x508   : > { %v6769_v39 = vpack.c.bf16 %v6744_v62, %v6743_v22  ;;  %v7079_v62 = vld [vmem:[#allocation2 + $0xf6] sm:$0xff]  ;;  %v7082_v22 = vld [vmem:[#allocation2 + $0x10e] sm:$0xff] }
 0x50e   : > { %9412 = vmatmul.mubr.msk.bf16.gmra.mrb[12].mxu1 %vm643_vm1, %v6107_v0  ;;  %v6768_v0 = vpack.c.bf16 %v6742_v33, %v6741_v57  ;;  %v7077_v57 = vld [vmem:[#allocation2 + $0xe6] sm:$0xff] }
 0x50f   : > { %9415 = vmatprep.mubr.msk.bf16.mxu1 %vm643_vm1, %v6108_v7  ;;  %v6748_v7 = vld [vmem:[#allocation2 + $0xed] sm:$0xff]  ;;  %v7101_v33 = vpack.c.bf16 %v7078_v18, %v7077_v57 }
 0x510   : > { %v6771_v58 = vpack.c.bf16 %v6748_v7, %v6747_v52  ;;  %v7083_v7 = vld [vmem:[#allocation2 + $0x116] sm:$0xff]  ;;  %v7085_v52 = vld [vmem:[#allocation2 + $0x126] sm:$0xff] }
 0x516   : > { %9416 = vmatmul.mubr.msk.bf16.gmra.mrb[16].mxu1 %vm643_vm1, %v6109_v26  ;;  %v6770_v26 = vpack.c.bf16 %v6746_v61, %v6745_v28  ;;  %v7081_v28 = vld [vmem:[#allocation2 + $0x106] sm:$0xff] }
 0x517   : > { %9419 = vmatprep.mubr.msk.bf16.mxu1 %vm643_vm1, %v6110_v41  ;;  %v6752_v41 = vld [vmem:[#allocation2 + $0x10d] sm:$0xff]  ;;  %v7103_v61 = vpack.c.bf16 %v7082_v22, %v7081_v28 }
 0x518   : > { %v6773_v63 = vpack.c.bf16 %v6752_v41, %v6751_v46  ;;  %v7087_v41 = vld [vmem:[#allocation2 + $0x136] sm:$0xff] }
 0x51e   : > { %9420 = vmatmul.mubr.msk.bf16.gmra.mrb[20].mxu1 %vm643_vm1, %v6111_v56  ;;  %v6772_v56 = vpack.c.bf16 %v6750_v36, %v6749_v4 }
 0x51f   : > { %9423 = vmatprep.mubr.msk.bf16.mxu1 %vm643_vm1, %v6112_v48  ;;  %v6755_v48 = vld [vmem:[#allocation2 + $0x125] sm:$0xff] }
 0x526   : > { %9424 = vmatmul.mubr.msk.bf16.gmra.mrb[24].mxu1 %vm643_vm1, %v6113_v11  ;;  %v6756_v11 = vld [vmem:[#allocation2 + $0x12d] sm:$0xff] }
 0x527   : > { %9427 = vmatprep.mubr.msk.bf16.mxu1 %vm643_vm1, %v6114_v29  ;;  %v6775_v2 = vpack.c.bf16 %v6756_v11, %v6755_v48  ;;  %v6776_v29 = vpack.c.bf16 %v6758_v50, %v6757_v45  ;;  %v8469_v48 = vld [vmem:[%s10283_s22 + $0x18] sm:$0xff]   ;;  %v7621_v45 = vunpack.c.l.bf16 %v7584_v42  ;;  %v7622_v50 = vunpack.c.l.bf16 %v7585_v10 }
 0x529   : > { %v7697_v14 = vrot.slane %v7622_v50, 3 }
 0x52e   : > { %9428 = vmatmul.mubr.msk.bf16.gmra.mrb[28].mxu1 %vm643_vm1, %v6115_v60  ;;  %v7054_v60 = vld [vmem:[#allocation2 + $0x2e] sm:$0xff] }
 0x52f   : > { %9431 = vmatprep.mubr.msk.bf16.mxu1 %vm643_vm1, %v6445_v5  ;;  %v7089_v13 = vpack.c.bf16 %v7054_v60, %v7053_v25  ;;  %v8472_v60 = vld [vmem:[%s10283_s22 + $0x30] sm:$0xff]   ;;  %v8406_v25 = vunpack.c.l.bf16 %v8469_v48 }
 0x536   : > { %9432 = vmatmul.mubr.msk.bf16.gmra.mrb[32].mxu1 %vm643_vm1, %v6446_v38  ;;  %v7059_v38 = vld [vmem:[#allocation2 + $0x56] sm:$0xff] }
 0x537   : > { %9437 = vmatprep.mubr.msk.bf16.mxu1 %vm643_vm1, %v6759_v37  ;;  %v7092_v37 = vpack.c.bf16 %v7060_v19, %v7059_v38  ;;  %v8418_v38 = vunpack.c.l.bf16 %v8472_v60  ;;  %v8419_v19 = vunpack.c.h.bf16 %v8472_v60 }
 0x539   : > { %v7717_v40 = vrot.slane %v8419_v19, 3 }
 0x53e   : > { %9438 = vmatmul.mubr.msk.bf16.vlgmr.msra.gmra.mrb[0].mxu1 %vm643_vm1, %v6760_v35  ;;  %v7064_v35 = vld [vmem:[#allocation2 + $0x7e] sm:$0xff] }
 0x53f   : > { %9474 = vmatpush3.bf16.msra.mxu1 %v10197_v17  ;;  %9441 = vmatprep.mubr.msk.bf16.mxu1 %vm643_vm1, %v6761_v59  ;;  %v7056_v17 = vld [vmem:[#allocation2 + $0x3e] sm:$0xff]  ;;  %v7094_v59 = vpack.c.bf16 %v7064_v35, %v7063_v12  ;;  %v7703_v12 = vrot.slane %v8406_v25, 3  ;;  %v8422_v35 = vunpack.c.l.bf16 %v8473_v9 }
 0x540   : > { %v7090_v5 = vpack.c.bf16 %v7056_v17, %v7055_v15  ;;  %v8407_v17 = vunpack.c.h.bf16 %v8469_v48 }
 0x546   : > { %9442 = vmatmul.mubr.msk.bf16.gmra.mrb[4].mxu1 %vm643_vm1, %v6762_v21  ;;  %v7068_v21 = vld [vmem:[#allocation2 + $0x9e] sm:$0xff] }
 0x547   : > { %9445 = vmatprep.mubr.msk.bf16.mxu1 %vm643_vm1, %v6763_v16  ;;  %v7096_v16 = vpack.c.bf16 %v7068_v21, %v7067_v34  ;;  %v7705_v34 = vrot.slane %v8407_v17, 3  ;;  %v11696_v21 = vld [vmem:[%s12079_s7] ss:$0 sm:$0xff] }
 0x54e   : > { %9446 = vmatmul.mubr.msk.bf16.gmra.mrb[8].mxu1 %vm643_vm1, %v6764_v44  ;;  %v7072_v44 = vld [vmem:[#allocation2 + $0xbe] sm:$0xff] }
 0x54f   : > { %9449 = vmatprep.mubr.msk.bf16.mxu1 %vm643_vm1, %v6765_v51  ;;  %v7098_v51 = vpack.c.bf16 %v7072_v44, %v7071_v1 }
 0x556   : > { %9450 = vmatmul.mubr.msk.bf16.gmra.mrb[12].mxu1 %vm643_vm1, %v6766_v6  ;;  %v7076_v6 = vld [vmem:[#allocation2 + $0xde] sm:$0xff] }
 0x557   : > { %9453 = vmatprep.mubr.msk.bf16.mxu1 %vm643_vm1, %v6767_v54  ;;  %v7100_v54 = vpack.c.bf16 %v7076_v6, %v7075_v8  ;;  %v7719_v6 = vrot.slane %v8422_v35, 3 }
 0x559   : > { %v11746_v10 = vsel %vm3643_vm6, %v7717_v40, %v7719_v6 }
 0x55e   : > { %9454 = vmatmul.mubr.msk.bf16.gmra.mrb[16].mxu1 %vm643_vm1, %v6768_v0  ;;  %v7080_v0 = vld [vmem:[#allocation2 + $0xfe] sm:$0xff] }
 0x55f   : > { %9457 = vmatprep.mubr.msk.bf16.mxu1 %vm643_vm1, %v6769_v39  ;;  %v7102_v39 = vpack.c.bf16 %v7080_v0, %v7079_v62  ;;  %v11716_v0 = vsel %vm3643_vm6, %v7703_v12, %v7705_v34 }
 0x566   : > { %9458 = vmatmul.mubr.msk.bf16.gmra.mrb[20].mxu1 %vm643_vm1, %v6770_v26  ;;  %v7084_v26 = vld [vmem:[#allocation2 + $0x11e] sm:$0xff] }
 0x567   : > { %9461 = vmatprep.mubr.msk.bf16.mxu1 %vm643_vm1, %v6771_v58  ;;  %v7086_v58 = vld [vmem:[#allocation2 + $0x12e] sm:$0xff]  ;;  %v7104_v4 = vpack.c.bf16 %v7084_v26, %v7083_v7 }
 0x568   : > { %v7105_v36 = vpack.c.bf16 %v7086_v58, %v7085_v52  ;;  %v8475_v58 = vld [vmem:[%s10283_s22 + $0x48] sm:$0xff]  }
 0x56e   : > { %9462 = vmatmul.mubr.msk.bf16.gmra.mrb[24].mxu1 %vm643_vm1, %v6772_v56  ;;  %v7088_v56 = vld [vmem:[#allocation2 + $0x13e] sm:$0x3f] }
 0x56f   : > { %9465 = vmatprep.mubr.msk.bf16.mxu1 %vm643_vm1, %v6773_v63  ;;  %v7106_v46 = vpack.c.bf16 %v7088_v56, %v7087_v41  ;;  %v8468_v63 = vld [vmem:[%s10283_s22 + $0x10] sm:$0xff]  }
 0x570   : > { %v8402_v11 = vunpack.c.l.bf16 %v8468_v63 }
 0x572   : > { %v7699_v3 = vrot.slane %v8402_v11, 3  ;;  %v8476_v11 = vld [vmem:[%s10283_s22 + $0x50] sm:$0xff]  }
 0x574   : > { %v7700_v47 = vsel %vm3643_vm6, %v7697_v14, %v7699_v3 }
 0x576   : > { %9466 = vmatmul.mubr.msk.bf16.gmra.mrb[28].mxu1 %vm643_vm1, %v6774_v55  ;;  %v8470_v55 = vld [vmem:[%s10283_s22 + $0x20] sm:$0xff]  }
 0x577   : > { %9469 = vmatprep.mubr.msk.bf16.mxu1 %vm643_vm1, %v6775_v2  ;;  %v8403_v2 = vunpack.c.h.bf16 %v8468_v63  ;;  %v8411_v15 = vunpack.c.h.bf16 %v8470_v55 }
 0x579   : > { %v7701_v20 = vrot.slane %v8403_v2, 3 }
 0x57b   : > { %v7702_v1 = vsel %vm3643_vm6, %v7699_v3, %v7701_v20  ;;  %v7704_v8 = vsel %vm3643_vm6, %v7701_v20, %v7703_v12 }
 0x57e   : > { %9470 = vmatmul.mubr.msk.bf16.gmra.mrb[32].mxu1 %vm643_vm1, %v6776_v29  ;;  %v8471_v29 = vld [vmem:[%s10283_s22 + $0x28] sm:$0xff]  }
 0x57f   : > { %9475 = vmatprep.mubr.msk.bf16.mxu1 %vm643_vm1, %v7089_v13  ;;  %v8410_v13 = vunpack.c.l.bf16 %v8470_v55 }
 0x581   : > { %v7707_v31 = vrot.slane %v8410_v13, 3 }
 0x583   : > { %v11719_v22 = vsel %vm3643_vm6, %v7705_v34, %v7707_v31 }
 0x586   : > { %9476 = vmatmul.mubr.msk.bf16.vlgmr.msra.gmra.mrb[0].mxu1 %vm643_vm1, %v7090_v5  ;;  %v8474_v5 = vld [vmem:[%s10283_s22 + $0x40] sm:$0xff]  }
 0x587   : > { %9479 = vmatprep.mubr.msk.bf16.mxu1 %vm643_vm1, %v7091_v49  ;;  %v8414_v49 = vunpack.c.l.bf16 %v8471_v29  ;;  %v8426_v23 = vunpack.c.l.bf16 %v8474_v5 }
 0x589   : > { %v7711_v24 = vrot.slane %v8414_v49, 3  ;;  %v11707_v18 = vrot.slane %v8426_v23, 3  ;;  %v8431_v23 = vunpack.c.h.bf16 %v8475_v58 }
 0x58e   : > { %9480 = vmatmul.mubr.msk.bf16.gmra.mrb[4].mxu1 %vm643_vm1, %v7092_v37  ;;  %v7696_v37 = vrot.slane %v7621_v45, 3  ;;  %v8430_v45 = vunpack.c.l.bf16 %v8475_v58 }
 0x58f   : > { %9483 = vmatprep.mubr.msk.bf16.mxu1 %vm643_vm1, %v7093_v32  ;;  %v8415_v32 = vunpack.c.h.bf16 %v8471_v29 }
 0x590   : > { %v7698_v44 = vsel %vm3643_vm6, %v7696_v37, %v7697_v14  ;;  %v8435_v37 = vunpack.c.h.bf16 %v8476_v11 }
 0x596   : > { %9484 = vmatmul.mubr.msk.bf16.gmra.mrb[8].mxu1 %vm643_vm1, %v7094_v59  ;;  %v8427_v59 = vunpack.c.h.bf16 %v8474_v5 }
 0x597   : > { %9487 = vmatprep.mubr.msk.bf16.mxu1 %vm643_vm1, %v7095_v30  ;;  %v7709_v30 = vrot.slane %v8411_v15, 3  ;;  %v8434_v15 = vunpack.c.l.bf16 %v8476_v11 }
 0x599   : > { %v11713_v62 = vsel %vm3643_vm6, %v7707_v31, %v7709_v30  ;;  %v11728_v7 = vsel %vm3643_vm6, %v7709_v30, %v7711_v24 }
 0x59e   : > { %9488 = vmatmul.mubr.msk.bf16.gmra.mrb[12].mxu1 %vm643_vm1, %v7096_v16  ;;  %v7715_v16 = vrot.slane %v8418_v38, 3 }
 0x59f   : > { %9491 = vmatprep.mubr.msk.bf16.mxu1 %vm643_vm1, %v7097_v27  ;;  %v8423_v27 = vunpack.c.h.bf16 %v8473_v9 }
 0x5a0   : > { %v11731_v26 = vsel %vm3643_vm6, %v7715_v16, %v7717_v40 }
 0x5a1   : > { %v7721_v52 = vrot.slane %v8423_v27, 3 }
 0x5a3   : > { %v11759_v60 = vsel %vm3643_vm6, %v7719_v6, %v7721_v52  ;;  %v11782_v27 = vsel %vm3643_vm6, %v7721_v52, %v11707_v18 }
 0x5a6   : > { %9492 = vmatmul.mubr.msk.bf16.gmra.mrb[16].mxu1 %vm643_vm1, %v7098_v51  ;;  %v7713_v51 = vrot.slane %v8415_v32, 3 }
 0x5a7   : > { %9495 = vmatprep.mubr.msk.bf16.mxu1 %vm643_vm1, %v7099_v53  ;;  %v11704_v53 = vld [vmem:[%s12080_s8] ss:$0 sm:$0xff] }
 0x5a8   : > { %v11738_v56 = vsel %vm3643_vm6, %v7711_v24, %v7713_v51  ;;  %v7727_v24 = vrot.slane %v8430_v45, 3 }
 0x5ae   : > { %9496 = vmatmul.mubr.msk.bf16.gmra.mrb[20].mxu1 %vm643_vm1, %v7100_v54  ;;  %v11709_v54 = vrot.slane %v8427_v59, 3 }
 0x5af   : > { %9499 = vmatprep.mubr.msk.bf16.mxu1 %vm643_vm1, %v7101_v33 }
 0x5b0   : > { %v11751_v48 = vsel %vm3643_vm6, %v11707_v18, %v11709_v54  ;;  %v11797_v18 = vrot.slane %v8431_v23, 3 }
 0x5b6   : > { %9500 = vmatmul.mubr.msk.bf16.gmra.mrb[24].mxu1 %vm643_vm1, %v7102_v39  ;;  %v11724_v39 = vld [vmem:[%s12081_s9] ss:$0 sm:$0xff] }
 0x5b7   : > { %9503 = vmatprep.mubr.msk.bf16.mxu1 %vm643_vm1, %v7103_v61 }
 0x5be   : > { %9504 = vmatmul.mubr.msk.bf16.gmra.mrb[28].mxu1 %vm643_vm1, %v7104_v4 }
 0x5bf   : > { %9507 = vmatprep.mubr.msk.bf16.mxu1 %vm643_vm1, %v7105_v36 }
 0x5c6   : > { %9508 = vmatmul.mubr.msk.bf16.gmra.mrb[32].mxu1 %vm643_vm1, %v7106_v46  ;;  %v11741_v46 = vsel %vm3643_vm6, %v7713_v51, %v7715_v16 }
 0x659   : > { %v9477_v43 = vpop.f32.mrb[0].mxu1 }
 0x65a   : > { %v7392_v57 = vmul.f32 %v9477_v43, %v11696_v21  ;;  %v7204_v33 = vpop.f32.mrb[1].mxu1  ;;  %v11793_v43 = vrot.slane %v8435_v37, 3 }
 0x65b   : > { %v7390_v28 = vmul.f32 %v11696_v21, %v7204_v33  ;;  %v9478_v61 = vpop.f32.mrb[2].mxu1 }
 0x65c   : > { %v7435_v4 = vadd.f32 %v11704_v53, %v7392_v57  ;;  %v7393_v36 = vmul.f32 %v9478_v61, %v11696_v21  ;;  %v7207_v41 = vpop.f32.mrb[3].mxu1 }
 0x65d   : > { %v7433_v63 = vadd.f32 %v11704_v53, %v7390_v28  ;;  %v7391_v42 = vmul.f32 %v11696_v21, %v7207_v41 }
 0x65e   : > { %vm7471_vm2 = vcmp.gt.f32.partialorder %v7435_v4, 0.0  ;;  %v7514_v55 = vmul.f32 %v11724_v39, %v7435_v4  ;;  %v7436_v2 = vadd.f32 %v11704_v53, %v7393_v36  ;;  %v8478_v36 = vld [vmem:[%s10283_s22 + $0x60] sm:$0xff]  }
 0x65f   : > { %vm7469_vm3 = vcmp.gt.f32.partialorder %v7433_v63, 0.0  ;;  %v7512_v50 = vmul.f32 %v11724_v39, %v7433_v63  ;;  %v7434_v29 = vadd.f32 %v11704_v53, %v7391_v42 }
 0x660   : > { %v7550_v25 = vsel %vm7471_vm2, %v7435_v4, %v7514_v55  ;;  %vm7472_vm4 = vcmp.gt.f32.partialorder %v7436_v2, 0.0  ;;  %v7515_v13 = vmul.f32 %v11724_v39, %v7436_v2  ;;  %v11808_v55 = vsel %vm3643_vm6, %v11709_v54, %v7727_v24 }
 0x661   : > { %v7807_v17 = vadd.f32 %v7702_v1, %v7550_v25  ;;  %v7548_v9 = vsel %vm7469_vm3, %v7433_v63, %v7512_v50  ;;  %vm7470_vm5 = vcmp.gt.f32.partialorder %v7434_v29, 0.0  ;;  %v7513_v5 = vmul.f32 %v11724_v39, %v7434_v29  ;;  %v9481_v3 = vpop.f32.mrb[4].mxu1 }
 0x662   : > { %v7805_v49 = vadd.f32 %v7698_v44, %v7548_v9  ;;  %v7551_v38 = vsel %vm7472_vm4, %v7436_v2, %v7515_v13  ;;  %v7396_v19 = vmul.f32 %v9481_v3, %v11696_v21  ;;  %v7220_v20 = vpop.f32.mrb[5].mxu1  ;;  %v11784_v1 = vrot.slane %v8434_v15, 3  ;;  %v11787_v44 = vld [vmem:[%s10283_s22 + $0x58] sm:$0xff]  }
 0x663   : > { %7843 = vst.msk [vmem:[%s11764_s21 + $0x10] sm:$0xff] %vm643_vm1, %v7807_v17  ;;  %v7808_v14 = vadd.f32 %v7704_v8, %v7551_v38  ;;  %v7549_v32 = vsel %vm7470_vm5, %v7434_v29, %v7513_v5  ;;  %v7394_v12 = vmul.f32 %v11696_v21, %v7220_v20  ;;  %v9482_v35 = vpop.f32.mrb[6].mxu1  ;;  %v8438_v28 = vunpack.c.l.bf16 %v11787_v44 }
 0x664   : > { %7841 = vst.msk [vmem:[%s11764_s21] sm:$0xff] %vm643_vm1, %v7805_v49  ;;  %v7806_v59 = vadd.f32 %v7700_v47, %v7549_v32  ;;  %v7439_v31 = vadd.f32 %v11704_v53, %v7396_v19  ;;  %v7397_v30 = vmul.f32 %v9482_v35, %v11696_v21  ;;  %v7223_v34 = vpop.f32.mrb[7].mxu1  ;;  %v11830_v9 = vsel %vm3643_vm6, %v7727_v24, %v11797_v18 }
 0x665   : > { %7844 = vst.msk [vmem:[%s11764_s21 + $0x18] sm:$0xff] %vm643_vm1, %v7808_v14  ;;  %v7437_v16 = vadd.f32 %v11704_v53, %v7394_v12  ;;  %v7395_v40 = vmul.f32 %v11696_v21, %v7223_v34  ;;  %v7735_v5 = vrot.slane %v8438_v28, 3  ;;  %v8443_v49 = vunpack.c.h.bf16 %v8478_v36 }
 0x666   : > { %7842 = vst.msk [vmem:[%s11764_s21 + $0x8] sm:$0xff] %vm643_vm1, %v7806_v59  ;;  %vm7475_vm7 = vcmp.gt.f32.partialorder %v7439_v31, 0.0  ;;  %v7518_v47 = vmul.f32 %v11724_v39, %v7439_v31  ;;  %v7440_v51 = vadd.f32 %v11704_v53, %v7397_v30  ;;  %v8439_v20 = vunpack.c.h.bf16 %v11787_v44 }
 0x667   : > { %vm7473_vm8 = vcmp.gt.f32.partialorder %v7437_v16, 0.0  ;;  %v7516_v8 = vmul.f32 %v11724_v39, %v7437_v16  ;;  %v7438_v6 = vadd.f32 %v11704_v53, %v7395_v40  ;;  %v7741_v40 = vrot.slane %v8443_v49, 3 }
 0x668   : > { %v7554_v57 = vsel %vm7475_vm7, %v7439_v31, %v7518_v47  ;;  %vm7476_vm9 = vcmp.gt.f32.partialorder %v7440_v51, 0.0  ;;  %v7519_v33 = vmul.f32 %v11724_v39, %v7440_v51  ;;  %v11845_v31 = vld [vmem:[%s10283_s22 + $0x68] sm:$0xff]  }
 0x669   : > { %v7811_v61 = vadd.f32 %v11713_v62, %v7554_v57  ;;  %v7552_v52 = vsel %vm7473_vm8, %v7437_v16, %v7516_v8  ;;  %vm7474_vm10 = vcmp.gt.f32.partialorder %v7438_v6, 0.0  ;;  %v7517_v58 = vmul.f32 %v11724_v39, %v7438_v6  ;;  %v9485_v4 = vpop.f32.mrb[8].mxu1 }
 0x66a   : > { %v7809_v41 = vadd.f32 %v11716_v0, %v7552_v52  ;;  %v7555_v63 = vsel %vm7476_vm9, %v7440_v51, %v7519_v33  ;;  %v7400_v42 = vmul.f32 %v9485_v4, %v11696_v21  ;;  %v7236_v11 = vpop.f32.mrb[9].mxu1  ;;  %v11817_v0 = vsel %vm3643_vm6, %v11784_v1, %v11793_v43 }
 0x66b   : > { %7847 = vst.msk [vmem:[%s11764_s21 + $0x30] sm:$0xff] %vm643_vm1, %v7811_v61  ;;  %v7812_v62 = vadd.f32 %v11728_v7, %v7555_v63  ;;  %v7553_v2 = vsel %vm7474_vm10, %v7438_v6, %v7517_v58  ;;  %v7398_v45 = vmul.f32 %v11696_v21, %v7236_v11  ;;  %v9486_v50 = vpop.f32.mrb[10].mxu1  ;;  %v8442_v7 = vunpack.c.l.bf16 %v8478_v36 }
 0x66c   : > { %7845 = vst.msk [vmem:[%s11764_s21 + $0x20] sm:$0xff] %vm643_vm1, %v7809_v41  ;;  %v7810_v29 = vadd.f32 %v11719_v22, %v7553_v2  ;;  %v7443_v54 = vadd.f32 %v11704_v53, %v7400_v42  ;;  %v7401_v25 = vmul.f32 %v9486_v50, %v11696_v21  ;;  %v7239_v13 = vpop.f32.mrb[11].mxu1  ;;  %v7737_v8 = vrot.slane %v8439_v20, 3 }
 0x66d   : > { %7848 = vst.msk [vmem:[%s11764_s21 + $0x38] sm:$0xff] %vm643_vm1, %v7812_v62  ;;  %v7441_v15 = vadd.f32 %v11704_v53, %v7398_v45  ;;  %v7399_v17 = vmul.f32 %v11696_v21, %v7239_v13  ;;  %v11840_v32 = vrot.slane %v8442_v7, 3  ;;  %v8446_v28 = vunpack.c.l.bf16 %v11845_v31 }
 0x66e   : > { %7846 = vst.msk [vmem:[%s11764_s21 + $0x28] sm:$0xff] %vm643_vm1, %v7810_v29  ;;  %vm7479_vm11 = vcmp.gt.f32.partialorder %v7443_v54, 0.0  ;;  %v7522_v22 = vmul.f32 %v11724_v39, %v7443_v54  ;;  %v7444_v3 = vadd.f32 %v11704_v53, %v7401_v25  ;;  %v11865_v52 = vsel %vm3643_vm6, %v11793_v43, %v7735_v5 }
 0x66f   : > { %vm7477_vm12 = vcmp.gt.f32.partialorder %v7441_v15, 0.0  ;;  %v7520_v38 = vmul.f32 %v11724_v39, %v7441_v15  ;;  %v7442_v19 = vadd.f32 %v11704_v53, %v7399_v17  ;;  %v11878_v36 = vsel %vm3643_vm6, %v11840_v32, %v7741_v40 }
 0x670   : > { %v7558_v37 = vsel %vm7479_vm11, %v7443_v54, %v7522_v22  ;;  %vm7480_vm13 = vcmp.gt.f32.partialorder %v7444_v3, 0.0  ;;  %v7523_v14 = vmul.f32 %v11724_v39, %v7444_v3  ;;  %v11883_v63 = vsel %vm3643_vm6, %v7735_v5, %v7737_v8 }
 0x671   : > { %v7815_v12 = vadd.f32 %v11731_v26, %v7558_v37  ;;  %v7556_v35 = vsel %vm7477_vm12, %v7441_v15, %v7520_v38  ;;  %vm7478_vm14 = vcmp.gt.f32.partialorder %v7442_v19, 0.0  ;;  %v7521_v23 = vmul.f32 %v11724_v39, %v7442_v19  ;;  %v9489_v59 = vpop.f32.mrb[12].mxu1 }
 0x672   : > { %v7813_v30 = vadd.f32 %v11738_v56, %v7556_v35  ;;  %v7559_v34 = vsel %vm7480_vm13, %v7444_v3, %v7523_v14  ;;  %v7404_v24 = vmul.f32 %v9489_v59, %v11696_v21  ;;  %v7252_v16 = vpop.f32.mrb[13].mxu1  ;;  %v11887_v11 = vrot.slane %v8446_v28, 3 }
 0x673   : > { %7851 = vst.msk [vmem:[%s11764_s21 + $0x50] sm:$0xff] %vm643_vm1, %v7815_v12  ;;  %v7816_v26 = vadd.f32 %v11746_v10, %v7559_v34  ;;  %v7557_v44 = vsel %vm7478_vm14, %v7442_v19, %v7521_v23  ;;  %v7402_v47 = vmul.f32 %v11696_v21, %v7252_v16  ;;  %v9490_v51 = vpop.f32.mrb[14].mxu1  ;;  %v8447_v19 = vunpack.c.h.bf16 %v11845_v31  ;;  %v8482_v16 = vld [vmem:[%s10283_s22 + $0x80] sm:$0xff]  }
 0x674   : > { %7849 = vst.msk [vmem:[%s11764_s21 + $0x40] sm:$0xff] %vm643_vm1, %v7813_v30  ;;  %v7814_v56 = vadd.f32 %v11741_v46, %v7557_v44  ;;  %v7447_v6 = vadd.f32 %v11704_v53, %v7404_v24  ;;  %v7405_v57 = vmul.f32 %v9490_v51, %v11696_v21  ;;  %v7255_v33 = vpop.f32.mrb[15].mxu1  ;;  %v11870_v46 = vsel %vm3643_vm6, %v11797_v18, %v11784_v1  ;;  %v8480_v1 = vld [vmem:[%s10283_s22 + $0x70] sm:$0xff]   ;;  %v11926_v30 = vld [vmem:[%s10283_s22 + $0x78] sm:$0xff]  }
 0x675   : > { %7852 = vst.msk [vmem:[%s11764_s21 + $0x58] sm:$0xff] %vm643_vm1, %v7816_v26  ;;  %v7445_v10 = vadd.f32 %v11704_v53, %v7402_v47  ;;  %v7403_v61 = vmul.f32 %v11696_v21, %v7255_v33  ;;  %v8450_v7 = vunpack.c.l.bf16 %v8480_v1  ;;  %v8451_v22 = vunpack.c.h.bf16 %v8480_v1 }
 0x676   : > { %7850 = vst.msk [vmem:[%s11764_s21 + $0x48] sm:$0xff] %vm643_vm1, %v7814_v56  ;;  %vm7483_vm0 = vcmp.gt.f32.partialorder %v7447_v6, 0.0  ;;  %v7526_v58 = vmul.f32 %v11724_v39, %v7447_v6  ;;  %v7448_v4 = vadd.f32 %v11704_v53, %v7405_v57  ;;  %v11909_v37 = vsel %vm3643_vm6, %v7741_v40, %v11887_v11 }
 0x677   : > { %vm7481_vm2 = vcmp.gt.f32.partialorder %v7445_v10, 0.0  ;;  %v7524_v43 = vmul.f32 %v11724_v39, %v7445_v10  ;;  %v7446_v41 = vadd.f32 %v11704_v53, %v7403_v61  ;;  %v11919_v35 = vrot.slane %v8450_v7, 3 }
 0x678   : > { %v7562_v18 = vsel %vm7483_vm0, %v7447_v6, %v7526_v58  ;;  %vm7484_vm3 = vcmp.gt.f32.partialorder %v7448_v4, 0.0  ;;  %v7527_v42 = vmul.f32 %v11724_v39, %v7448_v4  ;;  %v11923_v31 = vrot.slane %v8451_v22, 3 }
 0x679   : > { %v7819_v62 = vadd.f32 %v11751_v48, %v7562_v18  ;;  %v7560_v2 = vsel %vm7481_vm2, %v7445_v10, %v7524_v43  ;;  %vm7482_vm4 = vcmp.gt.f32.partialorder %v7446_v41, 0.0  ;;  %v7525_v45 = vmul.f32 %v11724_v39, %v7446_v41  ;;  %v9493_v50 = vpop.f32.mrb[16].mxu1 }
 0x67a   : > { %v7817_v29 = vadd.f32 %v11759_v60, %v7560_v2  ;;  %v7563_v54 = vsel %vm7484_vm3, %v7448_v4, %v7527_v42  ;;  %v7408_v25 = vmul.f32 %v9493_v50, %v11696_v21  ;;  %v7268_v13 = vpop.f32.mrb[17].mxu1  ;;  %v11929_v24 = vrot.slane %v8447_v19, 3 }
 0x67b   : > { %7855 = vst.msk [vmem:[%s11764_s21 + $0x70] sm:$0xff] %vm643_vm1, %v7819_v62  ;;  %v7820_v15 = vadd.f32 %v11808_v55, %v7563_v54  ;;  %v7561_v48 = vsel %vm7482_vm4, %v7446_v41, %v7525_v45  ;;  %v7406_v17 = vmul.f32 %v11696_v21, %v7268_v13  ;;  %v9494_v5 = vpop.f32.mrb[18].mxu1  ;;  %v8454_v57 = vunpack.c.l.bf16 %v11926_v30  ;;  %v11968_v13 = vld [vmem:[%s10283_s22 + $0x88] sm:$0xff]  }
 0x67c   : > { %7853 = vst.msk [vmem:[%s11764_s21 + $0x60] sm:$0xff] %vm643_vm1, %v7817_v29  ;;  %v7818_v60 = vadd.f32 %v11782_v27, %v7561_v48  ;;  %v7451_v3 = vadd.f32 %v11704_v53, %v7408_v25  ;;  %v7409_v49 = vmul.f32 %v9494_v5, %v11696_v21  ;;  %v7271_v38 = vpop.f32.mrb[19].mxu1  ;;  %v11913_v27 = vsel %vm3643_vm6, %v7737_v8, %v11840_v32 }
 0x67d   : > { %7856 = vst.msk [vmem:[%s11764_s21 + $0x78] sm:$0xff] %vm643_vm1, %v7820_v15  ;;  %v7449_v55 = vadd.f32 %v11704_v53, %v7406_v17  ;;  %v7407_v20 = vmul.f32 %v11696_v21, %v7271_v38  ;;  %v8458_v61 = vunpack.c.l.bf16 %v8482_v16  ;;  %v8459_v41 = vunpack.c.h.bf16 %v8482_v16 }
 0x67e   : > { %7854 = vst.msk [vmem:[%s11764_s21 + $0x68] sm:$0xff] %vm643_vm1, %v7818_v60  ;;  %vm7487_vm5 = vcmp.gt.f32.partialorder %v7451_v3, 0.0  ;;  %v7530_v14 = vmul.f32 %v11724_v39, %v7451_v3  ;;  %v7452_v12 = vadd.f32 %v11704_v53, %v7409_v49  ;;  %v7750_v18 = vsel %vm3643_vm6, %v11919_v35, %v11923_v31 }
 0x67f   : > { %vm7485_vm7 = vcmp.gt.f32.partialorder %v7449_v55, 0.0  ;;  %v7528_v23 = vmul.f32 %v11724_v39, %v7449_v55  ;;  %v7450_v59 = vadd.f32 %v11704_v53, %v7407_v20  ;;  %v7751_v2 = vrot.slane %v8454_v57, 3 }
 0x680   : > { %v7566_v32 = vsel %vm7487_vm5, %v7451_v3, %v7530_v14  ;;  %vm7488_vm8 = vcmp.gt.f32.partialorder %v7452_v12, 0.0  ;;  %v7531_v34 = vmul.f32 %v11724_v39, %v7452_v12  ;;  %v11962_v29 = vrot.slane %v8458_v61, 3 }
 0x681   : > { %v7823_v40 = vadd.f32 %v11817_v0, %v7566_v32  ;;  %v7564_v26 = vsel %vm7485_vm7, %v7449_v55, %v7528_v23  ;;  %vm7486_vm9 = vcmp.gt.f32.partialorder %v7450_v59, 0.0  ;;  %v7529_v44 = vmul.f32 %v11724_v39, %v7450_v59  ;;  %v9497_v47 = vpop.f32.mrb[20].mxu1 }
 0x682   : > { %v7821_v51 = vadd.f32 %v11830_v9, %v7564_v26  ;;  %v7567_v8 = vsel %vm7488_vm8, %v7452_v12, %v7531_v34  ;;  %v7412_v56 = vmul.f32 %v9497_v47, %v11696_v21  ;;  %v7284_v6 = vpop.f32.mrb[21].mxu1  ;;  %v11965_v25 = vrot.slane %v8459_v41, 3  ;;  %v8484_v34 = vld [vmem:[%s10283_s22 + $0x90] sm:$0xff]  }
 0x683   : > { %7859 = vst.msk [vmem:[%s11764_s21 + $0x90] sm:$0xff] %vm643_vm1, %v7823_v40  ;;  %v7824_v33 = vadd.f32 %v11865_v52, %v7567_v8  ;;  %v7565_v0 = vsel %vm7486_vm9, %v7450_v59, %v7529_v44  ;;  %v7410_v28 = vmul.f32 %v11696_v21, %v7284_v6  ;;  %v9498_v10 = vpop.f32.mrb[22].mxu1  ;;  %v8455_v49 = vunpack.c.h.bf16 %v11926_v30 }
 0x684   : > { %7857 = vst.msk [vmem:[%s11764_s21 + $0x80] sm:$0xff] %vm643_vm1, %v7821_v51  ;;  %v7822_v9 = vadd.f32 %v11870_v46, %v7565_v0  ;;  %v7455_v58 = vadd.f32 %v11704_v53, %v7412_v56  ;;  %v7413_v4 = vmul.f32 %v9498_v10, %v11696_v21  ;;  %v7287_v43 = vpop.f32.mrb[23].mxu1  ;;  %v7746_v46 = vsel %vm3643_vm6, %v11887_v11, %v11929_v24 }
 0x685   : > { %7860 = vst.msk [vmem:[%s11764_s21 + $0x98] sm:$0xff] %vm643_vm1, %v7824_v33  ;;  %v7453_v52 = vadd.f32 %v11704_v53, %v7410_v28  ;;  %v7411_v1 = vmul.f32 %v11696_v21, %v7287_v43  ;;  %v8462_v20 = vunpack.c.l.bf16 %v11968_v13  ;;  %v7752_v30 = vsel %vm3643_vm6, %v11923_v31, %v7751_v2 }
 0x686   : > { %7858 = vst.msk [vmem:[%s11764_s21 + $0x88] sm:$0xff] %vm643_vm1, %v7822_v9  ;;  %vm7491_vm10 = vcmp.gt.f32.partialorder %v7455_v58, 0.0  ;;  %v7534_v42 = vmul.f32 %v11724_v39, %v7455_v58  ;;  %v7456_v62 = vadd.f32 %v11704_v53, %v7413_v4  ;;  %v8466_v51 = vunpack.c.l.bf16 %v8484_v34 }
 0x687   : > { %vm7489_vm11 = vcmp.gt.f32.partialorder %v7453_v52, 0.0  ;;  %v7532_v45 = vmul.f32 %v11724_v39, %v7453_v52  ;;  %v7454_v50 = vadd.f32 %v11704_v53, %v7411_v1  ;;  %v12004_v26 = vrot.slane %v8462_v20, 3 }
 0x688   : > { %v7570_v54 = vsel %vm7491_vm10, %v7455_v58, %v7534_v42  ;;  %vm7492_vm12 = vcmp.gt.f32.partialorder %v7456_v62, 0.0  ;;  %v7535_v11 = vmul.f32 %v11724_v39, %v7456_v62  ;;  %v8467_v41 = vunpack.c.h.bf16 %v8484_v34 }
 0x689   : > { %v7827_v7 = vadd.f32 %v11878_v36, %v7570_v54  ;;  %v7568_v15 = vsel %vm7489_vm11, %v7453_v52, %v7532_v45  ;;  %vm7490_vm13 = vcmp.gt.f32.partialorder %v7454_v50, 0.0  ;;  %v7533_v48 = vmul.f32 %v11724_v39, %v7454_v50  ;;  %v9501_v17 = vpop.f32.mrb[24].mxu1  ;;  %v7620_v54 = vld [vmem:[%s10283_s22 + $0x98] sm:$0x1] }
 0x68a   : > { %v7825_v5 = vadd.f32 %v11883_v63, %v7568_v15  ;;  %v7571_v22 = vsel %vm7492_vm12, %v7456_v62, %v7535_v11  ;;  %v7416_v60 = vmul.f32 %v9501_v17, %v11696_v21  ;;  %v7300_v3 = vpop.f32.mrb[25].mxu1 }
 0x68b   : > { %7863 = vst.msk [vmem:[%s11764_s21 + $0xb0] sm:$0xff] %vm643_vm1, %v7827_v7  ;;  %v7828_v38 = vadd.f32 %v11909_v37, %v7571_v22  ;;  %v7569_v36 = vsel %vm7490_vm13, %v7454_v50, %v7533_v48  ;;  %v7414_v19 = vmul.f32 %v11696_v21, %v7300_v3  ;;  %v9502_v55 = vpop.f32.mrb[26].mxu1  ;;  %v7748_v37 = vsel %vm3643_vm6, %v11929_v24, %v11919_v35 }
 0x68c   : > { %7861 = vst.msk [vmem:[%s11764_s21 + $0xa0] sm:$0xff] %vm643_vm1, %v7825_v5  ;;  %v7826_v63 = vadd.f32 %v11913_v27, %v7569_v36  ;;  %v7459_v14 = vadd.f32 %v11704_v53, %v7416_v60  ;;  %v7417_v12 = vmul.f32 %v9502_v55, %v11696_v21  ;;  %v7303_v23 = vpop.f32.mrb[27].mxu1  ;;  %v7758_v27 = vsel %vm3643_vm6, %v11962_v29, %v11965_v25 }
 0x68d   : > { %7864 = vst.msk [vmem:[%s11764_s21 + $0xb8] sm:$0xff] %vm643_vm1, %v7828_v38  ;;  %v7457_v59 = vadd.f32 %v11704_v53, %v7414_v19  ;;  %v7415_v32 = vmul.f32 %v11696_v21, %v7303_v23  ;;  %v7753_v24 = vrot.slane %v8455_v49, 3  ;;  %v7763_v50 = vrot.slane %v8466_v51, 3 }
 0x68e   : > { %7862 = vst.msk [vmem:[%s11764_s21 + $0xa8] sm:$0xff] %vm643_vm1, %v7826_v63  ;;  %vm7495_vm14 = vcmp.gt.f32.partialorder %v7459_v14, 0.0  ;;  %v7538_v16 = vmul.f32 %v11724_v39, %v7459_v14  ;;  %v7460_v35 = vadd.f32 %v11704_v53, %v7417_v12  ;;  %v7657_v22 = vunpack.c.l.bf16 %v7620_v54 }
 0x68f   : > { %vm7493_vm0 = vcmp.gt.f32.partialorder %v7457_v59, 0.0  ;;  %v7536_v40 = vmul.f32 %v11724_v39, %v7457_v59  ;;  %v7458_v31 = vadd.f32 %v11704_v53, %v7415_v32  ;;  %v7754_v61 = vsel %vm3643_vm6, %v7751_v2, %v7753_v24 }
 0x690   : > { %v7574_v44 = vsel %vm7495_vm14, %v7459_v14, %v7538_v16  ;;  %vm7496_vm2 = vcmp.gt.f32.partialorder %v7460_v35, 0.0  ;;  %v7539_v47 = vmul.f32 %v11724_v39, %v7460_v35  ;;  %v7756_v42 = vsel %vm3643_vm6, %v7753_v24, %v11962_v29 }
 0x691   : > { %v7831_v8 = vadd.f32 %v7750_v18, %v7574_v44  ;;  %v7572_v56 = vsel %vm7493_vm0, %v7457_v59, %v7536_v40  ;;  %vm7494_vm3 = vcmp.gt.f32.partialorder %v7458_v31, 0.0  ;;  %v7537_v6 = vmul.f32 %v11724_v39, %v7458_v31  ;;  %v9505_v57 = vpop.f32.mrb[28].mxu1 }
 0x692   : > { %v7829_v33 = vadd.f32 %v7746_v46, %v7572_v56  ;;  %v7575_v0 = vsel %vm7496_vm2, %v7460_v35, %v7539_v47  ;;  %v7420_v28 = vmul.f32 %v9505_v57, %v11696_v21  ;;  %v7316_v10 = vpop.f32.mrb[29].mxu1  ;;  %v7760_v2 = vsel %vm3643_vm6, %v11965_v25, %v12004_v26 }
 0x693   : > { %7867 = vst.msk [vmem:[%s11764_s21 + $0xd0] sm:$0xff] %vm643_vm1, %v7831_v8  ;;  %v7832_v9 = vadd.f32 %v7752_v30, %v7575_v0  ;;  %v7573_v58 = vsel %vm7494_vm3, %v7458_v31, %v7537_v6  ;;  %v7418_v4 = vmul.f32 %v11696_v21, %v7316_v10  ;;  %v9506_v43 = vpop.f32.mrb[30].mxu1  ;;  %v8463_v29 = vunpack.c.h.bf16 %v11968_v13 }
 0x694   : > { %7865 = vst.msk [vmem:[%s11764_s21 + $0xc0] sm:$0xff] %vm643_vm1, %v7829_v33  ;;  %v7830_v52 = vadd.f32 %v7748_v37, %v7573_v58  ;;  %v7463_v1 = vadd.f32 %v11704_v53, %v7420_v28  ;;  %v7421_v18 = vmul.f32 %v9506_v43, %v11696_v21  ;;  %v7319_v46 = vpop.f32.mrb[31].mxu1  ;;  %v7765_v25 = vrot.slane %v8467_v41, 3 }
 0x695   : > { %7868 = vst.msk [vmem:[%s11764_s21 + $0xd8] sm:$0xff] %vm643_vm1, %v7832_v9  ;;  %v7461_v62 = vadd.f32 %v11704_v53, %v7418_v4  ;;  %v7419_v45 = vmul.f32 %v11696_v21, %v7319_v46  ;;  %v7761_v20 = vrot.slane %v8463_v29, 3  ;;  %v7767_v32 = vrot.slane %v7657_v22, 3 }
 0x696   : > { %7866 = vst.msk [vmem:[%s11764_s21 + $0xc8] sm:$0xff] %vm643_vm1, %v7830_v52  ;;  %vm7499_vm4 = vcmp.gt.f32.partialorder %v7463_v1, 0.0  ;;  %v7542_v11 = vmul.f32 %v11724_v39, %v7463_v1  ;;  %v7464_v7 = vadd.f32 %v11704_v53, %v7421_v18  ;;  %v7766_v34 = vsel %vm3643_vm6, %v7763_v50, %v7765_v25 }
 0x697   : > { %vm7497_vm5 = vcmp.gt.f32.partialorder %v7461_v62, 0.0  ;;  %v7540_v15 = vmul.f32 %v11724_v39, %v7461_v62  ;;  %v7462_v48 = vadd.f32 %v11704_v53, %v7419_v45  ;;  %v7762_v40 = vsel %vm3643_vm6, %v12004_v26, %v7761_v20 }
 0x698   : > { %v7578_v17 = vsel %vm7499_vm4, %v7463_v1, %v7542_v11  ;;  %vm7500_vm7 = vcmp.gt.f32.partialorder %v7464_v7, 0.0  ;;  %v7543_v5 = vmul.f32 %v11724_v39, %v7464_v7  ;;  %v7764_v51 = vsel %vm3643_vm6, %v7761_v20, %v7763_v50 }
 0x699   : > { %v7835_v60 = vadd.f32 %v7758_v27, %v7578_v17  ;;  %v7576_v3 = vsel %vm7497_vm5, %v7461_v62, %v7540_v15  ;;  %vm7498_vm8 = vcmp.gt.f32.partialorder %v7462_v48, 0.0  ;;  %v7541_v49 = vmul.f32 %v11724_v39, %v7462_v48  ;;  %v9509_v38 = vpop.f32.mrb[32].mxu1 }
 0x69a   : > { %v7833_v13 = vadd.f32 %v7754_v61, %v7576_v3  ;;  %v7579_v36 = vsel %vm7500_vm7, %v7464_v7, %v7543_v5  ;;  %v7424_v19 = vmul.f32 %v9509_v38, %v11696_v21  ;;  %v7332_v55 = vpop.f32.mrb[33].mxu1  ;;  %v7768_v56 = vsel %vm3643_vm6, %v7765_v25, %v7767_v32 }
 0x69b   : > { %7871 = vst.msk [vmem:[%s11764_s21 + $0xf0] sm:$0xff] %vm643_vm1, %v7835_v60  ;;  %v7836_v63 = vadd.f32 %v7760_v2, %v7579_v36  ;;  %v7577_v14 = vsel %vm7498_vm8, %v7462_v48, %v7541_v49  ;;  %v7422_v12 = vmul.f32 %v11696_v21, %v7332_v55  ;;  %v9510_v23 = vpop.f32.mrb[34].mxu1 }
 0x69c   : > { %7869 = vst.msk [vmem:[%s11764_s21 + $0xe0] sm:$0xff] %vm643_vm1, %v7833_v13  ;;  %v7834_v37 = vadd.f32 %v7756_v42, %v7577_v14  ;;  %v7467_v59 = vadd.f32 %v11704_v53, %v7424_v19  ;;  %v7425_v30 = vmul.f32 %v9510_v23, %v11696_v21  ;;  %v7335_v27 = vpop.f32.mrb[35].mxu1 }
 0x69d   : > { %7872 = vst.msk [vmem:[%s11764_s21 + $0xf8] sm:$0xff] %vm643_vm1, %v7836_v63  ;;  %v7465_v16 = vadd.f32 %v11704_v53, %v7422_v12  ;;  %v7423_v35 = vmul.f32 %v11696_v21, %v7335_v27 }
 0x69e   : > { %7870 = vst.msk [vmem:[%s11764_s21 + $0xe8] sm:$0xff] %vm643_vm1, %v7834_v37  ;;  %vm7503_vm9 = vcmp.gt.f32.partialorder %v7467_v59, 0.0  ;;  %v7546_v24 = vmul.f32 %v11724_v39, %v7467_v59  ;;  %v7468_v31 = vadd.f32 %v11704_v53, %v7425_v30 }
 0x69f   : > { %vm7501_vm10 = vcmp.gt.f32.partialorder %v7465_v16, 0.0  ;;  %v7544_v44 = vmul.f32 %v11724_v39, %v7465_v16  ;;  %v7466_v47 = vadd.f32 %v11704_v53, %v7423_v35 }
 0x6a0   : > { %v7582_v21 = vsel %vm7503_vm9, %v7467_v59, %v7546_v24  ;;  %vm7504_vm11 = vcmp.gt.f32.partialorder %v7468_v31, 0.0  ;;  %v7547_v8 = vmul.f32 %v11724_v39, %v7468_v31 }
 0x6a1   : > { %v7839_v26 = vadd.f32 %v7766_v34, %v7582_v21  ;;  %v7580_v6 = vsel %vm7501_vm10, %v7465_v16, %v7544_v44  ;;  %vm7502_vm12 = vcmp.gt.f32.partialorder %v7466_v47, 0.0  ;;  %v7545_v57 = vmul.f32 %v11724_v39, %v7466_v47 }
 0x6a2   : > { %v7837_v33 = vadd.f32 %v7762_v40, %v7580_v6  ;;  %v7583_v0 = vsel %vm7504_vm11, %v7468_v31, %v7547_v8 }
 0x6a3   : > { %7875 = vst.msk [vmem:[%s11764_s21 + $0x110] sm:$0xff] %vm643_vm1, %v7839_v26  ;;  %v7840_v53 = vadd.f32 %v7768_v56, %v7583_v0  ;;  %v7581_v28 = vsel %vm7502_vm12, %v7466_v47, %v7545_v57 }
 0x6a4   : > { %7873 = vst.msk [vmem:[%s11764_s21 + $0x100] sm:$0xff] %vm643_vm1, %v7837_v33  ;;  %v7838_v10 = vadd.f32 %v7764_v51, %v7581_v28 }
 0x6a5   : > { %7876 = vst.msk [vmem:[%s11764_s21 + $0x118] sm:$0x3f] %vm4484_vm15, %v7840_v53 }
 0x6a6   : > { %7874 = vst.msk [vmem:[%s11764_s21 + $0x108] sm:$0xff] %vm643_vm1, %v7838_v10 }
 0x6a7 PF: > { %s20_s13 = sadd.s32 1, %s10204_s13  }
 0x6a8   : > { %p17_p4 = scmp.ge.s32.totalorder %s20_s13, 4  }
 0x6aa   :  { %19 = sbr.rel (!%p17_p4) target bundleno = 1 (0x1), region = 106 }

</bundles_post_ra>
